<compile_context>
chip_gen: v7x
topology: tpu7x:2x2x1
jax: 0.10.0
libtpu: 0.0.40
codegen_flags: <defaults>
</compile_context>

<pallas_src>
import functools

import jax
import jax.numpy as jnp
from jax.experimental import pallas as pl
from jax.experimental.pallas import tpu as pltpu

BN_EPS = 1e-3


def _round_up(v, m):
    return ((v + m - 1) // m) * m


# --------------------------------------------------------------------------
# Pallas kernels
# --------------------------------------------------------------------------
def _matmul_bias_kernel(x_ref, w_ref, b_ref, o_ref, *, apply_relu):
    # Fused conv-as-matmul (bf16 operands, f32 accumulate) + bias + optional ReLU.
    acc = jnp.dot(x_ref[...], w_ref[...], preferred_element_type=jnp.float32)
    y = acc + b_ref[...]
    if apply_relu:
        y = jnp.maximum(y, 0.0)
    o_ref[...] = y.astype(o_ref.dtype)


def _maxpool_reduce_kernel(x_ref, o_ref):
    # x: (k*k, TILE) shifted windows, lane-dense -> elementwise max over windows.
    o_ref[...] = jnp.max(x_ref[...], axis=0, keepdims=True)


def _mean_reduce_kernel(x_ref, o_ref):
    # x: (N, H*W, C) -> adaptive avg pool to (N, C). Tiny at this point (H*W<=1),
    # so a single un-gridded block is fine.
    o_ref[...] = jnp.mean(x_ref[...].astype(jnp.float32), axis=1).astype(o_ref.dtype)


# --------------------------------------------------------------------------
# Fused matmul wrapper
# --------------------------------------------------------------------------
def _pick_tm(M):
    if M >= 512:
        return 256          # fills the 2x256^2 MXU on v6e/v7x; harmless on v5e
    if M >= 128:
        return 128
    return _round_up(max(M, 1), 8)   # tiny layers (e.g. final FC, M=batch)


def matmul_bias(x, w, bias, *, apply_relu, out_dtype):
    """y = relu?( x @ w + bias ), tiled over rows of x.

    x: (M, K) bf16, w: (K, N) bf16 (BN scale pre-folded), bias: (N,) f32.
    K and N stay as full single blocks (all K/N in this net are <= a few hundred).
    """
    M, K = x.shape
    Kw, N = w.shape
    assert K == Kw
    TM = _pick_tm(M)
    M_pad = _round_up(M, TM)
    if M_pad != M:
        x = jnp.pad(x, ((0, M_pad - M), (0, 0)))
    out = pl.pallas_call(
        functools.partial(_matmul_bias_kernel, apply_relu=apply_relu),
        out_shape=jax.ShapeDtypeStruct((M_pad, N), out_dtype),
        grid=(M_pad // TM,),
        in_specs=[
            pl.BlockSpec((TM, K), lambda i: (i, 0)),
            pl.BlockSpec((K, N), lambda i: (0, 0)),
            pl.BlockSpec((1, N), lambda i: (0, 0)),
        ],
        out_specs=pl.BlockSpec((TM, N), lambda i: (i, 0)),
        compiler_params=pltpu.CompilerParams(dimension_semantics=("parallel",)),
    )(x, w, bias.reshape(1, N))
    return out[:M] if M_pad != M else out


# --------------------------------------------------------------------------
# Layer helpers (im2col / pooling glue in plain JAX, compute in Pallas)
# --------------------------------------------------------------------------
def _im2col(x, k, stride, pad):
    """x: (N, H, W, C) bf16 -> patches (N*Ho*Wo, k*k*C), ordering (dy, dx, c)."""
    N, H, W, C = x.shape
    Ho = (H + 2 * pad - k) // stride + 1
    Wo = (W + 2 * pad - k) // stride + 1
    xp = jnp.pad(x, ((0, 0), (pad, pad), (pad, pad), (0, 0)))
    cols = []
    for dy in range(k):
        for dx in range(k):
            cols.append(xp[:, dy:dy + stride * Ho:stride,
                           dx:dx + stride * Wo:stride, :])
    patches = jnp.concatenate(cols, axis=-1)
    return patches.reshape(N * Ho * Wo, k * k * C), N, Ho, Wo


def basic_conv2d(x, p):
    """Conv2d(bias=False) + BatchNorm2d(eval, folded) + ReLU, one Pallas matmul."""
    k, stride, pad = p["k"], p["stride"], p["pad"]
    N, H, W, C = x.shape
    if k == 1 and stride == 1 and pad == 0:
        # 1x1 conv: no im2col, plain reshape of the activation.
        y = matmul_bias(x.reshape(N * H * W, C), p["wm"], p["bias"],
                        apply_relu=True, out_dtype=jnp.bfloat16)
        return y.reshape(N, H, W, p["cout"])
    patches, N, Ho, Wo = _im2col(x, k, stride, pad)
    y = matmul_bias(patches, p["wm"], p["bias"],
                    apply_relu=True, out_dtype=jnp.bfloat16)
    return y.reshape(N, Ho, Wo, p["cout"])


def maxpool2d(x, k, stride, pad):
    """MaxPool2d(..., ceil_mode=True) in NHWC; reduction done in a gridded,
    lane-dense Pallas kernel."""
    N, H, W, C = x.shape

    def out_size(L):
        o = -(-(L + 2 * pad - k) // stride) + 1       # ceil mode
        if pad > 0 and (o - 1) * stride >= L + pad:   # PyTorch ceil adjustment
            o -= 1
        return o

    Ho, Wo = out_size(H), out_size(W)
    pad_b = max(0, (Ho - 1) * stride + k - H - pad)
    pad_r = max(0, (Wo - 1) * stride + k - W - pad)
    xp = jnp.pad(x, ((0, 0), (pad, pad_b), (pad, pad_r), (0, 0)),
                 constant_values=-jnp.inf)
    wins = []
    for dy in range(k):
        for dx in range(k):
            wins.append(xp[:, dy:dy + stride * Ho:stride,
                           dx:dx + stride * Wo:stride, :])
    kk = k * k
    L = N * Ho * Wo * C
    stacked = jnp.stack(wins, axis=0).reshape(kk, L)
    # Lane-dense flattening: pad the flattened (rows*channels) axis to a multiple
    # of 128 and tile it so the reduction is pipelined instead of one huge block.
    TILE = min(_round_up(L, 128), 2048)
    L_pad = _round_up(L, TILE)
    if L_pad != L:
        stacked = jnp.pad(stacked, ((0, 0), (0, L_pad - L)))
    out = pl.pallas_call(
        _maxpool_reduce_kernel,
        out_shape=jax.ShapeDtypeStruct((1, L_pad), x.dtype),
        grid=(L_pad // TILE,),
        in_specs=[pl.BlockSpec((kk, TILE), lambda i: (0, i))],
        out_specs=pl.BlockSpec((1, TILE), lambda i: (0, i)),
        compiler_params=pltpu.CompilerParams(dimension_semantics=("parallel",)),
    )(stacked)
    return out[0, :L].reshape(N, Ho, Wo, C)


def inception(x, p):
    """Inception block with branch fusion:
       - one matmul for the three 1x1 branches that share input x,
       - one matmul (block-diagonal weights) for the two 3x3 branches,
       - one matmul for the pool-proj branch.
    Channel order of the output matches torch.cat([b1, b2, b3, b4], dim=1)."""
    N, H, W, C = x.shape
    M = N * H * W
    xm = x.reshape(M, C)

    c1, c2a, c3a = p["c1"], p["c2a"], p["c3a"]
    c2, c3, c4 = p["c2"], p["c3"], p["c4"]

    # Fused 1x1 branches: [branch1 | branch2-reduce | branch3-reduce].
    y = matmul_bias(xm, p["w1x1"], p["b1x1"], apply_relu=True,
                    out_dtype=jnp.bfloat16)
    b1 = y[:, :c1].reshape(N, H, W, c1)
    red = y[:, c1:].reshape(N, H, W, c2a + c3a)   # stays concatenated for the 3x3s

    # Fused 3x3 branches (block-diagonal weight): [branch2-out | branch3-out].
    patches, _, Ho, Wo = _im2col(red, 3, 1, 1)
    y23 = matmul_bias(patches, p["w3x3"], p["b3x3"], apply_relu=True,
                      out_dtype=jnp.bfloat16)
    b23 = y23.reshape(N, Ho, Wo, c2 + c3)

    # Branch4: maxpool + 1x1.
    pooled = maxpool2d(x, 3, 1, 1)
    b4 = matmul_bias(pooled.reshape(M, C), p["w4"], p["b4"], apply_relu=True,
                     out_dtype=jnp.bfloat16).reshape(N, H, W, c4)

    return jnp.concatenate([b1, b23, b4], axis=-1)


# --------------------------------------------------------------------------
# Deterministic parameter construction (matches module __init__ shapes)
# --------------------------------------------------------------------------
def _trunc_normal(key, shape, std=0.01):
    return jax.random.truncated_normal(key, -2.0, 2.0, shape, jnp.float32) * std


def make_conv(key, cin, cout, k, stride=1, pad=0):
    w = _trunc_normal(key, (cout, cin, k, k))  # PyTorch OIHW, truncnorm(std=0.01)
    # BatchNorm2d eval-mode fold (gamma=1, beta=0, mean=0, var=1):
    #   scale = 1/sqrt(var+eps) is folded straight into the weights; bias = 0.
    scale = 1.0 / float(jnp.sqrt(1.0 + BN_EPS))
    wm = (jnp.transpose(w, (2, 3, 1, 0)).reshape(k * k * cin, cout) * scale)
    return dict(wm=wm.astype(jnp.bfloat16),
                bias=jnp.zeros((cout,), jnp.float32),
                k=k, stride=stride, pad=pad, cin=cin, cout=cout)


def make_inception(key, cin, ch1x1, ch3x3red, ch3x3, ch5x5red, ch5x5, pool_proj):
    ks = jax.random.split(key, 6)
    b1 = make_conv(ks[0], cin, ch1x1, 1)
    b2a = make_conv(ks[1], cin, ch3x3red, 1)
    b2b = make_conv(ks[2], ch3x3red, ch3x3, 3, pad=1)
    b3a = make_conv(ks[3], cin, ch5x5red, 1)
    b3b = make_conv(ks[4], ch5x5red, ch5x5, 3, pad=1)
    b4 = make_conv(ks[5], cin, pool_proj, 1)

    # Fuse the three 1x1 branches that share the same input (concat along Cout).
    w1x1 = jnp.concatenate([b1["wm"], b2a["wm"], b3a["wm"]], axis=1)
    b1x1 = jnp.concatenate([b1["bias"], b2a["bias"], b3a["bias"]])

    # Fuse the two 3x3 branches via a block-diagonal weight:
    #   input channels  = [b2a-out | b3a-out]
    #   output channels = [b2b-out | b3b-out]
    cin23 = ch3x3red + ch5x5red
    cout23 = ch3x3 + ch5x5
    w2b = b2b["wm"].reshape(9, ch3x3red, ch3x3)
    w3b = b3b["wm"].reshape(9, ch5x5red, ch5x5)
    wblk = jnp.zeros((9, cin23, cout23), jnp.bfloat16)
    wblk = wblk.at[:, :ch3x3red, :ch3x3].set(w2b)
    wblk = wblk.at[:, ch3x3red:, ch3x3:].set(w3b)
    w3x3 = wblk.reshape(9 * cin23, cout23)
    b3x3 = jnp.concatenate([b2b["bias"], b3b["bias"]])

    return dict(w1x1=w1x1, b1x1=b1x1, w3x3=w3x3, b3x3=b3x3,
                w4=b4["wm"], b4=b4["bias"],
                c1=ch1x1, c2a=ch3x3red, c3a=ch5x5red,
                c2=ch3x3, c3=ch5x5, c4=pool_proj)


def build_googlenet(key, cfg, num_classes=100):
    keys = jax.random.split(key, 16)
    params = {}
    params["conv1"] = make_conv(keys[0], 3, cfg[0], 7, stride=2, pad=3)
    params["conv2"] = make_conv(keys[1], cfg[0], cfg[1], 1)
    params["conv3"] = make_conv(keys[2], cfg[1], cfg[2], 3, pad=1)
    cur = 2
    in_ch = cfg[2]
    names = ["3a", "3b", "4a", "4b", "4c", "4d", "4e", "5a", "5b"]
    for idx, name in enumerate(names):
        c = cfg[cur + 1:cur + 7]
        params["inception" + name] = make_inception(keys[3 + idx], in_ch, *c)
        in_ch = c[0] + c[2] + c[4] + c[5]
        cur += 6
    fc_w = _trunc_normal(keys[12], (num_classes, in_ch))
    params["fc_wm"] = fc_w.T.astype(jnp.bfloat16)          # (in_ch, num_classes)
    params["fc_b"] = jnp.zeros((num_classes,), jnp.float32)  # deterministic bias
    return params


# --------------------------------------------------------------------------
# Forward (transform_input=False, aux_logits=False, eval mode)
# --------------------------------------------------------------------------
def googlenet_forward(x_nchw, params):
    x = jnp.transpose(x_nchw, (0, 2, 3, 1)).astype(jnp.bfloat16)   # NCHW -> NHWC, bf16
    x = basic_conv2d(x, params["conv1"])
    x = maxpool2d(x, 3, 2, 0)
    x = basic_conv2d(x, params["conv2"])
    x = basic_conv2d(x, params["conv3"])
    x = maxpool2d(x, 3, 2, 0)
    x = inception(x, params["inception3a"])
    x = inception(x, params["inception3b"])
    x = maxpool2d(x, 3, 2, 0)
    for name in ["4a", "4b", "4c", "4d", "4e"]:
        x = inception(x, params["inception" + name])
    x = maxpool2d(x, 2, 2, 0)
    x = inception(x, params["inception5a"])
    x = inception(x, params["inception5b"])

    # AdaptiveAvgPool2d((1,1)) + flatten, via a (tiny) Pallas mean-reduction.
    N, H, W, C = x.shape
    feat = pl.pallas_call(
        _mean_reduce_kernel,
        out_shape=jax.ShapeDtypeStruct((N, C), jnp.float32),
    )(x.reshape(N, H * W, C))

    # Dropout(0.2) is identity in eval mode.
    # Final FC: M = batch (tiny) -> matmul_bias uses a single 8-row tile.
    logits = matmul_bias(feat.astype(jnp.bfloat16), params["fc_wm"],
                         params["fc_b"], apply_relu=False, out_dtype=jnp.float32)
    return logits


if __name__ == "__main__":
    # Small GoogLeNet-style cfg: [conv1, conv2, conv3, then 9 x (ch1x1, ch3x3red,
    # ch3x3, ch5x5red, ch5x5, pool_proj)].
    cfg = [8, 8, 16,
           4, 4, 8, 2, 4, 4,      # 3a -> 20 ch
           4, 4, 8, 2, 4, 4,      # 3b -> 20 ch
           8, 4, 8, 2, 4, 4,      # 4a -> 24 ch
           8, 4, 8, 2, 4, 4,      # 4b -> 24 ch
           8, 4, 8, 2, 4, 4,      # 4c -> 24 ch
           8, 4, 8, 2, 4, 4,      # 4d -> 24 ch
           8, 8, 16, 4, 8, 8,     # 4e -> 40 ch
           8, 8, 16, 4, 8, 8,     # 5a -> 40 ch
           8, 8, 16, 4, 8, 8]     # 5b -> 40 ch

    key = jax.random.PRNGKey(0)
    kp, kx = jax.random.split(key)
    params = build_googlenet(kp, cfg, num_classes=100)

    x = jax.random.normal(kx, (2, 3, 32, 32), jnp.float32)   # NCHW like PyTorch

    fwd = jax.jit(lambda xx: googlenet_forward(xx, params))
    out = fwd(x)
    out = jax.block_until_ready(out)
    assert out.shape == (2, 100), out.shape
    assert bool(jnp.all(jnp.isfinite(out)))
    print("KERNEL_OK")
</pallas_src>

<mosaic_0001>
module attributes {stable_mosaic.version = 11 : i64} {
  func.func @_matmul_bias_kernel(%arg0: i32, %arg1: memref<256x147xbf16, #tpu.memory_space<vmem>>, %arg2: memref<147x8xbf16, #tpu.memory_space<vmem>>, %arg3: memref<1x8xf32, #tpu.memory_space<vmem>>, %arg4: memref<256x8xbf16, #tpu.memory_space<vmem>>) attributes {dimension_semantics = [#tpu.dimension_semantics<parallel>], iteration_bounds = array<i64: 2>, scalar_prefetch = 0 : i64, scratch_operands = 0 : i64, tpu.core_type = #tpu.core_type<tc>, window_params = [{transform_indices = @transform_0, window_bounds = array<i64: 256, 147>}, {pipeline_mode = #tpu.pipeline_mode<synchronous>, transform_indices = @transform_1, window_bounds = array<i64: 147, 8>}, {pipeline_mode = #tpu.pipeline_mode<synchronous>, transform_indices = @transform_2, window_bounds = array<i64: 1, 8>}, {transform_indices = @transform_3, window_bounds = array<i64: 256, 8>}]} {
    %c0 = arith.constant 0 : index
    %c0_0 = arith.constant 0 : index
    %0 = vector.load %arg1[%c0, %c0_0] : memref<256x147xbf16, #tpu.memory_space<vmem>>, vector<256x147xbf16>
    %c0_1 = arith.constant 0 : index
    %c0_2 = arith.constant 0 : index
    %1 = vector.load %arg2[%c0_1, %c0_2] : memref<147x8xbf16, #tpu.memory_space<vmem>>, vector<147x8xbf16>
    %cst = arith.constant dense<0.000000e+00> : vector<256x8xf32>
    %2 = tpu.matmul %0, %1, %cst {dimension_numbers = #tpu.dot_dimension_numbers<[1], [0], [0], [1], [0, 0, 1, 1], [], []>} : vector<256x147xbf16>, vector<147x8xbf16>, vector<256x8xf32> -> vector<256x8xf32>
    %c0_3 = arith.constant 0 : index
    %c0_4 = arith.constant 0 : index
    %3 = vector.load %arg3[%c0_3, %c0_4] : memref<1x8xf32, #tpu.memory_space<vmem>>, vector<1x8xf32>
    %4 = vector.broadcast %3 : vector<1x8xf32> to vector<256x8xf32>
    %5 = arith.addf %2, %4 : vector<256x8xf32>
    %cst_5 = arith.constant 0.000000e+00 : f32
    %6 = vector.broadcast %cst_5 : f32 to vector<256x8xf32>
    %7 = arith.maximumf %5, %6 : vector<256x8xf32>
    %8 = arith.truncf %7 : vector<256x8xf32> to vector<256x8xbf16>
    %c0_6 = arith.constant 0 : index
    %c0_7 = arith.constant 0 : index
    %9 = vector.load %arg4[%c0_6, %c0_7] : memref<256x8xbf16, #tpu.memory_space<vmem>>, vector<256x8xbf16>
    tpu.vector_store %arg4[%c0_6, %c0_7], %8 {strides = array<i32>} : memref<256x8xbf16, #tpu.memory_space<vmem>>, vector<256x8xbf16>,
    return
  }
  func.func @transform_0(%arg0: i32) -> (i32, i32) {
    %c0_i32 = arith.constant 0 : i32
    %c0_i32_0 = arith.constant 0 : i32
    return %arg0, %c0_i32 : i32, i32
  }
  func.func @transform_1(%arg0: i32) -> (i32, i32) {
    %c0_i32 = arith.constant 0 : i32
    %c0_i32_0 = arith.constant 0 : i32
    %c0_i32_1 = arith.constant 0 : i32
    return %c0_i32, %c0_i32_0 : i32, i32
  }
  func.func @transform_2(%arg0: i32) -> (i32, i32) {
    %c0_i32 = arith.constant 0 : i32
    %c0_i32_0 = arith.constant 0 : i32
    %c0_i32_1 = arith.constant 0 : i32
    return %c0_i32, %c0_i32_0 : i32, i32
  }
  func.func @transform_3(%arg0: i32) -> (i32, i32) {
    %c0_i32 = arith.constant 0 : i32
    %c0_i32_0 = arith.constant 0 : i32
    return %arg0, %c0_i32 : i32, i32
  }
}

module attributes {stable_mosaic.version = 11 : i64} {
  func.func @_maxpool_reduce_kernel(%arg0: i32, %arg1: memref<9x1024xbf16, #tpu.memory_space<vmem>>, %arg2: memref<1x1024xbf16, #tpu.memory_space<vmem>>) attributes {dimension_semantics = [#tpu.dimension_semantics<parallel>], iteration_bounds = array<i64: 1>, scalar_prefetch = 0 : i64, scratch_operands = 0 : i64, tpu.core_type = #tpu.core_type<tc>, window_params = [{transform_indices = @transform_0, window_bounds = array<i64: 9, 1024>}, {transform_indices = @transform_1, window_bounds = array<i64: 1, 1024>}]} {
    %c0 = arith.constant 0 : index
    %c0_0 = arith.constant 0 : index
    %0 = vector.load %arg1[%c0, %c0_0] : memref<9x1024xbf16, #tpu.memory_space<vmem>>, vector<9x1024xbf16>
    %cst = arith.constant dense<0xFF80> : vector<1024xbf16>
    %1 = vector.multi_reduction <maximumf>, %0, %cst [0] : vector<9x1024xbf16> to vector<1024xbf16>
    %2 = vector.shape_cast %1 : vector<1024xbf16> to vector<1x1024xbf16>
    %c0_1 = arith.constant 0 : index
    %c0_2 = arith.constant 0 : index
    %3 = vector.load %arg2[%c0_1, %c0_2] : memref<1x1024xbf16, #tpu.memory_space<vmem>>, vector<1x1024xbf16>
    tpu.vector_store %arg2[%c0_1, %c0_2], %2 {strides = array<i32>} : memref<1x1024xbf16, #tpu.memory_space<vmem>>, vector<1x1024xbf16>,
    return
  }
  func.func @transform_0(%arg0: i32) -> (i32, i32) {
    %c0_i32 = arith.constant 0 : i32
    %c0_i32_0 = arith.constant 0 : i32
    return %c0_i32, %arg0 : i32, i32
  }
  func.func @transform_1(%arg0: i32) -> (i32, i32) {
    %c0_i32 = arith.constant 0 : i32
    %c0_i32_0 = arith.constant 0 : i32
    return %c0_i32, %arg0 : i32, i32
  }
}

module attributes {stable_mosaic.version = 11 : i64} {
  func.func @_matmul_bias_kernel(%arg0: i32, %arg1: memref<128x8xbf16, #tpu.memory_space<vmem>>, %arg2: memref<8x8xbf16, #tpu.memory_space<vmem>>, %arg3: memref<1x8xf32, #tpu.memory_space<vmem>>, %arg4: memref<128x8xbf16, #tpu.memory_space<vmem>>) attributes {dimension_semantics = [#tpu.dimension_semantics<parallel>], iteration_bounds = array<i64: 1>, scalar_prefetch = 0 : i64, scratch_operands = 0 : i64, tpu.core_type = #tpu.core_type<tc>, window_params = [{transform_indices = @transform_0, window_bounds = array<i64: 128, 8>}, {pipeline_mode = #tpu.pipeline_mode<synchronous>, transform_indices = @transform_1, window_bounds = array<i64: 8, 8>}, {pipeline_mode = #tpu.pipeline_mode<synchronous>, transform_indices = @transform_2, window_bounds = array<i64: 1, 8>}, {transform_indices = @transform_3, window_bounds = array<i64: 128, 8>}]} {
    %c0 = arith.constant 0 : index
    %c0_0 = arith.constant 0 : index
    %0 = vector.load %arg1[%c0, %c0_0] : memref<128x8xbf16, #tpu.memory_space<vmem>>, vector<128x8xbf16>
    %c0_1 = arith.constant 0 : index
    %c0_2 = arith.constant 0 : index
    %1 = vector.load %arg2[%c0_1, %c0_2] : memref<8x8xbf16, #tpu.memory_space<vmem>>, vector<8x8xbf16>
    %cst = arith.constant dense<0.000000e+00> : vector<128x8xf32>
    %2 = tpu.matmul %0, %1, %cst {dimension_numbers = #tpu.dot_dimension_numbers<[1], [0], [0], [1], [0, 0, 1, 1], [], []>} : vector<128x8xbf16>, vector<8x8xbf16>, vector<128x8xf32> -> vector<128x8xf32>
    %c0_3 = arith.constant 0 : index
    %c0_4 = arith.constant 0 : index
    %3 = vector.load %arg3[%c0_3, %c0_4] : memref<1x8xf32, #tpu.memory_space<vmem>>, vector<1x8xf32>
    %4 = vector.broadcast %3 : vector<1x8xf32> to vector<128x8xf32>
    %5 = arith.addf %2, %4 : vector<128x8xf32>
    %cst_5 = arith.constant 0.000000e+00 : f32
    %6 = vector.broadcast %cst_5 : f32 to vector<128x8xf32>
    %7 = arith.maximumf %5, %6 : vector<128x8xf32>
    %8 = arith.truncf %7 : vector<128x8xf32> to vector<128x8xbf16>
    %c0_6 = arith.constant 0 : index
    %c0_7 = arith.constant 0 : index
    %9 = vector.load %arg4[%c0_6, %c0_7] : memref<128x8xbf16, #tpu.memory_space<vmem>>, vector<128x8xbf16>
    tpu.vector_store %arg4[%c0_6, %c0_7], %8 {strides = array<i32>} : memref<128x8xbf16, #tpu.memory_space<vmem>>, vector<128x8xbf16>,
    return
  }
  func.func @transform_0(%arg0: i32) -> (i32, i32) {
    %c0_i32 = arith.constant 0 : i32
    %c0_i32_0 = arith.constant 0 : i32
    return %arg0, %c0_i32 : i32, i32
  }
  func.func @transform_1(%arg0: i32) -> (i32, i32) {
    %c0_i32 = arith.constant 0 : i32
    %c0_i32_0 = arith.constant 0 : i32
    %c0_i32_1 = arith.constant 0 : i32
    return %c0_i32, %c0_i32_0 : i32, i32
  }
  func.func @transform_2(%arg0: i32) -> (i32, i32) {
    %c0_i32 = arith.constant 0 : i32
    %c0_i32_0 = arith.constant 0 : i32
    %c0_i32_1 = arith.constant 0 : i32
    return %c0_i32, %c0_i32_0 : i32, i32
  }
  func.func @transform_3(%arg0: i32) -> (i32, i32) {
    %c0_i32 = arith.constant 0 : i32
    %c0_i32_0 = arith.constant 0 : i32
    return %arg0, %c0_i32 : i32, i32
  }
}

module attributes {stable_mosaic.version = 11 : i64} {
  func.func @_matmul_bias_kernel(%arg0: i32, %arg1: memref<128x72xbf16, #tpu.memory_space<vmem>>, %arg2: memref<72x16xbf16, #tpu.memory_space<vmem>>, %arg3: memref<1x16xf32, #tpu.memory_space<vmem>>, %arg4: memref<128x16xbf16, #tpu.memory_space<vmem>>) attributes {dimension_semantics = [#tpu.dimension_semantics<parallel>], iteration_bounds = array<i64: 1>, scalar_prefetch = 0 : i64, scratch_operands = 0 : i64, tpu.core_type = #tpu.core_type<tc>, window_params = [{transform_indices = @transform_0, window_bounds = array<i64: 128, 72>}, {pipeline_mode = #tpu.pipeline_mode<synchronous>, transform_indices = @transform_1, window_bounds = array<i64: 72, 16>}, {pipeline_mode = #tpu.pipeline_mode<synchronous>, transform_indices = @transform_2, window_bounds = array<i64: 1, 16>}, {transform_indices = @transform_3, window_bounds = array<i64: 128, 16>}]} {
    %c0 = arith.constant 0 : index
    %c0_0 = arith.constant 0 : index
    %0 = vector.load %arg1[%c0, %c0_0] : memref<128x72xbf16, #tpu.memory_space<vmem>>, vector<128x72xbf16>
    %c0_1 = arith.constant 0 : index
    %c0_2 = arith.constant 0 : index
    %1 = vector.load %arg2[%c0_1, %c0_2] : memref<72x16xbf16, #tpu.memory_space<vmem>>, vector<72x16xbf16>
    %cst = arith.constant dense<0.000000e+00> : vector<128x16xf32>
    %2 = tpu.matmul %0, %1, %cst {dimension_numbers = #tpu.dot_dimension_numbers<[1], [0], [0], [1], [0, 0, 1, 1], [], []>} : vector<128x72xbf16>, vector<72x16xbf16>, vector<128x16xf32> -> vector<128x16xf32>
    %c0_3 = arith.constant 0 : index
    %c0_4 = arith.constant 0 : index
    %3 = vector.load %arg3[%c0_3, %c0_4] : memref<1x16xf32, #tpu.memory_space<vmem>>, vector<1x16xf32>
    %4 = vector.broadcast %3 : vector<1x16xf32> to vector<128x16xf32>
    %5 = arith.addf %2, %4 : vector<128x16xf32>
    %cst_5 = arith.constant 0.000000e+00 : f32
    %6 = vector.broadcast %cst_5 : f32 to vector<128x16xf32>
    %7 = arith.maximumf %5, %6 : vector<128x16xf32>
    %8 = arith.truncf %7 : vector<128x16xf32> to vector<128x16xbf16>
    %c0_6 = arith.constant 0 : index
    %c0_7 = arith.constant 0 : index
    %9 = vector.load %arg4[%c0_6, %c0_7] : memref<128x16xbf16, #tpu.memory_space<vmem>>, vector<128x16xbf16>
    tpu.vector_store %arg4[%c0_6, %c0_7], %8 {strides = array<i32>} : memref<128x16xbf16, #tpu.memory_space<vmem>>, vector<128x16xbf16>,
    return
  }
  func.func @transform_0(%arg0: i32) -> (i32, i32) {
    %c0_i32 = arith.constant 0 : i32
    %c0_i32_0 = arith.constant 0 : i32
    return %arg0, %c0_i32 : i32, i32
  }
  func.func @transform_1(%arg0: i32) -> (i32, i32) {
    %c0_i32 = arith.constant 0 : i32
    %c0_i32_0 = arith.constant 0 : i32
    %c0_i32_1 = arith.constant 0 : i32
    return %c0_i32, %c0_i32_0 : i32, i32
  }
  func.func @transform_2(%arg0: i32) -> (i32, i32) {
    %c0_i32 = arith.constant 0 : i32
    %c0_i32_0 = arith.constant 0 : i32
    %c0_i32_1 = arith.constant 0 : i32
    return %c0_i32, %c0_i32_0 : i32, i32
  }
  func.func @transform_3(%arg0: i32) -> (i32, i32) {
    %c0_i32 = arith.constant 0 : i32
    %c0_i32_0 = arith.constant 0 : i32
    return %arg0, %c0_i32 : i32, i32
  }
}

module attributes {stable_mosaic.version = 11 : i64} {
  func.func @_maxpool_reduce_kernel(%arg0: i32, %arg1: memref<9x512xbf16, #tpu.memory_space<vmem>>, %arg2: memref<1x512xbf16, #tpu.memory_space<vmem>>) attributes {dimension_semantics = [#tpu.dimension_semantics<parallel>], iteration_bounds = array<i64: 1>, scalar_prefetch = 0 : i64, scratch_operands = 0 : i64, tpu.core_type = #tpu.core_type<tc>, window_params = [{transform_indices = @transform_0, window_bounds = array<i64: 9, 512>}, {transform_indices = @transform_1, window_bounds = array<i64: 1, 512>}]} {
    %c0 = arith.constant 0 : index
    %c0_0 = arith.constant 0 : index
    %0 = vector.load %arg1[%c0, %c0_0] : memref<9x512xbf16, #tpu.memory_space<vmem>>, vector<9x512xbf16>
    %cst = arith.constant dense<0xFF80> : vector<512xbf16>
    %1 = vector.multi_reduction <maximumf>, %0, %cst [0] : vector<9x512xbf16> to vector<512xbf16>
    %2 = vector.shape_cast %1 : vector<512xbf16> to vector<1x512xbf16>
    %c0_1 = arith.constant 0 : index
    %c0_2 = arith.constant 0 : index
    %3 = vector.load %arg2[%c0_1, %c0_2] : memref<1x512xbf16, #tpu.memory_space<vmem>>, vector<1x512xbf16>
    tpu.vector_store %arg2[%c0_1, %c0_2], %2 {strides = array<i32>} : memref<1x512xbf16, #tpu.memory_space<vmem>>, vector<1x512xbf16>,
    return
  }
  func.func @transform_0(%arg0: i32) -> (i32, i32) {
    %c0_i32 = arith.constant 0 : i32
    %c0_i32_0 = arith.constant 0 : i32
    return %c0_i32, %arg0 : i32, i32
  }
  func.func @transform_1(%arg0: i32) -> (i32, i32) {
    %c0_i32 = arith.constant 0 : i32
    %c0_i32_0 = arith.constant 0 : i32
    return %c0_i32, %arg0 : i32, i32
  }
}

module attributes {stable_mosaic.version = 11 : i64} {
  func.func @_matmul_bias_kernel(%arg0: i32, %arg1: memref<32x16xbf16, #tpu.memory_space<vmem>>, %arg2: memref<16x10xbf16, #tpu.memory_space<vmem>>, %arg3: memref<1x10xf32, #tpu.memory_space<vmem>>, %arg4: memref<32x10xbf16, #tpu.memory_space<vmem>>) attributes {dimension_semantics = [#tpu.dimension_semantics<parallel>], iteration_bounds = array<i64: 1>, scalar_prefetch = 0 : i64, scratch_operands = 0 : i64, tpu.core_type = #tpu.core_type<tc>, window_params = [{transform_indices = @transform_0, window_bounds = array<i64: 32, 16>}, {pipeline_mode = #tpu.pipeline_mode<synchronous>, transform_indices = @transform_1, window_bounds = array<i64: 16, 10>}, {pipeline_mode = #tpu.pipeline_mode<synchronous>, transform_indices = @transform_2, window_bounds = array<i64: 1, 10>}, {transform_indices = @transform_3, window_bounds = array<i64: 32, 10>}]} {
    %c0 = arith.constant 0 : index
    %c0_0 = arith.constant 0 : index
    %0 = vector.load %arg1[%c0, %c0_0] : memref<32x16xbf16, #tpu.memory_space<vmem>>, vector<32x16xbf16>
    %c0_1 = arith.constant 0 : index
    %c0_2 = arith.constant 0 : index
    %1 = vector.load %arg2[%c0_1, %c0_2] : memref<16x10xbf16, #tpu.memory_space<vmem>>, vector<16x10xbf16>
    %cst = arith.constant dense<0.000000e+00> : vector<32x10xf32>
    %2 = tpu.matmul %0, %1, %cst {dimension_numbers = #tpu.dot_dimension_numbers<[1], [0], [0], [1], [0, 0, 1, 1], [], []>} : vector<32x16xbf16>, vector<16x10xbf16>, vector<32x10xf32> -> vector<32x10xf32>
    %c0_3 = arith.constant 0 : index
    %c0_4 = arith.constant 0 : index
    %3 = vector.load %arg3[%c0_3, %c0_4] : memref<1x10xf32, #tpu.memory_space<vmem>>, vector<1x10xf32>
    %4 = vector.broadcast %3 : vector<1x10xf32> to vector<32x10xf32>
    %5 = arith.addf %2, %4 : vector<32x10xf32>
    %cst_5 = arith.constant 0.000000e+00 : f32
    %6 = vector.broadcast %cst_5 : f32 to vector<32x10xf32>
    %7 = arith.maximumf %5, %6 : vector<32x10xf32>
    %8 = arith.truncf %7 : vector<32x10xf32> to vector<32x10xbf16>
    %c0_6 = arith.constant 0 : index
    %c0_7 = arith.constant 0 : index
    %9 = vector.load %arg4[%c0_6, %c0_7] : memref<32x10xbf16, #tpu.memory_space<vmem>>, vector<32x10xbf16>
    tpu.vector_store %arg4[%c0_6, %c0_7], %8 {strides = array<i32>} : memref<32x10xbf16, #tpu.memory_space<vmem>>, vector<32x10xbf16>,
    return
  }
  func.func @transform_0(%arg0: i32) -> (i32, i32) {
    %c0_i32 = arith.constant 0 : i32
    %c0_i32_0 = arith.constant 0 : i32
    return %arg0, %c0_i32 : i32, i32
  }
  func.func @transform_1(%arg0: i32) -> (i32, i32) {
    %c0_i32 = arith.constant 0 : i32
    %c0_i32_0 = arith.constant 0 : i32
    %c0_i32_1 = arith.constant 0 : i32
    return %c0_i32, %c0_i32_0 : i32, i32
  }
  func.func @transform_2(%arg0: i32) -> (i32, i32) {
    %c0_i32 = arith.constant 0 : i32
    %c0_i32_0 = arith.constant 0 : i32
    %c0_i32_1 = arith.constant 0 : i32
    return %c0_i32, %c0_i32_0 : i32, i32
  }
  func.func @transform_3(%arg0: i32) -> (i32, i32) {
    %c0_i32 = arith.constant 0 : i32
    %c0_i32_0 = arith.constant 0 : i32
    return %arg0, %c0_i32 : i32, i32
  }
}

module attributes {stable_mosaic.version = 11 : i64} {
  func.func @_matmul_bias_kernel(%arg0: i32, %arg1: memref<32x54xbf16, #tpu.memory_space<vmem>>, %arg2: memref<54x12xbf16, #tpu.memory_space<vmem>>, %arg3: memref<1x12xf32, #tpu.memory_space<vmem>>, %arg4: memref<32x12xbf16, #tpu.memory_space<vmem>>) attributes {dimension_semantics = [#tpu.dimension_semantics<parallel>], iteration_bounds = array<i64: 1>, scalar_prefetch = 0 : i64, scratch_operands = 0 : i64, tpu.core_type = #tpu.core_type<tc>, window_params = [{transform_indices = @transform_0, window_bounds = array<i64: 32, 54>}, {pipeline_mode = #tpu.pipeline_mode<synchronous>, transform_indices = @transform_1, window_bounds = array<i64: 54, 12>}, {pipeline_mode = #tpu.pipeline_mode<synchronous>, transform_indices = @transform_2, window_bounds = array<i64: 1, 12>}, {transform_indices = @transform_3, window_bounds = array<i64: 32, 12>}]} {
    %c0 = arith.constant 0 : index
    %c0_0 = arith.constant 0 : index
    %0 = vector.load %arg1[%c0, %c0_0] : memref<32x54xbf16, #tpu.memory_space<vmem>>, vector<32x54xbf16>
    %c0_1 = arith.constant 0 : index
    %c0_2 = arith.constant 0 : index
    %1 = vector.load %arg2[%c0_1, %c0_2] : memref<54x12xbf16, #tpu.memory_space<vmem>>, vector<54x12xbf16>
    %cst = arith.constant dense<0.000000e+00> : vector<32x12xf32>
    %2 = tpu.matmul %0, %1, %cst {dimension_numbers = #tpu.dot_dimension_numbers<[1], [0], [0], [1], [0, 0, 1, 1], [], []>} : vector<32x54xbf16>, vector<54x12xbf16>, vector<32x12xf32> -> vector<32x12xf32>
    %c0_3 = arith.constant 0 : index
    %c0_4 = arith.constant 0 : index
    %3 = vector.load %arg3[%c0_3, %c0_4] : memref<1x12xf32, #tpu.memory_space<vmem>>, vector<1x12xf32>
    %4 = vector.broadcast %3 : vector<1x12xf32> to vector<32x12xf32>
    %5 = arith.addf %2, %4 : vector<32x12xf32>
    %cst_5 = arith.constant 0.000000e+00 : f32
    %6 = vector.broadcast %cst_5 : f32 to vector<32x12xf32>
    %7 = arith.maximumf %5, %6 : vector<32x12xf32>
    %8 = arith.truncf %7 : vector<32x12xf32> to vector<32x12xbf16>
    %c0_6 = arith.constant 0 : index
    %c0_7 = arith.constant 0 : index
    %9 = vector.load %arg4[%c0_6, %c0_7] : memref<32x12xbf16, #tpu.memory_space<vmem>>, vector<32x12xbf16>
    tpu.vector_store %arg4[%c0_6, %c0_7], %8 {strides = array<i32>} : memref<32x12xbf16, #tpu.memory_space<vmem>>, vector<32x12xbf16>,
    return
  }
  func.func @transform_0(%arg0: i32) -> (i32, i32) {
    %c0_i32 = arith.constant 0 : i32
    %c0_i32_0 = arith.constant 0 : i32
    return %arg0, %c0_i32 : i32, i32
  }
  func.func @transform_1(%arg0: i32) -> (i32, i32) {
    %c0_i32 = arith.constant 0 : i32
    %c0_i32_0 = arith.constant 0 : i32
    %c0_i32_1 = arith.constant 0 : i32
    return %c0_i32, %c0_i32_0 : i32, i32
  }
  func.func @transform_2(%arg0: i32) -> (i32, i32) {
    %c0_i32 = arith.constant 0 : i32
    %c0_i32_0 = arith.constant 0 : i32
    %c0_i32_1 = arith.constant 0 : i32
    return %c0_i32, %c0_i32_0 : i32, i32
  }
  func.func @transform_3(%arg0: i32) -> (i32, i32) {
    %c0_i32 = arith.constant 0 : i32
    %c0_i32_0 = arith.constant 0 : i32
    return %arg0, %c0_i32 : i32, i32
  }
}

module attributes {stable_mosaic.version = 11 : i64} {
  func.func @_matmul_bias_kernel(%arg0: i32, %arg1: memref<32x16xbf16, #tpu.memory_space<vmem>>, %arg2: memref<16x4xbf16, #tpu.memory_space<vmem>>, %arg3: memref<1x4xf32, #tpu.memory_space<vmem>>, %arg4: memref<32x4xbf16, #tpu.memory_space<vmem>>) attributes {dimension_semantics = [#tpu.dimension_semantics<parallel>], iteration_bounds = array<i64: 1>, scalar_prefetch = 0 : i64, scratch_operands = 0 : i64, tpu.core_type = #tpu.core_type<tc>, window_params = [{transform_indices = @transform_0, window_bounds = array<i64: 32, 16>}, {pipeline_mode = #tpu.pipeline_mode<synchronous>, transform_indices = @transform_1, window_bounds = array<i64: 16, 4>}, {pipeline_mode = #tpu.pipeline_mode<synchronous>, transform_indices = @transform_2, window_bounds = array<i64: 1, 4>}, {transform_indices = @transform_3, window_bounds = array<i64: 32, 4>}]} {
    %c0 = arith.constant 0 : index
    %c0_0 = arith.constant 0 : index
    %0 = vector.load %arg1[%c0, %c0_0] : memref<32x16xbf16, #tpu.memory_space<vmem>>, vector<32x16xbf16>
    %c0_1 = arith.constant 0 : index
    %c0_2 = arith.constant 0 : index
    %1 = vector.load %arg2[%c0_1, %c0_2] : memref<16x4xbf16, #tpu.memory_space<vmem>>, vector<16x4xbf16>
    %cst = arith.constant dense<0.000000e+00> : vector<32x4xf32>
    %2 = tpu.matmul %0, %1, %cst {dimension_numbers = #tpu.dot_dimension_numbers<[1], [0], [0], [1], [0, 0, 1, 1], [], []>} : vector<32x16xbf16>, vector<16x4xbf16>, vector<32x4xf32> -> vector<32x4xf32>
    %c0_3 = arith.constant 0 : index
    %c0_4 = arith.constant 0 : index
    %3 = vector.load %arg3[%c0_3, %c0_4] : memref<1x4xf32, #tpu.memory_space<vmem>>, vector<1x4xf32>
    %4 = vector.broadcast %3 : vector<1x4xf32> to vector<32x4xf32>
    %5 = arith.addf %2, %4 : vector<32x4xf32>
    %cst_5 = arith.constant 0.000000e+00 : f32
    %6 = vector.broadcast %cst_5 : f32 to vector<32x4xf32>
    %7 = arith.maximumf %5, %6 : vector<32x4xf32>
    %8 = arith.truncf %7 : vector<32x4xf32> to vector<32x4xbf16>
    %c0_6 = arith.constant 0 : index
    %c0_7 = arith.constant 0 : index
    %9 = vector.load %arg4[%c0_6, %c0_7] : memref<32x4xbf16, #tpu.memory_space<vmem>>, vector<32x4xbf16>
    tpu.vector_store %arg4[%c0_6, %c0_7], %8 {strides = array<i32>} : memref<32x4xbf16, #tpu.memory_space<vmem>>, vector<32x4xbf16>,
    return
  }
  func.func @transform_0(%arg0: i32) -> (i32, i32) {
    %c0_i32 = arith.constant 0 : i32
    %c0_i32_0 = arith.constant 0 : i32
    return %arg0, %c0_i32 : i32, i32
  }
  func.func @transform_1(%arg0: i32) -> (i32, i32) {
    %c0_i32 = arith.constant 0 : i32
    %c0_i32_0 = arith.constant 0 : i32
    %c0_i32_1 = arith.constant 0 : i32
    return %c0_i32, %c0_i32_0 : i32, i32
  }
  func.func @transform_2(%arg0: i32) -> (i32, i32) {
    %c0_i32 = arith.constant 0 : i32
    %c0_i32_0 = arith.constant 0 : i32
    %c0_i32_1 = arith.constant 0 : i32
    return %c0_i32, %c0_i32_0 : i32, i32
  }
  func.func @transform_3(%arg0: i32) -> (i32, i32) {
    %c0_i32 = arith.constant 0 : i32
    %c0_i32_0 = arith.constant 0 : i32
    return %arg0, %c0_i32 : i32, i32
  }
}

module attributes {stable_mosaic.version = 11 : i64} {
  func.func @_matmul_bias_kernel(%arg0: i32, %arg1: memref<32x20xbf16, #tpu.memory_space<vmem>>, %arg2: memref<20x10xbf16, #tpu.memory_space<vmem>>, %arg3: memref<1x10xf32, #tpu.memory_space<vmem>>, %arg4: memref<32x10xbf16, #tpu.memory_space<vmem>>) attributes {dimension_semantics = [#tpu.dimension_semantics<parallel>], iteration_bounds = array<i64: 1>, scalar_prefetch = 0 : i64, scratch_operands = 0 : i64, tpu.core_type = #tpu.core_type<tc>, window_params = [{transform_indices = @transform_0, window_bounds = array<i64: 32, 20>}, {pipeline_mode = #tpu.pipeline_mode<synchronous>, transform_indices = @transform_1, window_bounds = array<i64: 20, 10>}, {pipeline_mode = #tpu.pipeline_mode<synchronous>, transform_indices = @transform_2, window_bounds = array<i64: 1, 10>}, {transform_indices = @transform_3, window_bounds = array<i64: 32, 10>}]} {
    %c0 = arith.constant 0 : index
    %c0_0 = arith.constant 0 : index
    %0 = vector.load %arg1[%c0, %c0_0] : memref<32x20xbf16, #tpu.memory_space<vmem>>, vector<32x20xbf16>
    %c0_1 = arith.constant 0 : index
    %c0_2 = arith.constant 0 : index
    %1 = vector.load %arg2[%c0_1, %c0_2] : memref<20x10xbf16, #tpu.memory_space<vmem>>, vector<20x10xbf16>
    %cst = arith.constant dense<0.000000e+00> : vector<32x10xf32>
    %2 = tpu.matmul %0, %1, %cst {dimension_numbers = #tpu.dot_dimension_numbers<[1], [0], [0], [1], [0, 0, 1, 1], [], []>} : vector<32x20xbf16>, vector<20x10xbf16>, vector<32x10xf32> -> vector<32x10xf32>
    %c0_3 = arith.constant 0 : index
    %c0_4 = arith.constant 0 : index
    %3 = vector.load %arg3[%c0_3, %c0_4] : memref<1x10xf32, #tpu.memory_space<vmem>>, vector<1x10xf32>
    %4 = vector.broadcast %3 : vector<1x10xf32> to vector<32x10xf32>
    %5 = arith.addf %2, %4 : vector<32x10xf32>
    %cst_5 = arith.constant 0.000000e+00 : f32
    %6 = vector.broadcast %cst_5 : f32 to vector<32x10xf32>
    %7 = arith.maximumf %5, %6 : vector<32x10xf32>
    %8 = arith.truncf %7 : vector<32x10xf32> to vector<32x10xbf16>
    %c0_6 = arith.constant 0 : index
    %c0_7 = arith.constant 0 : index
    %9 = vector.load %arg4[%c0_6, %c0_7] : memref<32x10xbf16, #tpu.memory_space<vmem>>, vector<32x10xbf16>
    tpu.vector_store %arg4[%c0_6, %c0_7], %8 {strides = array<i32>} : memref<32x10xbf16, #tpu.memory_space<vmem>>, vector<32x10xbf16>,
    return
  }
  func.func @transform_0(%arg0: i32) -> (i32, i32) {
    %c0_i32 = arith.constant 0 : i32
    %c0_i32_0 = arith.constant 0 : i32
    return %arg0, %c0_i32 : i32, i32
  }
  func.func @transform_1(%arg0: i32) -> (i32, i32) {
    %c0_i32 = arith.constant 0 : i32
    %c0_i32_0 = arith.constant 0 : i32
    %c0_i32_1 = arith.constant 0 : i32
    return %c0_i32, %c0_i32_0 : i32, i32
  }
  func.func @transform_2(%arg0: i32) -> (i32, i32) {
    %c0_i32 = arith.constant 0 : i32
    %c0_i32_0 = arith.constant 0 : i32
    %c0_i32_1 = arith.constant 0 : i32
    return %c0_i32, %c0_i32_0 : i32, i32
  }
  func.func @transform_3(%arg0: i32) -> (i32, i32) {
    %c0_i32 = arith.constant 0 : i32
    %c0_i32_0 = arith.constant 0 : i32
    return %arg0, %c0_i32 : i32, i32
  }
}

module attributes {stable_mosaic.version = 11 : i64} {
  func.func @_maxpool_reduce_kernel(%arg0: i32, %arg1: memref<9x640xbf16, #tpu.memory_space<vmem>>, %arg2: memref<1x640xbf16, #tpu.memory_space<vmem>>) attributes {dimension_semantics = [#tpu.dimension_semantics<parallel>], iteration_bounds = array<i64: 1>, scalar_prefetch = 0 : i64, scratch_operands = 0 : i64, tpu.core_type = #tpu.core_type<tc>, window_params = [{transform_indices = @transform_0, window_bounds = array<i64: 9, 640>}, {transform_indices = @transform_1, window_bounds = array<i64: 1, 640>}]} {
    %c0 = arith.constant 0 : index
    %c0_0 = arith.constant 0 : index
    %0 = vector.load %arg1[%c0, %c0_0] : memref<9x640xbf16, #tpu.memory_space<vmem>>, vector<9x640xbf16>
    %cst = arith.constant dense<0xFF80> : vector<640xbf16>
    %1 = vector.multi_reduction <maximumf>, %0, %cst [0] : vector<9x640xbf16> to vector<640xbf16>
    %2 = vector.shape_cast %1 : vector<640xbf16> to vector<1x640xbf16>
    %c0_1 = arith.constant 0 : index
    %c0_2 = arith.constant 0 : index
    %3 = vector.load %arg2[%c0_1, %c0_2] : memref<1x640xbf16, #tpu.memory_space<vmem>>, vector<1x640xbf16>
    tpu.vector_store %arg2[%c0_1, %c0_2], %2 {strides = array<i32>} : memref<1x640xbf16, #tpu.memory_space<vmem>>, vector<1x640xbf16>,
    return
  }
  func.func @transform_0(%arg0: i32) -> (i32, i32) {
    %c0_i32 = arith.constant 0 : i32
    %c0_i32_0 = arith.constant 0 : i32
    return %c0_i32, %arg0 : i32, i32
  }
  func.func @transform_1(%arg0: i32) -> (i32, i32) {
    %c0_i32 = arith.constant 0 : i32
    %c0_i32_0 = arith.constant 0 : i32
    return %c0_i32, %arg0 : i32, i32
  }
}

module attributes {stable_mosaic.version = 11 : i64} {
  func.func @_matmul_bias_kernel(%arg0: i32, %arg1: memref<32x20xbf16, #tpu.memory_space<vmem>>, %arg2: memref<20x4xbf16, #tpu.memory_space<vmem>>, %arg3: memref<1x4xf32, #tpu.memory_space<vmem>>, %arg4: memref<32x4xbf16, #tpu.memory_space<vmem>>) attributes {dimension_semantics = [#tpu.dimension_semantics<parallel>], iteration_bounds = array<i64: 1>, scalar_prefetch = 0 : i64, scratch_operands = 0 : i64, tpu.core_type = #tpu.core_type<tc>, window_params = [{transform_indices = @transform_0, window_bounds = array<i64: 32, 20>}, {pipeline_mode = #tpu.pipeline_mode<synchronous>, transform_indices = @transform_1, window_bounds = array<i64: 20, 4>}, {pipeline_mode = #tpu.pipeline_mode<synchronous>, transform_indices = @transform_2, window_bounds = array<i64: 1, 4>}, {transform_indices = @transform_3, window_bounds = array<i64: 32, 4>}]} {
    %c0 = arith.constant 0 : index
    %c0_0 = arith.constant 0 : index
    %0 = vector.load %arg1[%c0, %c0_0] : memref<32x20xbf16, #tpu.memory_space<vmem>>, vector<32x20xbf16>
    %c0_1 = arith.constant 0 : index
    %c0_2 = arith.constant 0 : index
    %1 = vector.load %arg2[%c0_1, %c0_2] : memref<20x4xbf16, #tpu.memory_space<vmem>>, vector<20x4xbf16>
    %cst = arith.constant dense<0.000000e+00> : vector<32x4xf32>
    %2 = tpu.matmul %0, %1, %cst {dimension_numbers = #tpu.dot_dimension_numbers<[1], [0], [0], [1], [0, 0, 1, 1], [], []>} : vector<32x20xbf16>, vector<20x4xbf16>, vector<32x4xf32> -> vector<32x4xf32>
    %c0_3 = arith.constant 0 : index
    %c0_4 = arith.constant 0 : index
    %3 = vector.load %arg3[%c0_3, %c0_4] : memref<1x4xf32, #tpu.memory_space<vmem>>, vector<1x4xf32>
    %4 = vector.broadcast %3 : vector<1x4xf32> to vector<32x4xf32>
    %5 = arith.addf %2, %4 : vector<32x4xf32>
    %cst_5 = arith.constant 0.000000e+00 : f32
    %6 = vector.broadcast %cst_5 : f32 to vector<32x4xf32>
    %7 = arith.maximumf %5, %6 : vector<32x4xf32>
    %8 = arith.truncf %7 : vector<32x4xf32> to vector<32x4xbf16>
    %c0_6 = arith.constant 0 : index
    %c0_7 = arith.constant 0 : index
    %9 = vector.load %arg4[%c0_6, %c0_7] : memref<32x4xbf16, #tpu.memory_space<vmem>>, vector<32x4xbf16>
    tpu.vector_store %arg4[%c0_6, %c0_7], %8 {strides = array<i32>} : memref<32x4xbf16, #tpu.memory_space<vmem>>, vector<32x4xbf16>,
    return
  }
  func.func @transform_0(%arg0: i32) -> (i32, i32) {
    %c0_i32 = arith.constant 0 : i32
    %c0_i32_0 = arith.constant 0 : i32
    return %arg0, %c0_i32 : i32, i32
  }
  func.func @transform_1(%arg0: i32) -> (i32, i32) {
    %c0_i32 = arith.constant 0 : i32
    %c0_i32_0 = arith.constant 0 : i32
    %c0_i32_1 = arith.constant 0 : i32
    return %c0_i32, %c0_i32_0 : i32, i32
  }
  func.func @transform_2(%arg0: i32) -> (i32, i32) {
    %c0_i32 = arith.constant 0 : i32
    %c0_i32_0 = arith.constant 0 : i32
    %c0_i32_1 = arith.constant 0 : i32
    return %c0_i32, %c0_i32_0 : i32, i32
  }
  func.func @transform_3(%arg0: i32) -> (i32, i32) {
    %c0_i32 = arith.constant 0 : i32
    %c0_i32_0 = arith.constant 0 : i32
    return %arg0, %c0_i32 : i32, i32
  }
}

module attributes {stable_mosaic.version = 11 : i64} {
  func.func @_maxpool_reduce_kernel(%arg0: i32, %arg1: memref<9x256xbf16, #tpu.memory_space<vmem>>, %arg2: memref<1x256xbf16, #tpu.memory_space<vmem>>) attributes {dimension_semantics = [#tpu.dimension_semantics<parallel>], iteration_bounds = array<i64: 1>, scalar_prefetch = 0 : i64, scratch_operands = 0 : i64, tpu.core_type = #tpu.core_type<tc>, window_params = [{transform_indices = @transform_0, window_bounds = array<i64: 9, 256>}, {transform_indices = @transform_1, window_bounds = array<i64: 1, 256>}]} {
    %c0 = arith.constant 0 : index
    %c0_0 = arith.constant 0 : index
    %0 = vector.load %arg1[%c0, %c0_0] : memref<9x256xbf16, #tpu.memory_space<vmem>>, vector<9x256xbf16>
    %cst = arith.constant dense<0xFF80> : vector<256xbf16>
    %1 = vector.multi_reduction <maximumf>, %0, %cst [0] : vector<9x256xbf16> to vector<256xbf16>
    %2 = vector.shape_cast %1 : vector<256xbf16> to vector<1x256xbf16>
    %c0_1 = arith.constant 0 : index
    %c0_2 = arith.constant 0 : index
    %3 = vector.load %arg2[%c0_1, %c0_2] : memref<1x256xbf16, #tpu.memory_space<vmem>>, vector<1x256xbf16>
    tpu.vector_store %arg2[%c0_1, %c0_2], %2 {strides = array<i32>} : memref<1x256xbf16, #tpu.memory_space<vmem>>, vector<1x256xbf16>,
    return
  }
  func.func @transform_0(%arg0: i32) -> (i32, i32) {
    %c0_i32 = arith.constant 0 : i32
    %c0_i32_0 = arith.constant 0 : i32
    return %c0_i32, %arg0 : i32, i32
  }
  func.func @transform_1(%arg0: i32) -> (i32, i32) {
    %c0_i32 = arith.constant 0 : i32
    %c0_i32_0 = arith.constant 0 : i32
    return %c0_i32, %arg0 : i32, i32
  }
}

module attributes {stable_mosaic.version = 11 : i64} {
  func.func @_matmul_bias_kernel(%arg0: i32, %arg1: memref<8x20xbf16, #tpu.memory_space<vmem>>, %arg2: memref<20x14xbf16, #tpu.memory_space<vmem>>, %arg3: memref<1x14xf32, #tpu.memory_space<vmem>>, %arg4: memref<8x14xbf16, #tpu.memory_space<vmem>>) attributes {dimension_semantics = [#tpu.dimension_semantics<parallel>], iteration_bounds = array<i64: 1>, scalar_prefetch = 0 : i64, scratch_operands = 0 : i64, tpu.core_type = #tpu.core_type<tc>, window_params = [{transform_indices = @transform_0, window_bounds = array<i64: 8, 20>}, {pipeline_mode = #tpu.pipeline_mode<synchronous>, transform_indices = @transform_1, window_bounds = array<i64: 20, 14>}, {pipeline_mode = #tpu.pipeline_mode<synchronous>, transform_indices = @transform_2, window_bounds = array<i64: 1, 14>}, {transform_indices = @transform_3, window_bounds = array<i64: 8, 14>}]} {
    %c0 = arith.constant 0 : index
    %c0_0 = arith.constant 0 : index
    %0 = vector.load %arg1[%c0, %c0_0] : memref<8x20xbf16, #tpu.memory_space<vmem>>, vector<8x20xbf16>
    %c0_1 = arith.constant 0 : index
    %c0_2 = arith.constant 0 : index
    %1 = vector.load %arg2[%c0_1, %c0_2] : memref<20x14xbf16, #tpu.memory_space<vmem>>, vector<20x14xbf16>
    %cst = arith.constant dense<0.000000e+00> : vector<8x14xf32>
    %2 = tpu.matmul %0, %1, %cst {dimension_numbers = #tpu.dot_dimension_numbers<[1], [0], [0], [1], [0, 0, 1, 1], [], []>} : vector<8x20xbf16>, vector<20x14xbf16>, vector<8x14xf32> -> vector<8x14xf32>
    %c0_3 = arith.constant 0 : index
    %c0_4 = arith.constant 0 : index
    %3 = vector.load %arg3[%c0_3, %c0_4] : memref<1x14xf32, #tpu.memory_space<vmem>>, vector<1x14xf32>
    %4 = vector.broadcast %3 : vector<1x14xf32> to vector<8x14xf32>
    %5 = arith.addf %2, %4 : vector<8x14xf32>
    %cst_5 = arith.constant 0.000000e+00 : f32
    %6 = vector.broadcast %cst_5 : f32 to vector<8x14xf32>
    %7 = arith.maximumf %5, %6 : vector<8x14xf32>
    %8 = arith.truncf %7 : vector<8x14xf32> to vector<8x14xbf16>
    %c0_6 = arith.constant 0 : index
    %c0_7 = arith.constant 0 : index
    %9 = vector.load %arg4[%c0_6, %c0_7] : memref<8x14xbf16, #tpu.memory_space<vmem>>, vector<8x14xbf16>
    tpu.vector_store %arg4[%c0_6, %c0_7], %8 {strides = array<i32>} : memref<8x14xbf16, #tpu.memory_space<vmem>>, vector<8x14xbf16>,
    return
  }
  func.func @transform_0(%arg0: i32) -> (i32, i32) {
    %c0_i32 = arith.constant 0 : i32
    %c0_i32_0 = arith.constant 0 : i32
    return %arg0, %c0_i32 : i32, i32
  }
  func.func @transform_1(%arg0: i32) -> (i32, i32) {
    %c0_i32 = arith.constant 0 : i32
    %c0_i32_0 = arith.constant 0 : i32
    %c0_i32_1 = arith.constant 0 : i32
    return %c0_i32, %c0_i32_0 : i32, i32
  }
  func.func @transform_2(%arg0: i32) -> (i32, i32) {
    %c0_i32 = arith.constant 0 : i32
    %c0_i32_0 = arith.constant 0 : i32
    %c0_i32_1 = arith.constant 0 : i32
    return %c0_i32, %c0_i32_0 : i32, i32
  }
  func.func @transform_3(%arg0: i32) -> (i32, i32) {
    %c0_i32 = arith.constant 0 : i32
    %c0_i32_0 = arith.constant 0 : i32
    return %arg0, %c0_i32 : i32, i32
  }
}

module attributes {stable_mosaic.version = 11 : i64} {
  func.func @_matmul_bias_kernel(%arg0: i32, %arg1: memref<8x54xbf16, #tpu.memory_space<vmem>>, %arg2: memref<54x12xbf16, #tpu.memory_space<vmem>>, %arg3: memref<1x12xf32, #tpu.memory_space<vmem>>, %arg4: memref<8x12xbf16, #tpu.memory_space<vmem>>) attributes {dimension_semantics = [#tpu.dimension_semantics<parallel>], iteration_bounds = array<i64: 1>, scalar_prefetch = 0 : i64, scratch_operands = 0 : i64, tpu.core_type = #tpu.core_type<tc>, window_params = [{transform_indices = @transform_0, window_bounds = array<i64: 8, 54>}, {pipeline_mode = #tpu.pipeline_mode<synchronous>, transform_indices = @transform_1, window_bounds = array<i64: 54, 12>}, {pipeline_mode = #tpu.pipeline_mode<synchronous>, transform_indices = @transform_2, window_bounds = array<i64: 1, 12>}, {transform_indices = @transform_3, window_bounds = array<i64: 8, 12>}]} {
    %c0 = arith.constant 0 : index
    %c0_0 = arith.constant 0 : index
    %0 = vector.load %arg1[%c0, %c0_0] : memref<8x54xbf16, #tpu.memory_space<vmem>>, vector<8x54xbf16>
    %c0_1 = arith.constant 0 : index
    %c0_2 = arith.constant 0 : index
    %1 = vector.load %arg2[%c0_1, %c0_2] : memref<54x12xbf16, #tpu.memory_space<vmem>>, vector<54x12xbf16>
    %cst = arith.constant dense<0.000000e+00> : vector<8x12xf32>
    %2 = tpu.matmul %0, %1, %cst {dimension_numbers = #tpu.dot_dimension_numbers<[1], [0], [0], [1], [0, 0, 1, 1], [], []>} : vector<8x54xbf16>, vector<54x12xbf16>, vector<8x12xf32> -> vector<8x12xf32>
    %c0_3 = arith.constant 0 : index
    %c0_4 = arith.constant 0 : index
    %3 = vector.load %arg3[%c0_3, %c0_4] : memref<1x12xf32, #tpu.memory_space<vmem>>, vector<1x12xf32>
    %4 = vector.broadcast %3 : vector<1x12xf32> to vector<8x12xf32>
    %5 = arith.addf %2, %4 : vector<8x12xf32>
    %cst_5 = arith.constant 0.000000e+00 : f32
    %6 = vector.broadcast %cst_5 : f32 to vector<8x12xf32>
    %7 = arith.maximumf %5, %6 : vector<8x12xf32>
    %8 = arith.truncf %7 : vector<8x12xf32> to vector<8x12xbf16>
    %c0_6 = arith.constant 0 : index
    %c0_7 = arith.constant 0 : index
    %9 = vector.load %arg4[%c0_6, %c0_7] : memref<8x12xbf16, #tpu.memory_space<vmem>>, vector<8x12xbf16>
    tpu.vector_store %arg4[%c0_6, %c0_7], %8 {strides = array<i32>} : memref<8x12xbf16, #tpu.memory_space<vmem>>, vector<8x12xbf16>,
    return
  }
  func.func @transform_0(%arg0: i32) -> (i32, i32) {
    %c0_i32 = arith.constant 0 : i32
    %c0_i32_0 = arith.constant 0 : i32
    return %arg0, %c0_i32 : i32, i32
  }
  func.func @transform_1(%arg0: i32) -> (i32, i32) {
    %c0_i32 = arith.constant 0 : i32
    %c0_i32_0 = arith.constant 0 : i32
    %c0_i32_1 = arith.constant 0 : i32
    return %c0_i32, %c0_i32_0 : i32, i32
  }
  func.func @transform_2(%arg0: i32) -> (i32, i32) {
    %c0_i32 = arith.constant 0 : i32
    %c0_i32_0 = arith.constant 0 : i32
    %c0_i32_1 = arith.constant 0 : i32
    return %c0_i32, %c0_i32_0 : i32, i32
  }
  func.func @transform_3(%arg0: i32) -> (i32, i32) {
    %c0_i32 = arith.constant 0 : i32
    %c0_i32_0 = arith.constant 0 : i32
    return %arg0, %c0_i32 : i32, i32
  }
}

module attributes {stable_mosaic.version = 11 : i64} {
  func.func @_matmul_bias_kernel(%arg0: i32, %arg1: memref<8x20xbf16, #tpu.memory_space<vmem>>, %arg2: memref<20x4xbf16, #tpu.memory_space<vmem>>, %arg3: memref<1x4xf32, #tpu.memory_space<vmem>>, %arg4: memref<8x4xbf16, #tpu.memory_space<vmem>>) attributes {dimension_semantics = [#tpu.dimension_semantics<parallel>], iteration_bounds = array<i64: 1>, scalar_prefetch = 0 : i64, scratch_operands = 0 : i64, tpu.core_type = #tpu.core_type<tc>, window_params = [{transform_indices = @transform_0, window_bounds = array<i64: 8, 20>}, {pipeline_mode = #tpu.pipeline_mode<synchronous>, transform_indices = @transform_1, window_bounds = array<i64: 20, 4>}, {pipeline_mode = #tpu.pipeline_mode<synchronous>, transform_indices = @transform_2, window_bounds = array<i64: 1, 4>}, {transform_indices = @transform_3, window_bounds = array<i64: 8, 4>}]} {
    %c0 = arith.constant 0 : index
    %c0_0 = arith.constant 0 : index
    %0 = vector.load %arg1[%c0, %c0_0] : memref<8x20xbf16, #tpu.memory_space<vmem>>, vector<8x20xbf16>
    %c0_1 = arith.constant 0 : index
    %c0_2 = arith.constant 0 : index
    %1 = vector.load %arg2[%c0_1, %c0_2] : memref<20x4xbf16, #tpu.memory_space<vmem>>, vector<20x4xbf16>
    %cst = arith.constant dense<0.000000e+00> : vector<8x4xf32>
    %2 = tpu.matmul %0, %1, %cst {dimension_numbers = #tpu.dot_dimension_numbers<[1], [0], [0], [1], [0, 0, 1, 1], [], []>} : vector<8x20xbf16>, vector<20x4xbf16>, vector<8x4xf32> -> vector<8x4xf32>
    %c0_3 = arith.constant 0 : index
    %c0_4 = arith.constant 0 : index
    %3 = vector.load %arg3[%c0_3, %c0_4] : memref<1x4xf32, #tpu.memory_space<vmem>>, vector<1x4xf32>
    %4 = vector.broadcast %3 : vector<1x4xf32> to vector<8x4xf32>
    %5 = arith.addf %2, %4 : vector<8x4xf32>
    %cst_5 = arith.constant 0.000000e+00 : f32
    %6 = vector.broadcast %cst_5 : f32 to vector<8x4xf32>
    %7 = arith.maximumf %5, %6 : vector<8x4xf32>
    %8 = arith.truncf %7 : vector<8x4xf32> to vector<8x4xbf16>
    %c0_6 = arith.constant 0 : index
    %c0_7 = arith.constant 0 : index
    %9 = vector.load %arg4[%c0_6, %c0_7] : memref<8x4xbf16, #tpu.memory_space<vmem>>, vector<8x4xbf16>
    tpu.vector_store %arg4[%c0_6, %c0_7], %8 {strides = array<i32>} : memref<8x4xbf16, #tpu.memory_space<vmem>>, vector<8x4xbf16>,
    return
  }
  func.func @transform_0(%arg0: i32) -> (i32, i32) {
    %c0_i32 = arith.constant 0 : i32
    %c0_i32_0 = arith.constant 0 : i32
    return %arg0, %c0_i32 : i32, i32
  }
  func.func @transform_1(%arg0: i32) -> (i32, i32) {
    %c0_i32 = arith.constant 0 : i32
    %c0_i32_0 = arith.constant 0 : i32
    %c0_i32_1 = arith.constant 0 : i32
    return %c0_i32, %c0_i32_0 : i32, i32
  }
  func.func @transform_2(%arg0: i32) -> (i32, i32) {
    %c0_i32 = arith.constant 0 : i32
    %c0_i32_0 = arith.constant 0 : i32
    %c0_i32_1 = arith.constant 0 : i32
    return %c0_i32, %c0_i32_0 : i32, i32
  }
  func.func @transform_3(%arg0: i32) -> (i32, i32) {
    %c0_i32 = arith.constant 0 : i32
    %c0_i32_0 = arith.constant 0 : i32
    return %arg0, %c0_i32 : i32, i32
  }
}

module attributes {stable_mosaic.version = 11 : i64} {
  func.func @_matmul_bias_kernel(%arg0: i32, %arg1: memref<8x24xbf16, #tpu.memory_space<vmem>>, %arg2: memref<24x14xbf16, #tpu.memory_space<vmem>>, %arg3: memref<1x14xf32, #tpu.memory_space<vmem>>, %arg4: memref<8x14xbf16, #tpu.memory_space<vmem>>) attributes {dimension_semantics = [#tpu.dimension_semantics<parallel>], iteration_bounds = array<i64: 1>, scalar_prefetch = 0 : i64, scratch_operands = 0 : i64, tpu.core_type = #tpu.core_type<tc>, window_params = [{transform_indices = @transform_0, window_bounds = array<i64: 8, 24>}, {pipeline_mode = #tpu.pipeline_mode<synchronous>, transform_indices = @transform_1, window_bounds = array<i64: 24, 14>}, {pipeline_mode = #tpu.pipeline_mode<synchronous>, transform_indices = @transform_2, window_bounds = array<i64: 1, 14>}, {transform_indices = @transform_3, window_bounds = array<i64: 8, 14>}]} {
    %c0 = arith.constant 0 : index
    %c0_0 = arith.constant 0 : index
    %0 = vector.load %arg1[%c0, %c0_0] : memref<8x24xbf16, #tpu.memory_space<vmem>>, vector<8x24xbf16>
    %c0_1 = arith.constant 0 : index
    %c0_2 = arith.constant 0 : index
    %1 = vector.load %arg2[%c0_1, %c0_2] : memref<24x14xbf16, #tpu.memory_space<vmem>>, vector<24x14xbf16>
    %cst = arith.constant dense<0.000000e+00> : vector<8x14xf32>
    %2 = tpu.matmul %0, %1, %cst {dimension_numbers = #tpu.dot_dimension_numbers<[1], [0], [0], [1], [0, 0, 1, 1], [], []>} : vector<8x24xbf16>, vector<24x14xbf16>, vector<8x14xf32> -> vector<8x14xf32>
    %c0_3 = arith.constant 0 : index
    %c0_4 = arith.constant 0 : index
    %3 = vector.load %arg3[%c0_3, %c0_4] : memref<1x14xf32, #tpu.memory_space<vmem>>, vector<1x14xf32>
    %4 = vector.broadcast %3 : vector<1x14xf32> to vector<8x14xf32>
    %5 = arith.addf %2, %4 : vector<8x14xf32>
    %cst_5 = arith.constant 0.000000e+00 : f32
    %6 = vector.broadcast %cst_5 : f32 to vector<8x14xf32>
    %7 = arith.maximumf %5, %6 : vector<8x14xf32>
    %8 = arith.truncf %7 : vector<8x14xf32> to vector<8x14xbf16>
    %c0_6 = arith.constant 0 : index
    %c0_7 = arith.constant 0 : index
    %9 = vector.load %arg4[%c0_6, %c0_7] : memref<8x14xbf16, #tpu.memory_space<vmem>>, vector<8x14xbf16>
    tpu.vector_store %arg4[%c0_6, %c0_7], %8 {strides = array<i32>} : memref<8x14xbf16, #tpu.memory_space<vmem>>, vector<8x14xbf16>,
    return
  }
  func.func @transform_0(%arg0: i32) -> (i32, i32) {
    %c0_i32 = arith.constant 0 : i32
    %c0_i32_0 = arith.constant 0 : i32
    return %arg0, %c0_i32 : i32, i32
  }
  func.func @transform_1(%arg0: i32) -> (i32, i32) {
    %c0_i32 = arith.constant 0 : i32
    %c0_i32_0 = arith.constant 0 : i32
    %c0_i32_1 = arith.constant 0 : i32
    return %c0_i32, %c0_i32_0 : i32, i32
  }
  func.func @transform_2(%arg0: i32) -> (i32, i32) {
    %c0_i32 = arith.constant 0 : i32
    %c0_i32_0 = arith.constant 0 : i32
    %c0_i32_1 = arith.constant 0 : i32
    return %c0_i32, %c0_i32_0 : i32, i32
  }
  func.func @transform_3(%arg0: i32) -> (i32, i32) {
    %c0_i32 = arith.constant 0 : i32
    %c0_i32_0 = arith.constant 0 : i32
    return %arg0, %c0_i32 : i32, i32
  }
}

module attributes {stable_mosaic.version = 11 : i64} {
  func.func @_matmul_bias_kernel(%arg0: i32, %arg1: memref<8x24xbf16, #tpu.memory_space<vmem>>, %arg2: memref<24x4xbf16, #tpu.memory_space<vmem>>, %arg3: memref<1x4xf32, #tpu.memory_space<vmem>>, %arg4: memref<8x4xbf16, #tpu.memory_space<vmem>>) attributes {dimension_semantics = [#tpu.dimension_semantics<parallel>], iteration_bounds = array<i64: 1>, scalar_prefetch = 0 : i64, scratch_operands = 0 : i64, tpu.core_type = #tpu.core_type<tc>, window_params = [{transform_indices = @transform_0, window_bounds = array<i64: 8, 24>}, {pipeline_mode = #tpu.pipeline_mode<synchronous>, transform_indices = @transform_1, window_bounds = array<i64: 24, 4>}, {pipeline_mode = #tpu.pipeline_mode<synchronous>, transform_indices = @transform_2, window_bounds = array<i64: 1, 4>}, {transform_indices = @transform_3, window_bounds = array<i64: 8, 4>}]} {
    %c0 = arith.constant 0 : index
    %c0_0 = arith.constant 0 : index
    %0 = vector.load %arg1[%c0, %c0_0] : memref<8x24xbf16, #tpu.memory_space<vmem>>, vector<8x24xbf16>
    %c0_1 = arith.constant 0 : index
    %c0_2 = arith.constant 0 : index
    %1 = vector.load %arg2[%c0_1, %c0_2] : memref<24x4xbf16, #tpu.memory_space<vmem>>, vector<24x4xbf16>
    %cst = arith.constant dense<0.000000e+00> : vector<8x4xf32>
    %2 = tpu.matmul %0, %1, %cst {dimension_numbers = #tpu.dot_dimension_numbers<[1], [0], [0], [1], [0, 0, 1, 1], [], []>} : vector<8x24xbf16>, vector<24x4xbf16>, vector<8x4xf32> -> vector<8x4xf32>
    %c0_3 = arith.constant 0 : index
    %c0_4 = arith.constant 0 : index
    %3 = vector.load %arg3[%c0_3, %c0_4] : memref<1x4xf32, #tpu.memory_space<vmem>>, vector<1x4xf32>
    %4 = vector.broadcast %3 : vector<1x4xf32> to vector<8x4xf32>
    %5 = arith.addf %2, %4 : vector<8x4xf32>
    %cst_5 = arith.constant 0.000000e+00 : f32
    %6 = vector.broadcast %cst_5 : f32 to vector<8x4xf32>
    %7 = arith.maximumf %5, %6 : vector<8x4xf32>
    %8 = arith.truncf %7 : vector<8x4xf32> to vector<8x4xbf16>
    %c0_6 = arith.constant 0 : index
    %c0_7 = arith.constant 0 : index
    %9 = vector.load %arg4[%c0_6, %c0_7] : memref<8x4xbf16, #tpu.memory_space<vmem>>, vector<8x4xbf16>
    tpu.vector_store %arg4[%c0_6, %c0_7], %8 {strides = array<i32>} : memref<8x4xbf16, #tpu.memory_space<vmem>>, vector<8x4xbf16>,
    return
  }
  func.func @transform_0(%arg0: i32) -> (i32, i32) {
    %c0_i32 = arith.constant 0 : i32
    %c0_i32_0 = arith.constant 0 : i32
    return %arg0, %c0_i32 : i32, i32
  }
  func.func @transform_1(%arg0: i32) -> (i32, i32) {
    %c0_i32 = arith.constant 0 : i32
    %c0_i32_0 = arith.constant 0 : i32
    %c0_i32_1 = arith.constant 0 : i32
    return %c0_i32, %c0_i32_0 : i32, i32
  }
  func.func @transform_2(%arg0: i32) -> (i32, i32) {
    %c0_i32 = arith.constant 0 : i32
    %c0_i32_0 = arith.constant 0 : i32
    %c0_i32_1 = arith.constant 0 : i32
    return %c0_i32, %c0_i32_0 : i32, i32
  }
  func.func @transform_3(%arg0: i32) -> (i32, i32) {
    %c0_i32 = arith.constant 0 : i32
    %c0_i32_0 = arith.constant 0 : i32
    return %arg0, %c0_i32 : i32, i32
  }
}

module attributes {stable_mosaic.version = 11 : i64} {
  func.func @_matmul_bias_kernel(%arg0: i32, %arg1: memref<8x24xbf16, #tpu.memory_space<vmem>>, %arg2: memref<24x20xbf16, #tpu.memory_space<vmem>>, %arg3: memref<1x20xf32, #tpu.memory_space<vmem>>, %arg4: memref<8x20xbf16, #tpu.memory_space<vmem>>) attributes {dimension_semantics = [#tpu.dimension_semantics<parallel>], iteration_bounds = array<i64: 1>, scalar_prefetch = 0 : i64, scratch_operands = 0 : i64, tpu.core_type = #tpu.core_type<tc>, window_params = [{transform_indices = @transform_0, window_bounds = array<i64: 8, 24>}, {pipeline_mode = #tpu.pipeline_mode<synchronous>, transform_indices = @transform_1, window_bounds = array<i64: 24, 20>}, {pipeline_mode = #tpu.pipeline_mode<synchronous>, transform_indices = @transform_2, window_bounds = array<i64: 1, 20>}, {transform_indices = @transform_3, window_bounds = array<i64: 8, 20>}]} {
    %c0 = arith.constant 0 : index
    %c0_0 = arith.constant 0 : index
    %0 = vector.load %arg1[%c0, %c0_0] : memref<8x24xbf16, #tpu.memory_space<vmem>>, vector<8x24xbf16>
    %c0_1 = arith.constant 0 : index
    %c0_2 = arith.constant 0 : index
    %1 = vector.load %arg2[%c0_1, %c0_2] : memref<24x20xbf16, #tpu.memory_space<vmem>>, vector<24x20xbf16>
    %cst = arith.constant dense<0.000000e+00> : vector<8x20xf32>
    %2 = tpu.matmul %0, %1, %cst {dimension_numbers = #tpu.dot_dimension_numbers<[1], [0], [0], [1], [0, 0, 1, 1], [], []>} : vector<8x24xbf16>, vector<24x20xbf16>, vector<8x20xf32> -> vector<8x20xf32>
    %c0_3 = arith.constant 0 : index
    %c0_4 = arith.constant 0 : index
    %3 = vector.load %arg3[%c0_3, %c0_4] : memref<1x20xf32, #tpu.memory_space<vmem>>, vector<1x20xf32>
    %4 = vector.broadcast %3 : vector<1x20xf32> to vector<8x20xf32>
    %5 = arith.addf %2, %4 : vector<8x20xf32>
    %cst_5 = arith.constant 0.000000e+00 : f32
    %6 = vector.broadcast %cst_5 : f32 to vector<8x20xf32>
    %7 = arith.maximumf %5, %6 : vector<8x20xf32>
    %8 = arith.truncf %7 : vector<8x20xf32> to vector<8x20xbf16>
    %c0_6 = arith.constant 0 : index
    %c0_7 = arith.constant 0 : index
    %9 = vector.load %arg4[%c0_6, %c0_7] : memref<8x20xbf16, #tpu.memory_space<vmem>>, vector<8x20xbf16>
    tpu.vector_store %arg4[%c0_6, %c0_7], %8 {strides = array<i32>} : memref<8x20xbf16, #tpu.memory_space<vmem>>, vector<8x20xbf16>,
    return
  }
  func.func @transform_0(%arg0: i32) -> (i32, i32) {
    %c0_i32 = arith.constant 0 : i32
    %c0_i32_0 = arith.constant 0 : i32
    return %arg0, %c0_i32 : i32, i32
  }
  func.func @transform_1(%arg0: i32) -> (i32, i32) {
    %c0_i32 = arith.constant 0 : i32
    %c0_i32_0 = arith.constant 0 : i32
    %c0_i32_1 = arith.constant 0 : i32
    return %c0_i32, %c0_i32_0 : i32, i32
  }
  func.func @transform_2(%arg0: i32) -> (i32, i32) {
    %c0_i32 = arith.constant 0 : i32
    %c0_i32_0 = arith.constant 0 : i32
    %c0_i32_1 = arith.constant 0 : i32
    return %c0_i32, %c0_i32_0 : i32, i32
  }
  func.func @transform_3(%arg0: i32) -> (i32, i32) {
    %c0_i32 = arith.constant 0 : i32
    %c0_i32_0 = arith.constant 0 : i32
    return %arg0, %c0_i32 : i32, i32
  }
}

module attributes {stable_mosaic.version = 11 : i64} {
  func.func @_matmul_bias_kernel(%arg0: i32, %arg1: memref<8x108xbf16, #tpu.memory_space<vmem>>, %arg2: memref<108x24xbf16, #tpu.memory_space<vmem>>, %arg3: memref<1x24xf32, #tpu.memory_space<vmem>>, %arg4: memref<8x24xbf16, #tpu.memory_space<vmem>>) attributes {dimension_semantics = [#tpu.dimension_semantics<parallel>], iteration_bounds = array<i64: 1>, scalar_prefetch = 0 : i64, scratch_operands = 0 : i64, tpu.core_type = #tpu.core_type<tc>, window_params = [{transform_indices = @transform_0, window_bounds = array<i64: 8, 108>}, {pipeline_mode = #tpu.pipeline_mode<synchronous>, transform_indices = @transform_1, window_bounds = array<i64: 108, 24>}, {pipeline_mode = #tpu.pipeline_mode<synchronous>, transform_indices = @transform_2, window_bounds = array<i64: 1, 24>}, {transform_indices = @transform_3, window_bounds = array<i64: 8, 24>}]} {
    %c0 = arith.constant 0 : index
    %c0_0 = arith.constant 0 : index
    %0 = vector.load %arg1[%c0, %c0_0] : memref<8x108xbf16, #tpu.memory_space<vmem>>, vector<8x108xbf16>
    %c0_1 = arith.constant 0 : index
    %c0_2 = arith.constant 0 : index
    %1 = vector.load %arg2[%c0_1, %c0_2] : memref<108x24xbf16, #tpu.memory_space<vmem>>, vector<108x24xbf16>
    %cst = arith.constant dense<0.000000e+00> : vector<8x24xf32>
    %2 = tpu.matmul %0, %1, %cst {dimension_numbers = #tpu.dot_dimension_numbers<[1], [0], [0], [1], [0, 0, 1, 1], [], []>} : vector<8x108xbf16>, vector<108x24xbf16>, vector<8x24xf32> -> vector<8x24xf32>
    %c0_3 = arith.constant 0 : index
    %c0_4 = arith.constant 0 : index
    %3 = vector.load %arg3[%c0_3, %c0_4] : memref<1x24xf32, #tpu.memory_space<vmem>>, vector<1x24xf32>
    %4 = vector.broadcast %3 : vector<1x24xf32> to vector<8x24xf32>
    %5 = arith.addf %2, %4 : vector<8x24xf32>
    %cst_5 = arith.constant 0.000000e+00 : f32
    %6 = vector.broadcast %cst_5 : f32 to vector<8x24xf32>
    %7 = arith.maximumf %5, %6 : vector<8x24xf32>
    %8 = arith.truncf %7 : vector<8x24xf32> to vector<8x24xbf16>
    %c0_6 = arith.constant 0 : index
    %c0_7 = arith.constant 0 : index
    %9 = vector.load %arg4[%c0_6, %c0_7] : memref<8x24xbf16, #tpu.memory_space<vmem>>, vector<8x24xbf16>
    tpu.vector_store %arg4[%c0_6, %c0_7], %8 {strides = array<i32>} : memref<8x24xbf16, #tpu.memory_space<vmem>>, vector<8x24xbf16>,
    return
  }
  func.func @transform_0(%arg0: i32) -> (i32, i32) {
    %c0_i32 = arith.constant 0 : i32
    %c0_i32_0 = arith.constant 0 : i32
    return %arg0, %c0_i32 : i32, i32
  }
  func.func @transform_1(%arg0: i32) -> (i32, i32) {
    %c0_i32 = arith.constant 0 : i32
    %c0_i32_0 = arith.constant 0 : i32
    %c0_i32_1 = arith.constant 0 : i32
    return %c0_i32, %c0_i32_0 : i32, i32
  }
  func.func @transform_2(%arg0: i32) -> (i32, i32) {
    %c0_i32 = arith.constant 0 : i32
    %c0_i32_0 = arith.constant 0 : i32
    %c0_i32_1 = arith.constant 0 : i32
    return %c0_i32, %c0_i32_0 : i32, i32
  }
  func.func @transform_3(%arg0: i32) -> (i32, i32) {
    %c0_i32 = arith.constant 0 : i32
    %c0_i32_0 = arith.constant 0 : i32
    return %arg0, %c0_i32 : i32, i32
  }
}

module attributes {stable_mosaic.version = 11 : i64} {
  func.func @_matmul_bias_kernel(%arg0: i32, %arg1: memref<8x24xbf16, #tpu.memory_space<vmem>>, %arg2: memref<24x8xbf16, #tpu.memory_space<vmem>>, %arg3: memref<1x8xf32, #tpu.memory_space<vmem>>, %arg4: memref<8x8xbf16, #tpu.memory_space<vmem>>) attributes {dimension_semantics = [#tpu.dimension_semantics<parallel>], iteration_bounds = array<i64: 1>, scalar_prefetch = 0 : i64, scratch_operands = 0 : i64, tpu.core_type = #tpu.core_type<tc>, window_params = [{transform_indices = @transform_0, window_bounds = array<i64: 8, 24>}, {pipeline_mode = #tpu.pipeline_mode<synchronous>, transform_indices = @transform_1, window_bounds = array<i64: 24, 8>}, {pipeline_mode = #tpu.pipeline_mode<synchronous>, transform_indices = @transform_2, window_bounds = array<i64: 1, 8>}, {transform_indices = @transform_3, window_bounds = array<i64: 8, 8>}]} {
    %c0 = arith.constant 0 : index
    %c0_0 = arith.constant 0 : index
    %0 = vector.load %arg1[%c0, %c0_0] : memref<8x24xbf16, #tpu.memory_space<vmem>>, vector<8x24xbf16>
    %c0_1 = arith.constant 0 : index
    %c0_2 = arith.constant 0 : index
    %1 = vector.load %arg2[%c0_1, %c0_2] : memref<24x8xbf16, #tpu.memory_space<vmem>>, vector<24x8xbf16>
    %cst = arith.constant dense<0.000000e+00> : vector<8x8xf32>
    %2 = tpu.matmul %0, %1, %cst {dimension_numbers = #tpu.dot_dimension_numbers<[1], [0], [0], [1], [0, 0, 1, 1], [], []>} : vector<8x24xbf16>, vector<24x8xbf16>, vector<8x8xf32> -> vector<8x8xf32>
    %c0_3 = arith.constant 0 : index
    %c0_4 = arith.constant 0 : index
    %3 = vector.load %arg3[%c0_3, %c0_4] : memref<1x8xf32, #tpu.memory_space<vmem>>, vector<1x8xf32>
    %4 = vector.broadcast %3 : vector<1x8xf32> to vector<8x8xf32>
    %5 = arith.addf %2, %4 : vector<8x8xf32>
    %cst_5 = arith.constant 0.000000e+00 : f32
    %6 = vector.broadcast %cst_5 : f32 to vector<8x8xf32>
    %7 = arith.maximumf %5, %6 : vector<8x8xf32>
    %8 = arith.truncf %7 : vector<8x8xf32> to vector<8x8xbf16>
    %c0_6 = arith.constant 0 : index
    %c0_7 = arith.constant 0 : index
    %9 = vector.load %arg4[%c0_6, %c0_7] : memref<8x8xbf16, #tpu.memory_space<vmem>>, vector<8x8xbf16>
    tpu.vector_store %arg4[%c0_6, %c0_7], %8 {strides = array<i32>} : memref<8x8xbf16, #tpu.memory_space<vmem>>, vector<8x8xbf16>,
    return
  }
  func.func @transform_0(%arg0: i32) -> (i32, i32) {
    %c0_i32 = arith.constant 0 : i32
    %c0_i32_0 = arith.constant 0 : i32
    return %arg0, %c0_i32 : i32, i32
  }
  func.func @transform_1(%arg0: i32) -> (i32, i32) {
    %c0_i32 = arith.constant 0 : i32
    %c0_i32_0 = arith.constant 0 : i32
    %c0_i32_1 = arith.constant 0 : i32
    return %c0_i32, %c0_i32_0 : i32, i32
  }
  func.func @transform_2(%arg0: i32) -> (i32, i32) {
    %c0_i32 = arith.constant 0 : i32
    %c0_i32_0 = arith.constant 0 : i32
    %c0_i32_1 = arith.constant 0 : i32
    return %c0_i32, %c0_i32_0 : i32, i32
  }
  func.func @transform_3(%arg0: i32) -> (i32, i32) {
    %c0_i32 = arith.constant 0 : i32
    %c0_i32_0 = arith.constant 0 : i32
    return %arg0, %c0_i32 : i32, i32
  }
}

module attributes {stable_mosaic.version = 11 : i64} {
  func.func @_maxpool_reduce_kernel(%arg0: i32, %arg1: memref<4x128xbf16, #tpu.memory_space<vmem>>, %arg2: memref<1x128xbf16, #tpu.memory_space<vmem>>) attributes {dimension_semantics = [#tpu.dimension_semantics<parallel>], iteration_bounds = array<i64: 1>, scalar_prefetch = 0 : i64, scratch_operands = 0 : i64, tpu.core_type = #tpu.core_type<tc>, window_params = [{transform_indices = @transform_0, window_bounds = array<i64: 4, 128>}, {transform_indices = @transform_1, window_bounds = array<i64: 1, 128>}]} {
    %c0 = arith.constant 0 : index
    %c0_0 = arith.constant 0 : index
    %0 = vector.load %arg1[%c0, %c0_0] : memref<4x128xbf16, #tpu.memory_space<vmem>>, vector<4x128xbf16>
    %cst = arith.constant dense<0xFF80> : vector<128xbf16>
    %1 = vector.multi_reduction <maximumf>, %0, %cst [0] : vector<4x128xbf16> to vector<128xbf16>
    %2 = vector.shape_cast %1 : vector<128xbf16> to vector<1x128xbf16>
    %c0_1 = arith.constant 0 : index
    %c0_2 = arith.constant 0 : index
    %3 = vector.load %arg2[%c0_1, %c0_2] : memref<1x128xbf16, #tpu.memory_space<vmem>>, vector<1x128xbf16>
    tpu.vector_store %arg2[%c0_1, %c0_2], %2 {strides = array<i32>} : memref<1x128xbf16, #tpu.memory_space<vmem>>, vector<1x128xbf16>,
    return
  }
  func.func @transform_0(%arg0: i32) -> (i32, i32) {
    %c0_i32 = arith.constant 0 : i32
    %c0_i32_0 = arith.constant 0 : i32
    return %c0_i32, %arg0 : i32, i32
  }
  func.func @transform_1(%arg0: i32) -> (i32, i32) {
    %c0_i32 = arith.constant 0 : i32
    %c0_i32_0 = arith.constant 0 : i32
    return %c0_i32, %arg0 : i32, i32
  }
}

module attributes {stable_mosaic.version = 11 : i64} {
  func.func @_maxpool_reduce_kernel(%arg0: i32, %arg1: memref<9x128xbf16, #tpu.memory_space<vmem>>, %arg2: memref<1x128xbf16, #tpu.memory_space<vmem>>) attributes {dimension_semantics = [#tpu.dimension_semantics<parallel>], iteration_bounds = array<i64: 1>, scalar_prefetch = 0 : i64, scratch_operands = 0 : i64, tpu.core_type = #tpu.core_type<tc>, window_params = [{transform_indices = @transform_0, window_bounds = array<i64: 9, 128>}, {transform_indices = @transform_1, window_bounds = array<i64: 1, 128>}]} {
    %c0 = arith.constant 0 : index
    %c0_0 = arith.constant 0 : index
    %0 = vector.load %arg1[%c0, %c0_0] : memref<9x128xbf16, #tpu.memory_space<vmem>>, vector<9x128xbf16>
    %cst = arith.constant dense<0xFF80> : vector<128xbf16>
    %1 = vector.multi_reduction <maximumf>, %0, %cst [0] : vector<9x128xbf16> to vector<128xbf16>
    %2 = vector.shape_cast %1 : vector<128xbf16> to vector<1x128xbf16>
    %c0_1 = arith.constant 0 : index
    %c0_2 = arith.constant 0 : index
    %3 = vector.load %arg2[%c0_1, %c0_2] : memref<1x128xbf16, #tpu.memory_space<vmem>>, vector<1x128xbf16>
    tpu.vector_store %arg2[%c0_1, %c0_2], %2 {strides = array<i32>} : memref<1x128xbf16, #tpu.memory_space<vmem>>, vector<1x128xbf16>,
    return
  }
  func.func @transform_0(%arg0: i32) -> (i32, i32) {
    %c0_i32 = arith.constant 0 : i32
    %c0_i32_0 = arith.constant 0 : i32
    return %c0_i32, %arg0 : i32, i32
  }
  func.func @transform_1(%arg0: i32) -> (i32, i32) {
    %c0_i32 = arith.constant 0 : i32
    %c0_i32_0 = arith.constant 0 : i32
    return %c0_i32, %arg0 : i32, i32
  }
}

module attributes {stable_mosaic.version = 11 : i64} {
  func.func @_matmul_bias_kernel(%arg0: i32, %arg1: memref<8x40xbf16, #tpu.memory_space<vmem>>, %arg2: memref<40x8xbf16, #tpu.memory_space<vmem>>, %arg3: memref<1x8xf32, #tpu.memory_space<vmem>>, %arg4: memref<8x8xbf16, #tpu.memory_space<vmem>>) attributes {dimension_semantics = [#tpu.dimension_semantics<parallel>], iteration_bounds = array<i64: 1>, scalar_prefetch = 0 : i64, scratch_operands = 0 : i64, tpu.core_type = #tpu.core_type<tc>, window_params = [{transform_indices = @transform_0, window_bounds = array<i64: 8, 40>}, {pipeline_mode = #tpu.pipeline_mode<synchronous>, transform_indices = @transform_1, window_bounds = array<i64: 40, 8>}, {pipeline_mode = #tpu.pipeline_mode<synchronous>, transform_indices = @transform_2, window_bounds = array<i64: 1, 8>}, {transform_indices = @transform_3, window_bounds = array<i64: 8, 8>}]} {
    %c0 = arith.constant 0 : index
    %c0_0 = arith.constant 0 : index
    %0 = vector.load %arg1[%c0, %c0_0] : memref<8x40xbf16, #tpu.memory_space<vmem>>, vector<8x40xbf16>
    %c0_1 = arith.constant 0 : index
    %c0_2 = arith.constant 0 : index
    %1 = vector.load %arg2[%c0_1, %c0_2] : memref<40x8xbf16, #tpu.memory_space<vmem>>, vector<40x8xbf16>
    %cst = arith.constant dense<0.000000e+00> : vector<8x8xf32>
    %2 = tpu.matmul %0, %1, %cst {dimension_numbers = #tpu.dot_dimension_numbers<[1], [0], [0], [1], [0, 0, 1, 1], [], []>} : vector<8x40xbf16>, vector<40x8xbf16>, vector<8x8xf32> -> vector<8x8xf32>
    %c0_3 = arith.constant 0 : index
    %c0_4 = arith.constant 0 : index
    %3 = vector.load %arg3[%c0_3, %c0_4] : memref<1x8xf32, #tpu.memory_space<vmem>>, vector<1x8xf32>
    %4 = vector.broadcast %3 : vector<1x8xf32> to vector<8x8xf32>
    %5 = arith.addf %2, %4 : vector<8x8xf32>
    %cst_5 = arith.constant 0.000000e+00 : f32
    %6 = vector.broadcast %cst_5 : f32 to vector<8x8xf32>
    %7 = arith.maximumf %5, %6 : vector<8x8xf32>
    %8 = arith.truncf %7 : vector<8x8xf32> to vector<8x8xbf16>
    %c0_6 = arith.constant 0 : index
    %c0_7 = arith.constant 0 : index
    %9 = vector.load %arg4[%c0_6, %c0_7] : memref<8x8xbf16, #tpu.memory_space<vmem>>, vector<8x8xbf16>
    tpu.vector_store %arg4[%c0_6, %c0_7], %8 {strides = array<i32>} : memref<8x8xbf16, #tpu.memory_space<vmem>>, vector<8x8xbf16>,
    return
  }
  func.func @transform_0(%arg0: i32) -> (i32, i32) {
    %c0_i32 = arith.constant 0 : i32
    %c0_i32_0 = arith.constant 0 : i32
    return %arg0, %c0_i32 : i32, i32
  }
  func.func @transform_1(%arg0: i32) -> (i32, i32) {
    %c0_i32 = arith.constant 0 : i32
    %c0_i32_0 = arith.constant 0 : i32
    %c0_i32_1 = arith.constant 0 : i32
    return %c0_i32, %c0_i32_0 : i32, i32
  }
  func.func @transform_2(%arg0: i32) -> (i32, i32) {
    %c0_i32 = arith.constant 0 : i32
    %c0_i32_0 = arith.constant 0 : i32
    %c0_i32_1 = arith.constant 0 : i32
    return %c0_i32, %c0_i32_0 : i32, i32
  }
  func.func @transform_3(%arg0: i32) -> (i32, i32) {
    %c0_i32 = arith.constant 0 : i32
    %c0_i32_0 = arith.constant 0 : i32
    return %arg0, %c0_i32 : i32, i32
  }
}

module attributes {stable_mosaic.version = 11 : i64} {
  func.func @_matmul_bias_kernel(%arg0: i32, %arg1: memref<8x40xbf16, #tpu.memory_space<vmem>>, %arg2: memref<40x20xbf16, #tpu.memory_space<vmem>>, %arg3: memref<1x20xf32, #tpu.memory_space<vmem>>, %arg4: memref<8x20xbf16, #tpu.memory_space<vmem>>) attributes {dimension_semantics = [#tpu.dimension_semantics<parallel>], iteration_bounds = array<i64: 1>, scalar_prefetch = 0 : i64, scratch_operands = 0 : i64, tpu.core_type = #tpu.core_type<tc>, window_params = [{transform_indices = @transform_0, window_bounds = array<i64: 8, 40>}, {pipeline_mode = #tpu.pipeline_mode<synchronous>, transform_indices = @transform_1, window_bounds = array<i64: 40, 20>}, {pipeline_mode = #tpu.pipeline_mode<synchronous>, transform_indices = @transform_2, window_bounds = array<i64: 1, 20>}, {transform_indices = @transform_3, window_bounds = array<i64: 8, 20>}]} {
    %c0 = arith.constant 0 : index
    %c0_0 = arith.constant 0 : index
    %0 = vector.load %arg1[%c0, %c0_0] : memref<8x40xbf16, #tpu.memory_space<vmem>>, vector<8x40xbf16>
    %c0_1 = arith.constant 0 : index
    %c0_2 = arith.constant 0 : index
    %1 = vector.load %arg2[%c0_1, %c0_2] : memref<40x20xbf16, #tpu.memory_space<vmem>>, vector<40x20xbf16>
    %cst = arith.constant dense<0.000000e+00> : vector<8x20xf32>
    %2 = tpu.matmul %0, %1, %cst {dimension_numbers = #tpu.dot_dimension_numbers<[1], [0], [0], [1], [0, 0, 1, 1], [], []>} : vector<8x40xbf16>, vector<40x20xbf16>, vector<8x20xf32> -> vector<8x20xf32>
    %c0_3 = arith.constant 0 : index
    %c0_4 = arith.constant 0 : index
    %3 = vector.load %arg3[%c0_3, %c0_4] : memref<1x20xf32, #tpu.memory_space<vmem>>, vector<1x20xf32>
    %4 = vector.broadcast %3 : vector<1x20xf32> to vector<8x20xf32>
    %5 = arith.addf %2, %4 : vector<8x20xf32>
    %cst_5 = arith.constant 0.000000e+00 : f32
    %6 = vector.broadcast %cst_5 : f32 to vector<8x20xf32>
    %7 = arith.maximumf %5, %6 : vector<8x20xf32>
    %8 = arith.truncf %7 : vector<8x20xf32> to vector<8x20xbf16>
    %c0_6 = arith.constant 0 : index
    %c0_7 = arith.constant 0 : index
    %9 = vector.load %arg4[%c0_6, %c0_7] : memref<8x20xbf16, #tpu.memory_space<vmem>>, vector<8x20xbf16>
    tpu.vector_store %arg4[%c0_6, %c0_7], %8 {strides = array<i32>} : memref<8x20xbf16, #tpu.memory_space<vmem>>, vector<8x20xbf16>,
    return
  }
  func.func @transform_0(%arg0: i32) -> (i32, i32) {
    %c0_i32 = arith.constant 0 : i32
    %c0_i32_0 = arith.constant 0 : i32
    return %arg0, %c0_i32 : i32, i32
  }
  func.func @transform_1(%arg0: i32) -> (i32, i32) {
    %c0_i32 = arith.constant 0 : i32
    %c0_i32_0 = arith.constant 0 : i32
    %c0_i32_1 = arith.constant 0 : i32
    return %c0_i32, %c0_i32_0 : i32, i32
  }
  func.func @transform_2(%arg0: i32) -> (i32, i32) {
    %c0_i32 = arith.constant 0 : i32
    %c0_i32_0 = arith.constant 0 : i32
    %c0_i32_1 = arith.constant 0 : i32
    return %c0_i32, %c0_i32_0 : i32, i32
  }
  func.func @transform_3(%arg0: i32) -> (i32, i32) {
    %c0_i32 = arith.constant 0 : i32
    %c0_i32_0 = arith.constant 0 : i32
    return %arg0, %c0_i32 : i32, i32
  }
}

module attributes {stable_mosaic.version = 11 : i64} {
  func.func @_mean_reduce_kernel(%arg0: memref<2x1x40xbf16, #tpu.memory_space<vmem>>, %arg1: memref<2x40xf32, #tpu.memory_space<vmem>>) attributes {dimension_semantics = [], scalar_prefetch = 0 : i64, scratch_operands = 0 : i64, tpu.core_type = #tpu.core_type<tc>} {
    %c0 = arith.constant 0 : index
    %c0_0 = arith.constant 0 : index
    %c0_1 = arith.constant 0 : index
    %0 = vector.load %arg0[%c0, %c0_0, %c0_1] : memref<2x1x40xbf16, #tpu.memory_space<vmem>>, vector<2x1x40xbf16>
    %1 = arith.extf %0 : vector<2x1x40xbf16> to vector<2x1x40xf32>
    %cst = arith.constant dense<0.000000e+00> : vector<2x40xf32>
    %2 = vector.multi_reduction <add>, %1, %cst [1] : vector<2x1x40xf32> to vector<2x40xf32>
    %cst_2 = arith.constant 1.000000e+00 : f32
    %3 = vector.broadcast %cst_2 : f32 to vector<2x40xf32>
    %4 = arith.divf %2, %3 : vector<2x40xf32>
    %c0_3 = arith.constant 0 : index
    %c0_4 = arith.constant 0 : index
    %5 = vector.load %arg1[%c0_3, %c0_4] : memref<2x40xf32, #tpu.memory_space<vmem>>, vector<2x40xf32>
    tpu.vector_store %arg1[%c0_3, %c0_4], %4 {strides = array<i32>} : memref<2x40xf32, #tpu.memory_space<vmem>>, vector<2x40xf32>,
    return
  }
}

module attributes {stable_mosaic.version = 11 : i64} {
  func.func @_matmul_bias_kernel(%arg0: i32, %arg1: memref<8x40xbf16, #tpu.memory_space<vmem>>, %arg2: memref<40x100xbf16, #tpu.memory_space<vmem>>, %arg3: memref<1x100xf32, #tpu.memory_space<vmem>>, %arg4: memref<8x100xf32, #tpu.memory_space<vmem>>) attributes {dimension_semantics = [#tpu.dimension_semantics<parallel>], iteration_bounds = array<i64: 1>, scalar_prefetch = 0 : i64, scratch_operands = 0 : i64, tpu.core_type = #tpu.core_type<tc>, window_params = [{transform_indices = @transform_0, window_bounds = array<i64: 8, 40>}, {pipeline_mode = #tpu.pipeline_mode<synchronous>, transform_indices = @transform_1, window_bounds = array<i64: 40, 100>}, {pipeline_mode = #tpu.pipeline_mode<synchronous>, transform_indices = @transform_2, window_bounds = array<i64: 1, 100>}, {transform_indices = @transform_3, window_bounds = array<i64: 8, 100>}]} {
    %c0 = arith.constant 0 : index
    %c0_0 = arith.constant 0 : index
    %0 = vector.load %arg1[%c0, %c0_0] : memref<8x40xbf16, #tpu.memory_space<vmem>>, vector<8x40xbf16>
    %c0_1 = arith.constant 0 : index
    %c0_2 = arith.constant 0 : index
    %1 = vector.load %arg2[%c0_1, %c0_2] : memref<40x100xbf16, #tpu.memory_space<vmem>>, vector<40x100xbf16>
    %cst = arith.constant dense<0.000000e+00> : vector<8x100xf32>
    %2 = tpu.matmul %0, %1, %cst {dimension_numbers = #tpu.dot_dimension_numbers<[1], [0], [0], [1], [0, 0, 1, 1], [], []>} : vector<8x40xbf16>, vector<40x100xbf16>, vector<8x100xf32> -> vector<8x100xf32>
    %c0_3 = arith.constant 0 : index
    %c0_4 = arith.constant 0 : index
    %3 = vector.load %arg3[%c0_3, %c0_4] : memref<1x100xf32, #tpu.memory_space<vmem>>, vector<1x100xf32>
    %4 = vector.broadcast %3 : vector<1x100xf32> to vector<8x100xf32>
    %5 = arith.addf %2, %4 : vector<8x100xf32>
    %c0_5 = arith.constant 0 : index
    %c0_6 = arith.constant 0 : index
    %6 = vector.load %arg4[%c0_5, %c0_6] : memref<8x100xf32, #tpu.memory_space<vmem>>, vector<8x100xf32>
    tpu.vector_store %arg4[%c0_5, %c0_6], %5 {strides = array<i32>} : memref<8x100xf32, #tpu.memory_space<vmem>>, vector<8x100xf32>,
    return
  }
  func.func @transform_0(%arg0: i32) -> (i32, i32) {
    %c0_i32 = arith.constant 0 : i32
    %c0_i32_0 = arith.constant 0 : i32
    return %arg0, %c0_i32 : i32, i32
  }
  func.func @transform_1(%arg0: i32) -> (i32, i32) {
    %c0_i32 = arith.constant 0 : i32
    %c0_i32_0 = arith.constant 0 : i32
    %c0_i32_1 = arith.constant 0 : i32
    return %c0_i32, %c0_i32_0 : i32, i32
  }
  func.func @transform_2(%arg0: i32) -> (i32, i32) {
    %c0_i32 = arith.constant 0 : i32
    %c0_i32_0 = arith.constant 0 : i32
    %c0_i32_1 = arith.constant 0 : i32
    return %c0_i32, %c0_i32_0 : i32, i32
  }
  func.func @transform_3(%arg0: i32) -> (i32, i32) {
    %c0_i32 = arith.constant 0 : i32
    %c0_i32_0 = arith.constant 0 : i32
    return %arg0, %c0_i32 : i32, i32
  }
}

</mosaic_0001>

<bundles_post_ra>
// kernel: squeeze.16
= control target key start
LH: loop header
LB: loop body
LE: loop exit
PB: predicated region body
PF: predicated region fallthrough
CT: control target
= control target key end

     0   :  { %vm19_vm0 = vcmask 64512   ;;  %s408_s8 = smov 104   ;;  %s409_s9 = smov 112   ;;  %s523_s0 = inlined_call_operand.vmem [shape: bf16[1024], index: 0, kind: input, shape index: {}]   ;;  %s524_s1 = inlined_call_operand.vmem [shape: bf16[128,8], index: 1, kind: output, shape index: {}]  }
   0x1   :  { %v14_v0 = vld [vmem:[%s523_s0] sm:$0xf]  ;;  %s407_s0 = smov 120   ;;  %s410_s10 = smov 96  }
   0x2   :  { %v15_v1 = vunpack.c.l.bf16 %v14_v0  ;;  %s411_s11 = smov 88   ;;  %s412_s12 = smov 80  }
   0x3   :  { %s413_s13 = smov 72   ;;  %s414_s14 = smov 64  }
   0x4   :  { %25 = vrot.lane.b32.xlu0 %v15_v1, %s407_s0  ;;  %49 = vrot.lane.b32.xlu1 %v15_v1, %s408_s8  ;;  %20 = vst.msk [vmem:[#allocation0] ss:$16 sm:$0x3] %vm19_vm0, %v15_v1   ;;  %21 = vst.msk [vmem:[#allocation0] ss:$16 sm:$0xc] %vm19_vm0, %v15_v1  }
   0x5   :  { %22 = vst.msk [vmem:[#allocation0] ss:$16 sm:$0x30] %vm19_vm0, %v15_v1   ;;  %23 = vst.msk [vmem:[#allocation0] ss:$16 sm:$0xc0] %vm19_vm0, %v15_v1  }
   0x6   :  { %s415_s15 = smov 56   ;;  %s416_s16 = smov 48  }
   0x7   :  { %s417_s17 = smov 40   ;;  %s418_s18 = smov 32  }
   0x8   :  { %37 = vrot.lane.b32.xlu0 %v15_v1, %s409_s9  ;;  %61 = vrot.lane.b32.xlu1 %v15_v1, %s410_s10  ;;  %s419_s19 = smov 24   ;;  %s420_s20 = smov 16  }
   0x9   :  { %s421_s21 = smov 8  }
   0xc   :  { %73 = vrot.lane.b32.xlu0 %v15_v1, %s411_s11  ;;  %85 = vrot.lane.b32.xlu1 %v15_v1, %s412_s12 }
  0x10   :  { %97 = vrot.lane.b32.xlu0 %v15_v1, %s413_s13  ;;  %109 = vrot.lane.b32.xlu1 %v15_v1, %s414_s14 }
  0x14   :  { %121 = vrot.lane.b32.xlu0 %v15_v1, %s415_s15  ;;  %133 = vrot.lane.b32.xlu1 %v15_v1, %s416_s16 }
  0x18   :  { %145 = vrot.lane.b32.xlu0 %v15_v1, %s417_s17  ;;  %157 = vrot.lane.b32.xlu1 %v15_v1, %s418_s18 }
  0x1c   :  { %169 = vrot.lane.b32.xlu0 %v15_v1, %s419_s19  ;;  %181 = vrot.lane.b32.xlu1 %v15_v1, %s420_s20 }
  0x20   :  { %193 = vrot.lane.b32.xlu0 %v15_v1, %s421_s21 }
  0x76   :  { %v26_v2 = vpop.permute.xlu0 %25   ;;  %v50_v3 = vpop.permute.xlu1 %49  }
  0x77   :  { %29 = vst.msk [vmem:[#allocation0 + $0x1] ss:$16 sm:$0x3] %vm19_vm0, %v26_v2   ;;  %31 = vst.msk [vmem:[#allocation0 + $0x1] ss:$16 sm:$0xc] %vm19_vm0, %v26_v2  }
  0x78   :  { %33 = vst.msk [vmem:[#allocation0 + $0x1] ss:$16 sm:$0x30] %vm19_vm0, %v26_v2   ;;  %35 = vst.msk [vmem:[#allocation0 + $0x1] ss:$16 sm:$0xc0] %vm19_vm0, %v26_v2  }
  0x79   :  { %53 = vst.msk [vmem:[#allocation0 + $0x3] ss:$16 sm:$0x3] %vm19_vm0, %v50_v3   ;;  %55 = vst.msk [vmem:[#allocation0 + $0x3] ss:$16 sm:$0xc] %vm19_vm0, %v50_v3  }
  0x7a   :  { %57 = vst.msk [vmem:[#allocation0 + $0x3] ss:$16 sm:$0x30] %vm19_vm0, %v50_v3   ;;  %59 = vst.msk [vmem:[#allocation0 + $0x3] ss:$16 sm:$0xc0] %vm19_vm0, %v50_v3   ;;  %v38_v4 = vpop.permute.xlu0 %37   ;;  %v62_v5 = vpop.permute.xlu1 %61  }
  0x7b   :  { %41 = vst.msk [vmem:[#allocation0 + $0x2] ss:$16 sm:$0x3] %vm19_vm0, %v38_v4   ;;  %43 = vst.msk [vmem:[#allocation0 + $0x2] ss:$16 sm:$0xc] %vm19_vm0, %v38_v4  }
  0x7c   :  { %45 = vst.msk [vmem:[#allocation0 + $0x2] ss:$16 sm:$0x30] %vm19_vm0, %v38_v4   ;;  %47 = vst.msk [vmem:[#allocation0 + $0x2] ss:$16 sm:$0xc0] %vm19_vm0, %v38_v4  }
  0x7d   :  { %65 = vst.msk [vmem:[#allocation0 + $0x4] ss:$16 sm:$0x3] %vm19_vm0, %v62_v5   ;;  %67 = vst.msk [vmem:[#allocation0 + $0x4] ss:$16 sm:$0xc] %vm19_vm0, %v62_v5  }
  0x7e   :  { %69 = vst.msk [vmem:[#allocation0 + $0x4] ss:$16 sm:$0x30] %vm19_vm0, %v62_v5   ;;  %71 = vst.msk [vmem:[#allocation0 + $0x4] ss:$16 sm:$0xc0] %vm19_vm0, %v62_v5   ;;  %v74_v6 = vpop.permute.xlu0 %73   ;;  %v86_v7 = vpop.permute.xlu1 %85  }
  0x7f   :  { %77 = vst.msk [vmem:[#allocation0 + $0x5] ss:$16 sm:$0x3] %vm19_vm0, %v74_v6   ;;  %79 = vst.msk [vmem:[#allocation0 + $0x5] ss:$16 sm:$0xc] %vm19_vm0, %v74_v6  }
  0x80   :  { %81 = vst.msk [vmem:[#allocation0 + $0x5] ss:$16 sm:$0x30] %vm19_vm0, %v74_v6   ;;  %83 = vst.msk [vmem:[#allocation0 + $0x5] ss:$16 sm:$0xc0] %vm19_vm0, %v74_v6  }
  0x81   :  { %89 = vst.msk [vmem:[#allocation0 + $0x6] ss:$16 sm:$0x3] %vm19_vm0, %v86_v7   ;;  %91 = vst.msk [vmem:[#allocation0 + $0x6] ss:$16 sm:$0xc] %vm19_vm0, %v86_v7  }
  0x82   :  { %93 = vst.msk [vmem:[#allocation0 + $0x6] ss:$16 sm:$0x30] %vm19_vm0, %v86_v7   ;;  %95 = vst.msk [vmem:[#allocation0 + $0x6] ss:$16 sm:$0xc0] %vm19_vm0, %v86_v7   ;;  %v98_v8 = vpop.permute.xlu0 %97   ;;  %v110_v9 = vpop.permute.xlu1 %109  }
  0x83   :  { %101 = vst.msk [vmem:[#allocation0 + $0x7] ss:$16 sm:$0x3] %vm19_vm0, %v98_v8   ;;  %103 = vst.msk [vmem:[#allocation0 + $0x7] ss:$16 sm:$0xc] %vm19_vm0, %v98_v8  }
  0x84   :  { %105 = vst.msk [vmem:[#allocation0 + $0x7] ss:$16 sm:$0x30] %vm19_vm0, %v98_v8   ;;  %107 = vst.msk [vmem:[#allocation0 + $0x7] ss:$16 sm:$0xc0] %vm19_vm0, %v98_v8  }
  0x85   :  { %113 = vst.msk [vmem:[#allocation0 + $0x8] ss:$16 sm:$0x3] %vm19_vm0, %v110_v9   ;;  %115 = vst.msk [vmem:[#allocation0 + $0x8] ss:$16 sm:$0xc] %vm19_vm0, %v110_v9  }
  0x86   :  { %117 = vst.msk [vmem:[#allocation0 + $0x8] ss:$16 sm:$0x30] %vm19_vm0, %v110_v9   ;;  %119 = vst.msk [vmem:[#allocation0 + $0x8] ss:$16 sm:$0xc0] %vm19_vm0, %v110_v9   ;;  %v122_v10 = vpop.permute.xlu0 %121   ;;  %v134_v11 = vpop.permute.xlu1 %133  }
  0x87   :  { %125 = vst.msk [vmem:[#allocation0 + $0x9] ss:$16 sm:$0x3] %vm19_vm0, %v122_v10   ;;  %127 = vst.msk [vmem:[#allocation0 + $0x9] ss:$16 sm:$0xc] %vm19_vm0, %v122_v10  }
  0x88   :  { %129 = vst.msk [vmem:[#allocation0 + $0x9] ss:$16 sm:$0x30] %vm19_vm0, %v122_v10   ;;  %131 = vst.msk [vmem:[#allocation0 + $0x9] ss:$16 sm:$0xc0] %vm19_vm0, %v122_v10  }
  0x89   :  { %137 = vst.msk [vmem:[#allocation0 + $0xa] ss:$16 sm:$0x3] %vm19_vm0, %v134_v11   ;;  %139 = vst.msk [vmem:[#allocation0 + $0xa] ss:$16 sm:$0xc] %vm19_vm0, %v134_v11  }
  0x8a   :  { %141 = vst.msk [vmem:[#allocation0 + $0xa] ss:$16 sm:$0x30] %vm19_vm0, %v134_v11   ;;  %143 = vst.msk [vmem:[#allocation0 + $0xa] ss:$16 sm:$0xc0] %vm19_vm0, %v134_v11   ;;  %v146_v12 = vpop.permute.xlu0 %145   ;;  %v158_v13 = vpop.permute.xlu1 %157  }
  0x8b   :  { %149 = vst.msk [vmem:[#allocation0 + $0xb] ss:$16 sm:$0x3] %vm19_vm0, %v146_v12   ;;  %151 = vst.msk [vmem:[#allocation0 + $0xb] ss:$16 sm:$0xc] %vm19_vm0, %v146_v12  }
  0x8c   :  { %153 = vst.msk [vmem:[#allocation0 + $0xb] ss:$16 sm:$0x30] %vm19_vm0, %v146_v12   ;;  %155 = vst.msk [vmem:[#allocation0 + $0xb] ss:$16 sm:$0xc0] %vm19_vm0, %v146_v12  }
  0x8d   :  { %161 = vst.msk [vmem:[#allocation0 + $0xc] ss:$16 sm:$0x3] %vm19_vm0, %v158_v13   ;;  %163 = vst.msk [vmem:[#allocation0 + $0xc] ss:$16 sm:$0xc] %vm19_vm0, %v158_v13  }
  0x8e   :  { %165 = vst.msk [vmem:[#allocation0 + $0xc] ss:$16 sm:$0x30] %vm19_vm0, %v158_v13   ;;  %167 = vst.msk [vmem:[#allocation0 + $0xc] ss:$16 sm:$0xc0] %vm19_vm0, %v158_v13   ;;  %v170_v14 = vpop.permute.xlu0 %169   ;;  %v182_v15 = vpop.permute.xlu1 %181  }
  0x8f   :  { %173 = vst.msk [vmem:[#allocation0 + $0xd] ss:$16 sm:$0x3] %vm19_vm0, %v170_v14   ;;  %175 = vst.msk [vmem:[#allocation0 + $0xd] ss:$16 sm:$0xc] %vm19_vm0, %v170_v14  }
  0x90   :  { %177 = vst.msk [vmem:[#allocation0 + $0xd] ss:$16 sm:$0x30] %vm19_vm0, %v170_v14   ;;  %179 = vst.msk [vmem:[#allocation0 + $0xd] ss:$16 sm:$0xc0] %vm19_vm0, %v170_v14  }
  0x91   :  { %185 = vst.msk [vmem:[#allocation0 + $0xe] ss:$16 sm:$0x3] %vm19_vm0, %v182_v15   ;;  %187 = vst.msk [vmem:[#allocation0 + $0xe] ss:$16 sm:$0xc] %vm19_vm0, %v182_v15  }
  0x92   :  { %189 = vst.msk [vmem:[#allocation0 + $0xe] ss:$16 sm:$0x30] %vm19_vm0, %v182_v15   ;;  %191 = vst.msk [vmem:[#allocation0 + $0xe] ss:$16 sm:$0xc0] %vm19_vm0, %v182_v15   ;;  %v194_v16 = vpop.permute.xlu0 %193  }
  0x93   :  { %197 = vst.msk [vmem:[#allocation0 + $0xf] ss:$16 sm:$0x3] %vm19_vm0, %v194_v16   ;;  %199 = vst.msk [vmem:[#allocation0 + $0xf] ss:$16 sm:$0xc] %vm19_vm0, %v194_v16  }
  0x94   :  { %201 = vst.msk [vmem:[#allocation0 + $0xf] ss:$16 sm:$0x30] %vm19_vm0, %v194_v16   ;;  %203 = vst.msk [vmem:[#allocation0 + $0xf] ss:$16 sm:$0xc0] %vm19_vm0, %v194_v16  }
  0x95   :  { %v208_v17 = vld [vmem:[#allocation0] sm:$0xff]  ;;  %v219_v18 = vld [vmem:[#allocation0 + $0x10] sm:$0xff] }
  0x96   :  { %v233_v19 = vld [vmem:[#allocation0 + $0x20] sm:$0xff]  ;;  %v247_v20 = vld [vmem:[#allocation0 + $0x30] sm:$0xff] }
  0x97   :  { %v289_v21 = vld [vmem:[#allocation0 + $0x60] sm:$0xff]  ;;  %v303_v22 = vld [vmem:[#allocation0 + $0x70] sm:$0xff] }
  0x98   :  { %v261_v23 = vld [vmem:[#allocation0 + $0x40] sm:$0xff]  ;;  %v275_v33 = vld [vmem:[#allocation0 + $0x50] sm:$0xff] }
  0x9a   :  { %v213_v26 = vld [vmem:[#allocation0 + $0x8] sm:$0xff]  ;;  %v226_v30 = vld [vmem:[#allocation0 + $0x18] sm:$0xff] }
  0x9b   :  { %v296_v24 = vld [vmem:[#allocation0 + $0x68] sm:$0xff]  ;;  %v310_v25 = vld [vmem:[#allocation0 + $0x78] sm:$0xff]  ;;  %v348_v29 = vpack.c.bf16 %v213_v26, %v208_v17  ;;  %v353_v34 = vpack.c.bf16 %v226_v30, %v219_v18 }
  0x9c   :  { %v378_v27 = vpack.c.bf16 %v296_v24, %v289_v21  ;;  %v383_v28 = vpack.c.bf16 %v310_v25, %v303_v22  ;;  %v240_v31 = vld [vmem:[#allocation0 + $0x28] sm:$0xff]  ;;  %v254_v32 = vld [vmem:[#allocation0 + $0x38] sm:$0xff] }
  0x9d   :  { %v358_v35 = vpack.c.bf16 %v240_v31, %v233_v19  ;;  %v363_v36 = vpack.c.bf16 %v254_v32, %v247_v20  ;;  %v268_v37 = vld [vmem:[#allocation0 + $0x48] sm:$0xff]  ;;  %v282_v38 = vld [vmem:[#allocation0 + $0x58] sm:$0xff]  ;;  %349 = vst [vmem:[%s524_s1] sm:$0xff] %v348_v29   ;;  %385 = vst [vmem:[%s524_s1 + $0x8] sm:$0xff] %v353_v34  }
  0x9e   :  { %390 = vst [vmem:[%s524_s1 + $0x30] sm:$0xff] %v378_v27   ;;  %391 = vst [vmem:[%s524_s1 + $0x38] sm:$0xff] %v383_v28   ;;  %v368_v39 = vpack.c.bf16 %v268_v37, %v261_v23  ;;  %v373_v40 = vpack.c.bf16 %v282_v38, %v275_v33 }
  0x9f   :  { %386 = vst [vmem:[%s524_s1 + $0x10] sm:$0xff] %v358_v35   ;;  %387 = vst [vmem:[%s524_s1 + $0x18] sm:$0xff] %v363_v36  }
  0xa0   :  { %388 = vst [vmem:[%s524_s1 + $0x20] sm:$0xff] %v368_v39   ;;  %389 = vst [vmem:[%s524_s1 + $0x28] sm:$0xff] %v373_v40  }

// kernel: _lambda_.46
= control target key start
LH: loop header
LB: loop body
LE: loop exit
PB: predicated region body
PF: predicated region fallthrough
CT: control target
= control target key end

     0   :  { %vm57_vm0 = vcmask 1044480   ;;  %vm58_vm1 = vsmask.f32 4352  ;;  %v163_v0 = vlaneseq  ;;  %v252_v4 = vmov 1966171168   ;;  %s332_s0 = inlined_call_operand.vmem [shape: bf16[9,1024], index: 0, kind: input, shape index: {}]   ;;  %s333_s1 = inlined_call_operand.vmem [shape: bf16[1,1024], index: 1, kind: output, shape index: {}]  }
   0x1   :  { %v9_v1 = vld [vmem:[%s332_s0] sm:$0xff]  ;;  %v10_v2 = vld [vmem:[%s332_s0 + $0x8] sm:$0xff]  ;;  %v11_v3 = vld [vmem:[%s332_s0 + $0x10] sm:$0xff]  ;;  %v272_v5 = vunpack.c.l.s4 %v252_v4  ;;  %vm206_vm3 = vcmask 1040384   ;;  %vm207_vm4 = vsmask.f32 256 }
   0x2   :  { %v12_v6 = vld [vmem:[%s332_s0 + $0x18] sm:$0xff]  ;;  %v13_v7 = vld [vmem:[%s332_s0 + $0x20] sm:$0x11]  ;;  %v14_v8 = vld [vmem:[%s332_s0 + $0x28] sm:$0x11]  ;;  %v283_v9 = vshrl.u32 %v163_v0, 7 }
   0x3   :  { %v15_v10 = vld [vmem:[%s332_s0 + $0x30] sm:$0x11]  ;;  %v16_v11 = vld [vmem:[%s332_s0 + $0x38] sm:$0x11]  ;;  %v243_v12 = vcombine.low %v9_v1, %v13_v7  ;;  %v244_v13 = vcombine.high %v9_v1, %v13_v7  ;;  %v245_v14 = vcombine.low %v10_v2, %v14_v8  ;;  %v246_v15 = vcombine.high %v10_v2, %v14_v8  ;;  %vm293_vm2 = vmand %vm57_vm0, %vm58_vm1 }
   0x4   :  { %v247_v17 = vcombine.low %v11_v3, %v15_v10  ;;  %v248_v18 = vcombine.high %v11_v3, %v15_v10  ;;  %v249_v19 = vcombine.low %v12_v6, %v16_v11  ;;  %v250_v20 = vcombine.high %v12_v6, %v16_v11  ;;  %vm316_vm5 = vmand %vm206_vm3, %vm207_vm4 }
   0x5   :  { %v60_v21 = vsel %vm293_vm2, %v243_v12, 4286644096  ;;  %v71_v22 = vsel %vm293_vm2, %v244_v13, 4286644096  ;;  %v82_v23 = vsel %vm293_vm2, %v245_v14, 4286644096  ;;  %v162_v24 = vunpack.c.0.s8 %v272_v5 }
   0x6   :  { %v61_v25 = vunpack.i.l.bf16 %v60_v21  ;;  %v62_v26 = vunpack.i.h.bf16 %v60_v21  ;;  %v72_v27 = vunpack.i.l.bf16 %v71_v22  ;;  %v73_v28 = vunpack.i.h.bf16 %v71_v22 }
   0x7   :  { %v83_v29 = vunpack.i.l.bf16 %v82_v23  ;;  %v84_v30 = vunpack.i.h.bf16 %v82_v23  ;;  %v93_v31 = vsel %vm293_vm2, %v246_v15, 4286644096  ;;  %v104_v32 = vsel %vm293_vm2, %v247_v17, 4286644096 }
   0x8   :  { %v63_v33 = vmax.f32 %v61_v25, %v62_v26  ;;  %v74_v34 = vmax.f32 %v72_v27, %v73_v28  ;;  %v94_v35 = vunpack.i.l.bf16 %v93_v31  ;;  %v95_v36 = vunpack.i.h.bf16 %v93_v31 }
   0x9   :  { %v85_v37 = vmax.f32 %v83_v29, %v84_v30  ;;  %v105_v38 = vunpack.i.l.bf16 %v104_v32  ;;  %v106_v39 = vunpack.i.h.bf16 %v104_v32  ;;  %v115_v40 = vsel %vm293_vm2, %v248_v18, 4286644096 }
   0xa   :  { %v64_v41 = vrot.slane %v63_v33, 4  ;;  %v75_v42 = vrot.slane %v74_v34, 4  ;;  %v96_v43 = vmax.f32 %v94_v35, %v95_v36  ;;  %v116_v44 = vunpack.i.l.bf16 %v115_v40 }
   0xb   :  { %v86_v45 = vrot.slane %v85_v37, 4  ;;  %v107_v46 = vmax.f32 %v105_v38, %v106_v39  ;;  %v117_v47 = vunpack.i.h.bf16 %v115_v40  ;;  %v126_v48 = vsel %vm293_vm2, %v249_v19, 4286644096 }
   0xc   :  { %v65_v49 = vmax.f32 %v63_v33, %v64_v41  ;;  %v76_v50 = vmax.f32 %v74_v34, %v75_v42  ;;  %v97_v51 = vrot.slane %v96_v43, 4  ;;  %v127_v52 = vunpack.i.l.bf16 %v126_v48 }
   0xd   :  { %v87_v53 = vmax.f32 %v85_v37, %v86_v45  ;;  %v108_v54 = vrot.slane %v107_v46, 4  ;;  %v118_v55 = vmax.f32 %v116_v44, %v117_v47  ;;  %v128_v56 = vunpack.i.h.bf16 %v126_v48 }
   0xe   :  { %v66_v57 = vrot.slane %v65_v49, 2  ;;  %v77_v58 = vrot.slane %v76_v50, 2  ;;  %v98_v59 = vmax.f32 %v96_v43, %v97_v51  ;;  %v137_v60 = vsel %vm293_vm2, %v250_v20, 4286644096 }
   0xf   :  { %v88_v61 = vrot.slane %v87_v53, 2  ;;  %v109_v62 = vmax.f32 %v107_v46, %v108_v54  ;;  %v119_v63 = vrot.slane %v118_v55, 4  ;;  %v129_v0 = vmax.f32 %v127_v52, %v128_v56 }
  0x10   :  { %v67_v1 = vmax.f32 %v65_v49, %v66_v57  ;;  %v78_v2 = vmax.f32 %v76_v50, %v77_v58  ;;  %v99_v3 = vrot.slane %v98_v59, 2  ;;  %v138_v4 = vunpack.i.l.bf16 %v137_v60 }
  0x11   :  { %v89_v6 = vmax.f32 %v87_v53, %v88_v61  ;;  %v110_v7 = vrot.slane %v109_v62, 2  ;;  %v120_v8 = vmax.f32 %v118_v55, %v119_v63  ;;  %v130_v10 = vrot.slane %v129_v0, 4 }
  0x12   :  { %v68_v11 = vrot.slane %v67_v1, 1  ;;  %v79_v12 = vrot.slane %v78_v2, 1  ;;  %v100_v13 = vmax.f32 %v98_v59, %v99_v3  ;;  %v139_v14 = vunpack.i.h.bf16 %v137_v60  ;;  %v236_v60 = vld [vmem:[%s333_s1] sm:$0xff] }
  0x13   :  { %v90_v15 = vrot.slane %v89_v6, 1  ;;  %v111_v16 = vmax.f32 %v109_v62, %v110_v7  ;;  %v121_v17 = vrot.slane %v120_v8, 2  ;;  %v131_v18 = vmax.f32 %v129_v0, %v130_v10 }
  0x14   :  { %v69_v19 = vmax.f32 %v67_v1, %v68_v11  ;;  %v80_v20 = vmax.f32 %v78_v2, %v79_v12  ;;  %v101_v21 = vrot.slane %v100_v13, 1  ;;  %v140_v22 = vmax.f32 %v138_v4, %v139_v14 }
  0x15   :  { %v91_v23 = vmax.f32 %v89_v6, %v90_v15  ;;  %v112_v25 = vrot.slane %v111_v16, 1  ;;  %v122_v26 = vmax.f32 %v120_v8, %v121_v17  ;;  %v132_v27 = vrot.slane %v131_v18, 2 }
  0x16   :  { %v70_v28 = vpack.i.bf16 %v69_v19, %v69_v19  ;;  %v81_v29 = vpack.i.bf16 %v80_v20, %v80_v20  ;;  %v102_v30 = vmax.f32 %v100_v13, %v101_v21  ;;  %v141_v31 = vrot.slane %v140_v22, 4 }
  0x17   :  { %v92_v32 = vpack.i.bf16 %v91_v23, %v91_v23  ;;  %v113_v33 = vmax.f32 %v111_v16, %v112_v25  ;;  %v123_v34 = vrot.slane %v122_v26, 1  ;;  %v133_v35 = vmax.f32 %v131_v18, %v132_v27 }
  0x18   :  { %v103_v36 = vpack.i.bf16 %v102_v30, %v102_v30  ;;  %v142_v37 = vmax.f32 %v140_v22, %v141_v31  ;;  %v156_v40 = vcombine.low %v70_v28, %v81_v29  ;;  %vm209_vm6 = vcmask 1041409  }
  0x19   :  { %v124_v38 = vmax.f32 %v122_v26, %v123_v34  ;;  %v134_v39 = vrot.slane %v133_v35, 1  ;;  %v114_v42 = vpack.i.bf16 %v113_v33, %v113_v33  ;;  %v165_v44 = vsub.s32 %v162_v24, %v283_v9 }
  0x1a   :  { %v143_v43 = vrot.slane %v142_v37, 2  ;;  %vm210_vm7 = vsmask.f32 1280  ;;  %v157_v46 = vcombine.low %v92_v32, %v103_v36  ;;  %vm213_vm9 = vcmask 1042434  }
  0x1b   :  { %v135_v45 = vmax.f32 %v133_v35, %v134_v39  ;;  %vm211_vm8 = vmand %vm209_vm6, %vm210_vm7  ;;  %vm214_vm10 = vsmask.f32 2304  ;;  %v125_v47 = vpack.i.bf16 %v124_v38, %v124_v38  ;;  %vm217_vm12 = vcmask 1043459  }
  0x1c   :  { %v144_v48 = vmax.f32 %v142_v37, %v143_v43  ;;  %vm212_vm11 = vmor %vm211_vm8, %vm316_vm5  ;;  %vm218_vm13 = vsmask.f32 3328  ;;  %vm221_vm0 = vcmask 1044484   ;;  %v166_v5 = vrot.slane %v156_v40, %v165_v44 }
  0x1d   :  { %vm215_vm14 = vmand %vm213_vm9, %vm214_vm10  ;;  %v136_v50 = vpack.i.bf16 %v135_v45, %v135_v45  ;;  %v173_v9 = vrot.slane %v157_v46, %v165_v44  ;;  %v158_v51 = vcombine.low %v114_v42, %v125_v47  ;;  %vm224_vm4 = vcmask 1045509  }
  0x1e   :  { %v145_v49 = vrot.slane %v144_v48, 1  ;;  %vm216_vm15 = vmor %vm215_vm14, %vm212_vm11  ;;  %vm225_vm6 = vsmask.f32 5376  ;;  %vm228_vm8 = vcmask 1046534   ;;  %vm229_vm9 = vsmask.f32 6400 }
  0x1f   :  { %vm219_vm2 = vmand %vm217_vm12, %vm218_vm13  ;;  %v180_v54 = vrot.slane %v158_v51, %v165_v44  ;;  %v188_v55 = vcombine.low %v166_v5, %v173_v9  ;;  %vm232_vm12 = vcmask 1047559   ;;  %vm233_vm13 = vsmask.f32 7424 }
  0x20   :  { %v146_v24 = vmax.f32 %v144_v48, %v145_v49  ;;  %vm220_vm3 = vmor %vm219_vm2, %vm216_vm15 }
  0x21   :  { %vm222_vm7 = vmand %vm221_vm0, %vm58_vm1  ;;  %v196_v58 = vrot.slane %v188_v55, %v165_v44 }
  0x22   :  { %v147_v52 = vpack.i.bf16 %v146_v24, %v146_v24  ;;  %vm223_vm5 = vmor %vm222_vm7, %vm220_vm3 }
  0x23   :  { %vm226_vm10 = vmand %vm224_vm4, %vm225_vm6 }
  0x24   :  { %v159_v53 = vcombine.low %v136_v50, %v147_v52  ;;  %vm227_vm11 = vmor %vm226_vm10, %vm223_vm5 }
  0x25   :  { %vm230_vm14 = vmand %vm228_vm8, %vm229_vm9 }
  0x26   :  { %v187_v56 = vrot.slane %v159_v53, %v165_v44  ;;  %vm231_vm2 = vmor %vm230_vm14, %vm227_vm11 }
  0x27   :  { %vm234_vm15 = vmand %vm232_vm12, %vm233_vm13 }
  0x28   :  { %v189_v57 = vcombine.low %v180_v54, %v187_v56  ;;  %vm235_vm0 = vmor %vm234_vm15, %vm231_vm2 }
  0x2a   :  { %v203_v59 = vrot.slane %v189_v57, %v165_v44 }
  0x2c   :  { %v204_v61 = vcombine.low %v196_v58, %v203_v59 }
  0x2e   :  { %v237_v62 = vsel %vm235_vm0, %v204_v61, %v236_v60 }
  0x2f   :  { %238 = vst [vmem:[%s333_s1] sm:$0xff] %v237_v62 }

// kernel: _lambda_.45
= control target key start
LH: loop header
LB: loop body
LE: loop exit
PB: predicated region body
PF: predicated region fallthrough
CT: control target
= control target key end

     0   :  { %s1157_s12 = smov 0   ;;  %s1361_s0 = inlined_call_operand.vmem [shape: bf16[512,147], index: 0, kind: input, shape index: {}]   ;;  %s1362_s1 = inlined_call_operand.vmem [shape: bf16[147,8], index: 1, kind: input, shape index: {}]   ;;  %s1363_s2 = inlined_call_operand.vmem [shape: f32[1,8], index: 2, kind: input, shape index: {}]   ;;  %s1364_s3 = inlined_call_operand.vmem [shape: bf16[512,8], index: 3, kind: output, shape index: {}]  }
   0x1 LB: > { %s903_s13 = sadd.s32 4294967295, %s1133_s12   ;;  %p907_p0 = scmp.ge.s32.totalorder %s1133_s12, 1  ;;  %s1133_s12 = sphi %s1157_s12, %s13_s12  }
   0x2   : > { %p139_p1 = scmp.lt.s32.totalorder %s1133_s12, 3 }
   0x4   : > { %p140_p2 = pnand %p907_p0, %p139_p1 }
   0x5   : > { %v1069_v0 = vld [vmem:[%s1362_s1] sm:$0xff] (!%p140_p2)   ;;  %v1135_v1 = vmov (!%p140_p2), 0   ;;  %v1070_v2 = vld [vmem:[%s1362_s1 + $0x8] sm:$0xff] (!%p140_p2)   ;;  %v1071_v3 = vld [vmem:[%s1362_s1 + $0x10] sm:$0xff] (!%p140_p2)   ;;  %s908_s20 = sshll.u32 (!%p140_p2), %s903_s13, 5  ;;  %vm437_vm0 = vcmask (!%p140_p2), 154624  }
   0x6   : > { %143 = sbr.rel (%p140_p2) target bundleno = 323 (0x143), region = 32  ;;  %493 = vmatprep.subr.bf16.mxu0 (!%p140_p2), %v1135_v1  ;;  %1039 = vmatprep.subr.bf16.mxu1 (!%p140_p2), %v1135_v1  ;;  %p165_p3 = scmp.lt.s32.totalorder (!%p140_p2), %s908_s20, 63  ;;  %v1072_v4 = vld [vmem:[%s1362_s1 + $0x18] sm:$0xff] (!%p140_p2)   ;;  %v1073_v5 = vld [vmem:[%s1362_s1 + $0x20] sm:$0xff] (!%p140_p2)   ;;  %v1074_v8 = vld [vmem:[%s1362_s1 + $0x28] sm:$0xff] (!%p140_p2)   ;;  %vm486_vm1 = vcmask (!%p140_p2), 1040384  }
   0x7   : > { %494 = vmatpush1.bf16.msra.mxu0 (!%p140_p2), %v1069_v0  ;;  %1049 = vmatpush1.bf16.msra.mxu1 (!%p140_p2), %v1069_v0  ;;  %v1075_v9 = vld [vmem:[%s1362_s1 + $0x30] sm:$0xff] (!%p140_p2)   ;;  %v1076_v10 = vld [vmem:[%s1362_s1 + $0x38] sm:$0xff] (!%p140_p2)   ;;  %vm487_vm2 = vcmask (!%p140_p2), 1041408   ;;  %v1136_v11 = vmov (!%p140_p2), 65535   ;;  %v1077_v13 = vld [vmem:[%s1362_s1 + $0x40] sm:$0xff] (!%p140_p2)   ;;  %vm814_vm3 = vcmask (!%p140_p2), 60416  }
   0x8   : > { %495 = vmatprep.subr.bf16.mxu0 (!%p140_p2), %v1135_v1  ;;  %1040 = vmatprep.subr.bf16.mxu1 (!%p140_p2), %v1135_v1  ;;  %v488_v12 = vsel (!%p140_p2), %vm486_vm1, 4294967295, %v1136_v11  ;;  %v1078_v14 = vld [vmem:[%s1362_s1 + $0x48] ss:$0 sps:$4 sm:$0x33] (!%p140_p2)   ;;  %v1254_v47 = vld [vmem:[%s1363_s2] ss:$0 sm:$0xff] (!%p140_p2) }
   0x9   : > { %v489_v15 = vsel (!%p140_p2), %vm487_vm2, %v488_v12, 0 }
   0xa   : > { %v491_v16 = vand.u32 (!%p140_p2), %v1078_v14, %v489_v15 }
   0xb   : > { %496 = vmatpush1.bf16.msra.mxu0 (!%p140_p2), %v1070_v2  ;;  %1050 = vmatpush1.bf16.msra.mxu1 (!%p140_p2), %v1070_v2 }
   0xc   : > { %497 = vmatprep.subr.bf16.mxu0 (!%p140_p2), %v1135_v1  ;;  %1041 = vmatprep.subr.bf16.mxu1 (!%p140_p2), %v1135_v1 }
   0xd   : > { %s1366_s20 = smov (!%p165_p3, %s908_s20), 63 }
   0xe   : > { %s1006_s23 = sshll.u32 %s1366_s20, 3  ;;  %s912_s15 = sshll.u32 %s1366_s20, 2 }
   0xf   : > { %498 = vmatpush1.bf16.msra.mxu0 %v1071_v3  ;;  %1051 = vmatpush1.bf16.msra.mxu1 %v1071_v3  ;;  %s1183_s26 = scalar_lea.vmem %s1361_s0, %s1006_s23  ;;  %s1264_s18 = scalar_lea.vmem %s1364_s3, %s912_s15 }
  0x10   : > { %499 = vmatprep.subr.bf16.mxu0 %v1135_v1  ;;  %1042 = vmatprep.subr.bf16.mxu1 %v1135_v1  ;;  %v1081_v6 = vld [vmem:[%s1183_s26 + $0x4] ss:$8 sps:$4 sm:$0xff]   ;;  %v1079_v17 = vld [vmem:[%s1183_s26] ss:$8 sps:$4 sm:$0xff]   ;;  %v1085_v19 = vld [vmem:[%s1183_s26 + $0x14] ss:$8 sps:$4 sm:$0xff]  }
  0x11   : > { %v1084_v7 = vld [vmem:[%s1183_s26 + $0x84] ss:$8 sps:$4 sm:$0xff]   ;;  %956 = vmatprep.mubr.msk.bf16.mxu0 %vm437_vm0, %v1081_v6  ;;  %v1082_v18 = vld [vmem:[%s1183_s26 + $0x80] ss:$8 sps:$4 sm:$0xff]   ;;  %v1087_v20 = vld [vmem:[%s1183_s26 + $0x94] ss:$8 sps:$4 sm:$0xff]  }
  0x12   : > { %964 = vmatprep.mubr.msk.bf16.mxu1 %vm437_vm0, %v1084_v7  ;;  %v1089_v21 = vld [vmem:[%s1183_s26 + $0x10] ss:$8 sps:$4 sm:$0xff]   ;;  %v1091_v23 = vld [vmem:[%s1183_s26 + $0x24] ss:$8 sps:$4 sm:$0xff]   ;;  %v1095_v25 = vld [vmem:[%s1183_s26 + $0x20] ss:$8 sps:$4 sm:$0xff]  }
  0x13   : > { %500 = vmatpush1.bf16.msra.mxu0 %v1072_v4  ;;  %1052 = vmatpush1.bf16.msra.mxu1 %v1072_v4  ;;  %v1090_v22 = vld [vmem:[%s1183_s26 + $0x90] ss:$8 sps:$4 sm:$0xff]   ;;  %v1093_v24 = vld [vmem:[%s1183_s26 + $0xa4] ss:$8 sps:$4 sm:$0xff]   ;;  %v1096_v26 = vld [vmem:[%s1183_s26 + $0xa0] ss:$8 sps:$4 sm:$0xff]  }
  0x14   : > { %501 = vmatprep.subr.bf16.mxu0 %v1135_v1  ;;  %1043 = vmatprep.subr.bf16.mxu1 %v1135_v1  ;;  %v1097_v27 = vld [vmem:[%s1183_s26 + $0x34] ss:$8 sps:$4 sm:$0xff]   ;;  %v1101_v29 = vld [vmem:[%s1183_s26 + $0x30] ss:$8 sps:$4 sm:$0xff]   ;;  %v1103_v31 = vld [vmem:[%s1183_s26 + $0x44] ss:$8 sps:$4 sm:$0xff]  }
  0x15   : > { %v1099_v28 = vld [vmem:[%s1183_s26 + $0xb4] ss:$8 sps:$4 sm:$0xff]   ;;  %v1102_v30 = vld [vmem:[%s1183_s26 + $0xb0] ss:$8 sps:$4 sm:$0xff]   ;;  %v1105_v32 = vld [vmem:[%s1183_s26 + $0xc4] ss:$8 sps:$4 sm:$0xff]  }
  0x16   : > { %v1107_v33 = vld [vmem:[%s1183_s26 + $0x40] ss:$8 sps:$4 sm:$0xff]   ;;  %v1109_v35 = vld [vmem:[%s1183_s26 + $0x54] ss:$8 sps:$4 sm:$0xff]   ;;  %v1113_v37 = vld [vmem:[%s1183_s26 + $0x50] ss:$8 sps:$4 sm:$0xff]  }
  0x17   : > { %502 = vmatpush1.bf16.msra.mxu0 %v1073_v5  ;;  %1053 = vmatpush1.bf16.msra.mxu1 %v1073_v5  ;;  %v1108_v34 = vld [vmem:[%s1183_s26 + $0xc0] ss:$8 sps:$4 sm:$0xff]   ;;  %v1111_v36 = vld [vmem:[%s1183_s26 + $0xd4] ss:$8 sps:$4 sm:$0xff]   ;;  %v1114_v38 = vld [vmem:[%s1183_s26 + $0xd0] ss:$8 sps:$4 sm:$0xff]  }
  0x18   : > { %503 = vmatprep.subr.bf16.mxu0 %v1135_v1  ;;  %1044 = vmatprep.subr.bf16.mxu1 %v1135_v1  ;;  %v1115_v39 = vld [vmem:[%s1183_s26 + $0x64] ss:$8 sps:$4 sm:$0xff]   ;;  %v1119_v41 = vld [vmem:[%s1183_s26 + $0x60] ss:$8 sps:$4 sm:$0xff]   ;;  %v1121_v43 = vld [vmem:[%s1183_s26 + $0x74] ss:$8 sps:$4 sm:$0xff]  }
  0x19   : > { %v1117_v40 = vld [vmem:[%s1183_s26 + $0xe4] ss:$8 sps:$4 sm:$0xff]   ;;  %v1120_v42 = vld [vmem:[%s1183_s26 + $0xe0] ss:$8 sps:$4 sm:$0xff]   ;;  %v1123_v44 = vld [vmem:[%s1183_s26 + $0xf4] ss:$8 sps:$4 sm:$0xff]  }
  0x1a   : > { %v1125_v45 = vld [vmem:[%s1183_s26 + $0x70] ss:$8 sps:$4 sm:$0xff]  }
  0x1b   : > { %504 = vmatpush1.bf16.msra.mxu0 %v1074_v8  ;;  %1054 = vmatpush1.bf16.msra.mxu1 %v1074_v8  ;;  %v1126_v46 = vld [vmem:[%s1183_s26 + $0xf0] ss:$8 sps:$4 sm:$0xff]  }
  0x1c   : > { %505 = vmatprep.subr.bf16.mxu0 %v1135_v1  ;;  %1045 = vmatprep.subr.bf16.mxu1 %v1135_v1 }
  0x1f   : > { %506 = vmatpush1.bf16.msra.mxu0 %v1075_v9  ;;  %1055 = vmatpush1.bf16.msra.mxu1 %v1075_v9 }
  0x20   : > { %507 = vmatprep.subr.bf16.mxu0 %v1135_v1  ;;  %1046 = vmatprep.subr.bf16.mxu1 %v1135_v1 }
  0x23   : > { %508 = vmatpush1.bf16.msra.mxu0 %v1076_v10  ;;  %1056 = vmatpush1.bf16.msra.mxu1 %v1076_v10 }
  0x24   : > { %509 = vmatprep.subr.bf16.mxu0 %v1135_v1  ;;  %1047 = vmatprep.subr.bf16.mxu1 %v1135_v1 }
  0x27   : > { %510 = vmatpush1.bf16.msra.mxu0 %v1077_v13  ;;  %1057 = vmatpush1.bf16.msra.mxu1 %v1077_v13 }
  0x28   : > { %511 = vmatprep.subr.bf16.mxu0 %v1135_v1  ;;  %1048 = vmatprep.subr.bf16.mxu1 %v1135_v1 }
  0x2b   : > { %512 = vmatpush1.bf16.msra.mxu0 %v491_v16  ;;  %1058 = vmatpush1.bf16.msra.mxu1 %v491_v16 }
  0x2e   : > { %526 = vmatmul.mubr.bf16.vlgmr.msra.gmra.mrb[0].mxu0 %v1079_v17  ;;  %590 = vmatmul.mubr.bf16.vlgmr.msra.gmra.mrb[0].mxu1 %v1082_v18 }
  0x2f   : > { %957 = vmatprep.mubr.msk.bf16.mxu0 %vm437_vm0, %v1085_v19  ;;  %965 = vmatprep.mubr.msk.bf16.mxu1 %vm437_vm0, %v1087_v20 }
  0x36   : > { %534 = vmatmul.mubr.bf16.gmra.mrb[4].mxu0 %v1089_v21  ;;  %598 = vmatmul.mubr.bf16.gmra.mrb[4].mxu1 %v1090_v22 }
  0x37   : > { %958 = vmatprep.mubr.msk.bf16.mxu0 %vm437_vm0, %v1091_v23  ;;  %966 = vmatprep.mubr.msk.bf16.mxu1 %vm437_vm0, %v1093_v24 }
  0x3e   : > { %542 = vmatmul.mubr.bf16.gmra.mrb[8].mxu0 %v1095_v25  ;;  %606 = vmatmul.mubr.bf16.gmra.mrb[8].mxu1 %v1096_v26 }
  0x3f   : > { %959 = vmatprep.mubr.msk.bf16.mxu0 %vm437_vm0, %v1097_v27  ;;  %967 = vmatprep.mubr.msk.bf16.mxu1 %vm437_vm0, %v1099_v28 }
  0x46   : > { %550 = vmatmul.mubr.bf16.gmra.mrb[12].mxu0 %v1101_v29  ;;  %614 = vmatmul.mubr.bf16.gmra.mrb[12].mxu1 %v1102_v30 }
  0x47   : > { %960 = vmatprep.mubr.msk.bf16.mxu0 %vm437_vm0, %v1103_v31  ;;  %968 = vmatprep.mubr.msk.bf16.mxu1 %vm437_vm0, %v1105_v32 }
  0x4e   : > { %558 = vmatmul.mubr.bf16.gmra.mrb[16].mxu0 %v1107_v33  ;;  %622 = vmatmul.mubr.bf16.gmra.mrb[16].mxu1 %v1108_v34 }
  0x4f   : > { %961 = vmatprep.mubr.msk.bf16.mxu0 %vm437_vm0, %v1109_v35  ;;  %969 = vmatprep.mubr.msk.bf16.mxu1 %vm437_vm0, %v1111_v36 }
  0x56   : > { %566 = vmatmul.mubr.bf16.gmra.mrb[20].mxu0 %v1113_v37  ;;  %630 = vmatmul.mubr.bf16.gmra.mrb[20].mxu1 %v1114_v38 }
  0x57   : > { %962 = vmatprep.mubr.msk.bf16.mxu0 %vm437_vm0, %v1115_v39  ;;  %970 = vmatprep.mubr.msk.bf16.mxu1 %vm437_vm0, %v1117_v40 }
  0x5e   : > { %574 = vmatmul.mubr.bf16.gmra.mrb[24].mxu0 %v1119_v41  ;;  %638 = vmatmul.mubr.bf16.gmra.mrb[24].mxu1 %v1120_v42 }
  0x5f   : > { %963 = vmatprep.mubr.msk.bf16.mxu0 %vm437_vm0, %v1121_v43  ;;  %971 = vmatprep.mubr.msk.bf16.mxu1 %vm437_vm0, %v1123_v44 }
  0x66   : > { %582 = vmatmul.mubr.bf16.gmra.mrb[28].mxu0 %v1125_v45  ;;  %646 = vmatmul.mubr.bf16.gmra.mrb[28].mxu1 %v1126_v46 }
 0x101   : > { %v527_v48 = vpop.f32.mrb[0].mxu0  ;;  %v591_v49 = vpop.f32.mrb[0].mxu1 }
 0x102   : > { %v528_v50 = vadd.f32 %v1254_v47, %v527_v48  ;;  %v592_v51 = vadd.f32 %v1254_v47, %v591_v49  ;;  %v529_v52 = vpop.f32.mrb[1].mxu0  ;;  %v593_v53 = vpop.f32.mrb[1].mxu1 }
 0x103   : > { %v530_v54 = vpop.f32.mrb[2].mxu0  ;;  %v594_v55 = vpop.f32.mrb[2].mxu1 }
 0x104   : > { %v654_v56 = vmax.f32 %v528_v50, 0.0  ;;  %v670_v57 = vmax.f32 %v592_v51, 0.0  ;;  %v531_v58 = vadd.f32 %v1254_v47, %v530_v54  ;;  %v595_v59 = vadd.f32 %v1254_v47, %v594_v55  ;;  %v532_v60 = vpop.f32.mrb[3].mxu0  ;;  %v596_v61 = vpop.f32.mrb[3].mxu1 }
 0x106   : > { %v1007_v62 = vpack.c.bf16 %v654_v56, %v654_v56  ;;  %v1023_v63 = vpack.c.bf16 %v670_v57, %v670_v57  ;;  %v655_v0 = vmax.f32 %v531_v58, 0.0  ;;  %v671_v1 = vmax.f32 %v595_v59, 0.0 }
 0x108   : > { %815 = vst.msk [vmem:[%s1264_s18] sm:$0xf] %vm814_vm3, %v1007_v62  ;;  %831 = vst.msk [vmem:[%s1264_s18 + $0x40] sm:$0xf] %vm814_vm3, %v1023_v63  ;;  %v1008_v2 = vpack.c.bf16 %v655_v0, %v655_v0  ;;  %v1024_v3 = vpack.c.bf16 %v671_v1, %v671_v1 }
 0x109   : > { %v535_v4 = vpop.f32.mrb[4].mxu0  ;;  %v599_v5 = vpop.f32.mrb[4].mxu1 }
 0x10a   : > { %816 = vst.msk [vmem:[%s1264_s18 + $0x4] sm:$0xf] %vm814_vm3, %v1008_v2  ;;  %832 = vst.msk [vmem:[%s1264_s18 + $0x44] sm:$0xf] %vm814_vm3, %v1024_v3  ;;  %v536_v6 = vadd.f32 %v1254_v47, %v535_v4  ;;  %v600_v7 = vadd.f32 %v1254_v47, %v599_v5  ;;  %v537_v8 = vpop.f32.mrb[5].mxu0  ;;  %v601_v9 = vpop.f32.mrb[5].mxu1 }
 0x10b   : > { %v538_v10 = vpop.f32.mrb[6].mxu0  ;;  %v602_v11 = vpop.f32.mrb[6].mxu1 }
 0x10c   : > { %v656_v12 = vmax.f32 %v536_v6, 0.0  ;;  %v672_v13 = vmax.f32 %v600_v7, 0.0  ;;  %v539_v14 = vadd.f32 %v1254_v47, %v538_v10  ;;  %v603_v15 = vadd.f32 %v1254_v47, %v602_v11  ;;  %v540_v16 = vpop.f32.mrb[7].mxu0  ;;  %v604_v17 = vpop.f32.mrb[7].mxu1 }
 0x10e   : > { %v1009_v18 = vpack.c.bf16 %v656_v12, %v656_v12  ;;  %v1025_v19 = vpack.c.bf16 %v672_v13, %v672_v13  ;;  %v657_v20 = vmax.f32 %v539_v14, 0.0  ;;  %v673_v21 = vmax.f32 %v603_v15, 0.0 }
 0x110   : > { %817 = vst.msk [vmem:[%s1264_s18 + $0x8] sm:$0xf] %vm814_vm3, %v1009_v18  ;;  %833 = vst.msk [vmem:[%s1264_s18 + $0x48] sm:$0xf] %vm814_vm3, %v1025_v19  ;;  %v1010_v22 = vpack.c.bf16 %v657_v20, %v657_v20  ;;  %v1026_v23 = vpack.c.bf16 %v673_v21, %v673_v21 }
 0x111   : > { %v543_v24 = vpop.f32.mrb[8].mxu0  ;;  %v607_v25 = vpop.f32.mrb[8].mxu1 }
 0x112   : > { %818 = vst.msk [vmem:[%s1264_s18 + $0xc] sm:$0xf] %vm814_vm3, %v1010_v22  ;;  %834 = vst.msk [vmem:[%s1264_s18 + $0x4c] sm:$0xf] %vm814_vm3, %v1026_v23  ;;  %v544_v26 = vadd.f32 %v1254_v47, %v543_v24  ;;  %v608_v27 = vadd.f32 %v1254_v47, %v607_v25  ;;  %v545_v28 = vpop.f32.mrb[9].mxu0  ;;  %v609_v29 = vpop.f32.mrb[9].mxu1 }
 0x113   : > { %v546_v30 = vpop.f32.mrb[10].mxu0  ;;  %v610_v31 = vpop.f32.mrb[10].mxu1 }
 0x114   : > { %v658_v32 = vmax.f32 %v544_v26, 0.0  ;;  %v674_v33 = vmax.f32 %v608_v27, 0.0  ;;  %v547_v34 = vadd.f32 %v1254_v47, %v546_v30  ;;  %v611_v35 = vadd.f32 %v1254_v47, %v610_v31  ;;  %v548_v36 = vpop.f32.mrb[11].mxu0  ;;  %v612_v37 = vpop.f32.mrb[11].mxu1 }
 0x116   : > { %v1011_v38 = vpack.c.bf16 %v658_v32, %v658_v32  ;;  %v1027_v39 = vpack.c.bf16 %v674_v33, %v674_v33  ;;  %v659_v40 = vmax.f32 %v547_v34, 0.0  ;;  %v675_v41 = vmax.f32 %v611_v35, 0.0 }
 0x118   : > { %819 = vst.msk [vmem:[%s1264_s18 + $0x10] sm:$0xf] %vm814_vm3, %v1011_v38  ;;  %835 = vst.msk [vmem:[%s1264_s18 + $0x50] sm:$0xf] %vm814_vm3, %v1027_v39  ;;  %v1012_v42 = vpack.c.bf16 %v659_v40, %v659_v40  ;;  %v1028_v43 = vpack.c.bf16 %v675_v41, %v675_v41 }
 0x119   : > { %v551_v44 = vpop.f32.mrb[12].mxu0  ;;  %v615_v45 = vpop.f32.mrb[12].mxu1 }
 0x11a   : > { %820 = vst.msk [vmem:[%s1264_s18 + $0x14] sm:$0xf] %vm814_vm3, %v1012_v42  ;;  %836 = vst.msk [vmem:[%s1264_s18 + $0x54] sm:$0xf] %vm814_vm3, %v1028_v43  ;;  %v552_v46 = vadd.f32 %v1254_v47, %v551_v44  ;;  %v616_v48 = vadd.f32 %v1254_v47, %v615_v45  ;;  %v553_v49 = vpop.f32.mrb[13].mxu0  ;;  %v617_v50 = vpop.f32.mrb[13].mxu1 }
 0x11b   : > { %v554_v51 = vpop.f32.mrb[14].mxu0  ;;  %v618_v52 = vpop.f32.mrb[14].mxu1 }
 0x11c   : > { %v660_v53 = vmax.f32 %v552_v46, 0.0  ;;  %v676_v54 = vmax.f32 %v616_v48, 0.0  ;;  %v555_v55 = vadd.f32 %v1254_v47, %v554_v51  ;;  %v619_v56 = vadd.f32 %v1254_v47, %v618_v52  ;;  %v556_v57 = vpop.f32.mrb[15].mxu0  ;;  %v620_v58 = vpop.f32.mrb[15].mxu1 }
 0x11e   : > { %v1013_v59 = vpack.c.bf16 %v660_v53, %v660_v53  ;;  %v1029_v60 = vpack.c.bf16 %v676_v54, %v676_v54  ;;  %v661_v61 = vmax.f32 %v555_v55, 0.0  ;;  %v677_v62 = vmax.f32 %v619_v56, 0.0 }
 0x120   : > { %821 = vst.msk [vmem:[%s1264_s18 + $0x18] sm:$0xf] %vm814_vm3, %v1013_v59  ;;  %837 = vst.msk [vmem:[%s1264_s18 + $0x58] sm:$0xf] %vm814_vm3, %v1029_v60  ;;  %v1014_v63 = vpack.c.bf16 %v661_v61, %v661_v61  ;;  %v1030_v0 = vpack.c.bf16 %v677_v62, %v677_v62 }
 0x121   : > { %v559_v1 = vpop.f32.mrb[16].mxu0  ;;  %v623_v2 = vpop.f32.mrb[16].mxu1 }
 0x122   : > { %822 = vst.msk [vmem:[%s1264_s18 + $0x1c] sm:$0xf] %vm814_vm3, %v1014_v63  ;;  %838 = vst.msk [vmem:[%s1264_s18 + $0x5c] sm:$0xf] %vm814_vm3, %v1030_v0  ;;  %v560_v3 = vadd.f32 %v1254_v47, %v559_v1  ;;  %v624_v4 = vadd.f32 %v1254_v47, %v623_v2  ;;  %v561_v5 = vpop.f32.mrb[17].mxu0  ;;  %v625_v6 = vpop.f32.mrb[17].mxu1 }
 0x123   : > { %v562_v7 = vpop.f32.mrb[18].mxu0  ;;  %v626_v8 = vpop.f32.mrb[18].mxu1 }
 0x124   : > { %v662_v9 = vmax.f32 %v560_v3, 0.0  ;;  %v678_v10 = vmax.f32 %v624_v4, 0.0  ;;  %v563_v11 = vadd.f32 %v1254_v47, %v562_v7  ;;  %v627_v12 = vadd.f32 %v1254_v47, %v626_v8  ;;  %v564_v13 = vpop.f32.mrb[19].mxu0  ;;  %v628_v14 = vpop.f32.mrb[19].mxu1 }
 0x126   : > { %v1015_v15 = vpack.c.bf16 %v662_v9, %v662_v9  ;;  %v1031_v16 = vpack.c.bf16 %v678_v10, %v678_v10  ;;  %v663_v17 = vmax.f32 %v563_v11, 0.0  ;;  %v679_v18 = vmax.f32 %v627_v12, 0.0 }
 0x128   : > { %823 = vst.msk [vmem:[%s1264_s18 + $0x20] sm:$0xf] %vm814_vm3, %v1015_v15  ;;  %839 = vst.msk [vmem:[%s1264_s18 + $0x60] sm:$0xf] %vm814_vm3, %v1031_v16  ;;  %v1016_v19 = vpack.c.bf16 %v663_v17, %v663_v17  ;;  %v1032_v20 = vpack.c.bf16 %v679_v18, %v679_v18 }
 0x129   : > { %v567_v21 = vpop.f32.mrb[20].mxu0  ;;  %v631_v22 = vpop.f32.mrb[20].mxu1 }
 0x12a   : > { %824 = vst.msk [vmem:[%s1264_s18 + $0x24] sm:$0xf] %vm814_vm3, %v1016_v19  ;;  %840 = vst.msk [vmem:[%s1264_s18 + $0x64] sm:$0xf] %vm814_vm3, %v1032_v20  ;;  %v568_v23 = vadd.f32 %v1254_v47, %v567_v21  ;;  %v632_v24 = vadd.f32 %v1254_v47, %v631_v22  ;;  %v569_v25 = vpop.f32.mrb[21].mxu0  ;;  %v633_v26 = vpop.f32.mrb[21].mxu1 }
 0x12b   : > { %v570_v27 = vpop.f32.mrb[22].mxu0  ;;  %v634_v28 = vpop.f32.mrb[22].mxu1 }
 0x12c   : > { %v664_v29 = vmax.f32 %v568_v23, 0.0  ;;  %v680_v30 = vmax.f32 %v632_v24, 0.0  ;;  %v571_v31 = vadd.f32 %v1254_v47, %v570_v27  ;;  %v635_v32 = vadd.f32 %v1254_v47, %v634_v28  ;;  %v572_v33 = vpop.f32.mrb[23].mxu0  ;;  %v636_v34 = vpop.f32.mrb[23].mxu1 }
 0x12e   : > { %v1017_v35 = vpack.c.bf16 %v664_v29, %v664_v29  ;;  %v1033_v36 = vpack.c.bf16 %v680_v30, %v680_v30  ;;  %v665_v37 = vmax.f32 %v571_v31, 0.0  ;;  %v681_v38 = vmax.f32 %v635_v32, 0.0 }
 0x130   : > { %825 = vst.msk [vmem:[%s1264_s18 + $0x28] sm:$0xf] %vm814_vm3, %v1017_v35  ;;  %841 = vst.msk [vmem:[%s1264_s18 + $0x68] sm:$0xf] %vm814_vm3, %v1033_v36  ;;  %v1018_v39 = vpack.c.bf16 %v665_v37, %v665_v37  ;;  %v1034_v40 = vpack.c.bf16 %v681_v38, %v681_v38 }
 0x131   : > { %v575_v41 = vpop.f32.mrb[24].mxu0  ;;  %v639_v42 = vpop.f32.mrb[24].mxu1 }
 0x132   : > { %826 = vst.msk [vmem:[%s1264_s18 + $0x2c] sm:$0xf] %vm814_vm3, %v1018_v39  ;;  %842 = vst.msk [vmem:[%s1264_s18 + $0x6c] sm:$0xf] %vm814_vm3, %v1034_v40  ;;  %v576_v43 = vadd.f32 %v1254_v47, %v575_v41  ;;  %v640_v44 = vadd.f32 %v1254_v47, %v639_v42  ;;  %v577_v45 = vpop.f32.mrb[25].mxu0  ;;  %v641_v46 = vpop.f32.mrb[25].mxu1 }
 0x133   : > { %v578_v48 = vpop.f32.mrb[26].mxu0  ;;  %v642_v49 = vpop.f32.mrb[26].mxu1 }
 0x134   : > { %v666_v50 = vmax.f32 %v576_v43, 0.0  ;;  %v682_v51 = vmax.f32 %v640_v44, 0.0  ;;  %v579_v52 = vadd.f32 %v1254_v47, %v578_v48  ;;  %v643_v53 = vadd.f32 %v1254_v47, %v642_v49  ;;  %v580_v54 = vpop.f32.mrb[27].mxu0  ;;  %v644_v55 = vpop.f32.mrb[27].mxu1 }
 0x136   : > { %v1019_v56 = vpack.c.bf16 %v666_v50, %v666_v50  ;;  %v1035_v57 = vpack.c.bf16 %v682_v51, %v682_v51  ;;  %v667_v58 = vmax.f32 %v579_v52, 0.0  ;;  %v683_v59 = vmax.f32 %v643_v53, 0.0 }
 0x138   : > { %827 = vst.msk [vmem:[%s1264_s18 + $0x30] sm:$0xf] %vm814_vm3, %v1019_v56  ;;  %843 = vst.msk [vmem:[%s1264_s18 + $0x70] sm:$0xf] %vm814_vm3, %v1035_v57  ;;  %v1020_v60 = vpack.c.bf16 %v667_v58, %v667_v58  ;;  %v1036_v61 = vpack.c.bf16 %v683_v59, %v683_v59 }
 0x139   : > { %v583_v62 = vpop.f32.mrb[28].mxu0  ;;  %v647_v63 = vpop.f32.mrb[28].mxu1 }
 0x13a   : > { %828 = vst.msk [vmem:[%s1264_s18 + $0x34] sm:$0xf] %vm814_vm3, %v1020_v60  ;;  %844 = vst.msk [vmem:[%s1264_s18 + $0x74] sm:$0xf] %vm814_vm3, %v1036_v61  ;;  %v584_v0 = vadd.f32 %v1254_v47, %v583_v62  ;;  %v648_v1 = vadd.f32 %v1254_v47, %v647_v63  ;;  %v585_v2 = vpop.f32.mrb[29].mxu0  ;;  %v649_v3 = vpop.f32.mrb[29].mxu1 }
 0x13b   : > { %v586_v4 = vpop.f32.mrb[30].mxu0  ;;  %v650_v5 = vpop.f32.mrb[30].mxu1 }
 0x13c   : > { %v668_v6 = vmax.f32 %v584_v0, 0.0  ;;  %v684_v7 = vmax.f32 %v648_v1, 0.0  ;;  %v587_v8 = vadd.f32 %v1254_v47, %v586_v4  ;;  %v651_v9 = vadd.f32 %v1254_v47, %v650_v5  ;;  %v588_v10 = vpop.f32.mrb[31].mxu0  ;;  %v652_v11 = vpop.f32.mrb[31].mxu1 }
 0x13e   : > { %v1021_v12 = vpack.c.bf16 %v668_v6, %v668_v6  ;;  %v1037_v13 = vpack.c.bf16 %v684_v7, %v684_v7  ;;  %v669_v14 = vmax.f32 %v587_v8, 0.0  ;;  %v685_v15 = vmax.f32 %v651_v9, 0.0 }
 0x140   : > { %829 = vst.msk [vmem:[%s1264_s18 + $0x38] sm:$0xf] %vm814_vm3, %v1021_v12  ;;  %845 = vst.msk [vmem:[%s1264_s18 + $0x78] sm:$0xf] %vm814_vm3, %v1037_v13  ;;  %v1022_v16 = vpack.c.bf16 %v669_v14, %v669_v14  ;;  %v1038_v17 = vpack.c.bf16 %v685_v15, %v685_v15 }
 0x142   : > { %830 = vst.msk [vmem:[%s1264_s18 + $0x3c] sm:$0xf] %vm814_vm3, %v1022_v16  ;;  %846 = vst.msk [vmem:[%s1264_s18 + $0x7c] sm:$0xf] %vm814_vm3, %v1038_v17 }
 0x143 PF: > { %s13_s12 = sadd.s32 1, %s1133_s12  }
 0x144   : > { %p10_p4 = scmp.ge.s32.totalorder %s13_s12, 4  }
 0x146   :  { %12 = sbr.rel (!%p10_p4) target bundleno = 1 (0x1), region = 62 }

// kernel: _lambda_.47
= control target key start
LH: loop header
LB: loop body
LE: loop exit
PB: predicated region body
PF: predicated region fallthrough
CT: control target
= control target key end

     0   :  { %vm104_vm0 = vcmask 1043456   ;;  %vm79_vm1 = vcmask 64512   ;;  %vm285_vm2 = vcmask 60416   ;;  %s534_s1 = inlined_call_operand.vmem [shape: bf16[8,8], index: 1, kind: input, shape index: {}]   ;;  %s535_s0 = inlined_call_operand.vmem [shape: bf16[128,8], index: 0, kind: input, shape index: {}]   ;;  %s536_s2 = inlined_call_operand.vmem [shape: f32[1,8], index: 2, kind: input, shape index: {}]   ;;  %s537_s3 = inlined_call_operand.vmem [shape: bf16[128,8], index: 3, kind: output, shape index: {}]  }
   0x1   :  { %v31_v0 = vld [vmem:[%s534_s1] sm:$0xf]  ;;  %v388_v4 = vld [vmem:[%s535_s0 + $0x8] sm:$0xff]   ;;  %v390_v6 = vld [vmem:[%s535_s0 + $0x10] sm:$0xff]  }
   0x2   :  { %384 = vmatprep.subr.msk.bf16.mxu0 %vm104_vm0, %v31_v0  ;;  %385 = vmatprep.subr.msk.bf16.mxu1 %vm104_vm0, %v31_v0  ;;  %v106_v1 = vsel %vm104_vm0, %v31_v0, 0  ;;  %v386_v2 = vld [vmem:[%s535_s0] sm:$0xff]   ;;  %v389_v5 = vld [vmem:[%s535_s0 + $0x28] sm:$0xff]   ;;  %v391_v7 = vld [vmem:[%s535_s0 + $0x30] sm:$0xff]  }
   0x3   :  { %365 = vmatpush3.bf16.msra.mxu0 %v106_v1  ;;  %383 = vmatpush3.bf16.msra.mxu1 %v106_v1  ;;  %v387_v3 = vld [vmem:[%s535_s0 + $0x20] sm:$0xff]   ;;  %v392_v8 = vld [vmem:[%s535_s0 + $0x18] sm:$0xff]  }
   0x4   :  { %366 = vmatprep.mubr.msk.bf16.mxu0 %vm79_vm1, %v386_v2  ;;  %374 = vmatprep.mubr.msk.bf16.mxu1 %vm79_vm1, %v387_v3  ;;  %v393_v9 = vld [vmem:[%s535_s0 + $0x38] sm:$0xff]   ;;  %v452_v10 = vld [vmem:[%s536_s2] ss:$0 sm:$0xff] }
   0x6   :  { %367 = vmatmul.mubr.msk.bf16.vlgmr.msra.gmra.mrb[0].mxu0 %vm79_vm1, %v388_v4  ;;  %375 = vmatmul.mubr.msk.bf16.vlgmr.msra.gmra.mrb[0].mxu1 %vm79_vm1, %v389_v5 }
   0x7   :  { %370 = vmatprep.mubr.msk.bf16.mxu0 %vm79_vm1, %v390_v6  ;;  %378 = vmatprep.mubr.msk.bf16.mxu1 %vm79_vm1, %v391_v7 }
   0xe   :  { %371 = vmatmul.mubr.msk.bf16.gmra.mrb[4].mxu0 %vm79_vm1, %v392_v8  ;;  %379 = vmatmul.mubr.msk.bf16.gmra.mrb[4].mxu1 %vm79_vm1, %v393_v9 }
  0xd9   :  { %v368_v11 = vpop.f32.mrb[0].mxu0  ;;  %v376_v13 = vpop.f32.mrb[0].mxu1 }
  0xda   :  { %v151_v12 = vadd.f32 %v368_v11, %v452_v10  ;;  %v142_v14 = vpop.f32.mrb[1].mxu0  ;;  %v183_v15 = vadd.f32 %v376_v13, %v452_v10  ;;  %v174_v17 = vpop.f32.mrb[1].mxu1 }
  0xdb   :  { %v143_v16 = vadd.f32 %v452_v10, %v142_v14  ;;  %v369_v18 = vpop.f32.mrb[2].mxu0  ;;  %v175_v20 = vadd.f32 %v452_v10, %v174_v17  ;;  %v377_v22 = vpop.f32.mrb[2].mxu1 }
  0xdc   :  { %v207_v19 = vmax.f32 %v151_v12, 0.0  ;;  %v154_v21 = vadd.f32 %v369_v18, %v452_v10  ;;  %v145_v23 = vpop.f32.mrb[3].mxu0  ;;  %v215_v24 = vmax.f32 %v183_v15, 0.0  ;;  %v186_v26 = vadd.f32 %v377_v22, %v452_v10  ;;  %v177_v28 = vpop.f32.mrb[3].mxu1 }
  0xdd   :  { %v205_v25 = vmax.f32 %v143_v16, 0.0  ;;  %v146_v27 = vadd.f32 %v452_v10, %v145_v23  ;;  %v213_v30 = vmax.f32 %v175_v20, 0.0  ;;  %v178_v32 = vadd.f32 %v452_v10, %v177_v28 }
  0xde   :  { %v341_v29 = vpack.c.bf16 %v207_v19, %v207_v19  ;;  %v208_v31 = vmax.f32 %v154_v21, 0.0  ;;  %v349_v33 = vpack.c.bf16 %v215_v24, %v215_v24  ;;  %v216_v35 = vmax.f32 %v186_v26, 0.0 }
  0xdf   :  { %v339_v34 = vpack.c.bf16 %v205_v25, %v205_v25  ;;  %v206_v36 = vmax.f32 %v146_v27, 0.0  ;;  %v347_v37 = vpack.c.bf16 %v213_v30, %v213_v30  ;;  %v214_v39 = vmax.f32 %v178_v32, 0.0 }
  0xe0   :  { %288 = vst.msk [vmem:[%s537_s3 + $0x8] sm:$0xf] %vm285_vm2, %v341_v29  ;;  %v342_v38 = vpack.c.bf16 %v208_v31, %v208_v31  ;;  %296 = vst.msk [vmem:[%s537_s3 + $0x28] sm:$0xf] %vm285_vm2, %v349_v33  ;;  %v350_v40 = vpack.c.bf16 %v216_v35, %v216_v35 }
  0xe1   :  { %286 = vst.msk [vmem:[%s537_s3] sm:$0xf] %vm285_vm2, %v339_v34  ;;  %v340_v41 = vpack.c.bf16 %v206_v36, %v206_v36  ;;  %v372_v42 = vpop.f32.mrb[4].mxu0  ;;  %294 = vst.msk [vmem:[%s537_s3 + $0x20] sm:$0xf] %vm285_vm2, %v347_v37  ;;  %v348_v43 = vpack.c.bf16 %v214_v39, %v214_v39  ;;  %v380_v45 = vpop.f32.mrb[4].mxu1 }
  0xe2   :  { %289 = vst.msk [vmem:[%s537_s3 + $0xc] sm:$0xf] %vm285_vm2, %v342_v38  ;;  %v167_v44 = vadd.f32 %v372_v42, %v452_v10  ;;  %v158_v46 = vpop.f32.mrb[5].mxu0  ;;  %297 = vst.msk [vmem:[%s537_s3 + $0x2c] sm:$0xf] %vm285_vm2, %v350_v40  ;;  %v199_v47 = vadd.f32 %v380_v45, %v452_v10  ;;  %v190_v49 = vpop.f32.mrb[5].mxu1 }
  0xe3   :  { %287 = vst.msk [vmem:[%s537_s3 + $0x4] sm:$0xf] %vm285_vm2, %v340_v41  ;;  %v159_v48 = vadd.f32 %v452_v10, %v158_v46  ;;  %v373_v50 = vpop.f32.mrb[6].mxu0  ;;  %295 = vst.msk [vmem:[%s537_s3 + $0x24] sm:$0xf] %vm285_vm2, %v348_v43  ;;  %v191_v52 = vadd.f32 %v452_v10, %v190_v49  ;;  %v381_v54 = vpop.f32.mrb[6].mxu1 }
  0xe4   :  { %v211_v51 = vmax.f32 %v167_v44, 0.0  ;;  %v170_v53 = vadd.f32 %v373_v50, %v452_v10  ;;  %v161_v55 = vpop.f32.mrb[7].mxu0  ;;  %v219_v56 = vmax.f32 %v199_v47, 0.0  ;;  %v202_v58 = vadd.f32 %v381_v54, %v452_v10  ;;  %v193_v60 = vpop.f32.mrb[7].mxu1 }
  0xe5   :  { %v209_v57 = vmax.f32 %v159_v48, 0.0  ;;  %v162_v59 = vadd.f32 %v452_v10, %v161_v55  ;;  %v217_v62 = vmax.f32 %v191_v52, 0.0  ;;  %v194_v0 = vadd.f32 %v452_v10, %v193_v60 }
  0xe6   :  { %v345_v61 = vpack.c.bf16 %v211_v51, %v211_v51  ;;  %v212_v63 = vmax.f32 %v170_v53, 0.0  ;;  %v353_v1 = vpack.c.bf16 %v219_v56, %v219_v56  ;;  %v220_v3 = vmax.f32 %v202_v58, 0.0 }
  0xe7   :  { %v343_v2 = vpack.c.bf16 %v209_v57, %v209_v57  ;;  %v210_v4 = vmax.f32 %v162_v59, 0.0  ;;  %v351_v5 = vpack.c.bf16 %v217_v62, %v217_v62  ;;  %v218_v7 = vmax.f32 %v194_v0, 0.0 }
  0xe8   :  { %292 = vst.msk [vmem:[%s537_s3 + $0x18] sm:$0xf] %vm285_vm2, %v345_v61  ;;  %v346_v6 = vpack.c.bf16 %v212_v63, %v212_v63  ;;  %300 = vst.msk [vmem:[%s537_s3 + $0x38] sm:$0xf] %vm285_vm2, %v353_v1  ;;  %v354_v8 = vpack.c.bf16 %v220_v3, %v220_v3 }
  0xe9   :  { %290 = vst.msk [vmem:[%s537_s3 + $0x10] sm:$0xf] %vm285_vm2, %v343_v2  ;;  %v344_v9 = vpack.c.bf16 %v210_v4, %v210_v4  ;;  %298 = vst.msk [vmem:[%s537_s3 + $0x30] sm:$0xf] %vm285_vm2, %v351_v5  ;;  %v352_v10 = vpack.c.bf16 %v218_v7, %v218_v7 }
  0xea   :  { %293 = vst.msk [vmem:[%s537_s3 + $0x1c] sm:$0xf] %vm285_vm2, %v346_v6  ;;  %301 = vst.msk [vmem:[%s537_s3 + $0x3c] sm:$0xf] %vm285_vm2, %v354_v8 }
  0xeb   :  { %291 = vst.msk [vmem:[%s537_s3 + $0x14] sm:$0xf] %vm285_vm2, %v344_v9  ;;  %299 = vst.msk [vmem:[%s537_s3 + $0x34] sm:$0xf] %vm285_vm2, %v352_v10 }

// kernel: squeeze.18
= control target key start
LH: loop header
LB: loop body
LE: loop exit
PB: predicated region body
PF: predicated region fallthrough
CT: control target
= control target key end

     0   :  { %s115_s8 = smov 80   ;;  %vm19_vm0 = vcmask 130048   ;;  %s116_s9 = smov 96   ;;  %s148_s0 = inlined_call_operand.vmem [shape: bf16[512], index: 0, kind: input, shape index: {}]   ;;  %s149_s1 = inlined_call_operand.vmem [shape: bf16[32,16], index: 1, kind: output, shape index: {}]  }
   0x1   :  { %v14_v0 = vld [vmem:[%s148_s0] sm:$0x3]  ;;  %s114_s0 = smov 112   ;;  %s117_s10 = smov 64  }
   0x2   :  { %v15_v1 = vunpack.c.l.bf16 %v14_v0  ;;  %s118_s11 = smov 48   ;;  %s119_s12 = smov 32  }
   0x3   :  { %s120_s13 = smov 16  }
   0x4   :  { %17 = vst [vmem:[#allocation1] sm:$0xf] %v15_v1 }
   0xb   :  { %v21_v2 = vld [vmem:[#allocation1] sm:$0xf]  }
   0xc   :  { %v33_v3 = vld [vmem:[#allocation1] sm:$0xf]   ;;  %22 = vrot.lane.b32.xlu0 %v21_v2, %s114_s0 }
   0xd   :  { %34 = vrot.lane.b32.xlu1 %v33_v3, %s115_s8  ;;  %v27_v4 = vld [vmem:[#allocation1] sm:$0xf]  }
   0xe   :  { %v39_v5 = vld [vmem:[#allocation1] sm:$0xf]  }
   0xf   :  { %v18_v6 = vld [vmem:[#allocation1] sm:$0xf]  }
  0x10   :  { %20 = vst.msk [vmem:[#allocation0] ss:$8 sm:$0xf] %vm19_vm0, %v18_v6   ;;  %28 = vrot.lane.b32.xlu0 %v27_v4, %s116_s9  ;;  %v45_v7 = vld [vmem:[#allocation1] sm:$0xf]  }
  0x11   :  { %40 = vrot.lane.b32.xlu1 %v39_v5, %s117_s10  ;;  %v51_v8 = vld [vmem:[#allocation1] sm:$0xf]  }
  0x12   :  { %v57_v9 = vld [vmem:[#allocation1] sm:$0xf]  }
  0x14   :  { %46 = vrot.lane.b32.xlu0 %v45_v7, %s118_s11 }
  0x15   :  { %52 = vrot.lane.b32.xlu1 %v51_v8, %s119_s12 }
  0x18   :  { %58 = vrot.lane.b32.xlu0 %v57_v9, %s120_s13 }
  0x7e   :  { %v23_v10 = vpop.permute.xlu0 %22  }
  0x7f   :  { %v35_v11 = vpop.permute.xlu1 %34   ;;  %26 = vst.msk [vmem:[#allocation0 + $0x1] ss:$8 sm:$0xf] %vm19_vm0, %v23_v10  }
  0x80   :  { %38 = vst.msk [vmem:[#allocation0 + $0x3] ss:$8 sm:$0xf] %vm19_vm0, %v35_v11  }
  0x82   :  { %v29_v12 = vpop.permute.xlu0 %28  }
  0x83   :  { %v41_v13 = vpop.permute.xlu1 %40   ;;  %32 = vst.msk [vmem:[#allocation0 + $0x2] ss:$8 sm:$0xf] %vm19_vm0, %v29_v12  }
  0x84   :  { %44 = vst.msk [vmem:[#allocation0 + $0x4] ss:$8 sm:$0xf] %vm19_vm0, %v41_v13  }
  0x86   :  { %v47_v14 = vpop.permute.xlu0 %46  }
  0x87   :  { %v53_v15 = vpop.permute.xlu1 %52   ;;  %50 = vst.msk [vmem:[#allocation0 + $0x5] ss:$8 sm:$0xf] %vm19_vm0, %v47_v14  }
  0x88   :  { %56 = vst.msk [vmem:[#allocation0 + $0x6] ss:$8 sm:$0xf] %vm19_vm0, %v53_v15  }
  0x8a   :  { %v59_v16 = vpop.permute.xlu0 %58  }
  0x8b   :  { %62 = vst.msk [vmem:[#allocation0 + $0x7] ss:$8 sm:$0xf] %vm19_vm0, %v59_v16  }
  0x92   :  { %v67_v17 = vld [vmem:[#allocation0] sm:$0xff]  ;;  %v72_v18 = vld [vmem:[#allocation0 + $0x8] sm:$0xff]  ;;  %v78_v19 = vld [vmem:[#allocation0 + $0x10] sm:$0xff] }
  0x93   :  { %v99_v20 = vpack.c.bf16 %v72_v18, %v67_v17  ;;  %v85_v21 = vld [vmem:[#allocation0 + $0x18] sm:$0xff] }
  0x94   :  { %v104_v22 = vpack.c.bf16 %v85_v21, %v78_v19 }
  0x95   :  { %100 = vst [vmem:[%s149_s1] sm:$0xff] %v99_v20  }
  0x96   :  { %106 = vst [vmem:[%s149_s1 + $0x8] sm:$0xff] %v104_v22  }

// kernel: _lambda_.48
= control target key start
LH: loop header
LB: loop body
LE: loop exit
PB: predicated region body
PF: predicated region fallthrough
CT: control target
= control target key end

     0   :  { %vm114_vm0 = vcmask 588800   ;;  %vm139_vm1 = vcmask 1043456   ;;  %vm320_vm2 = vcmask 125952   ;;  %s593_s1 = inlined_call_operand.vmem [shape: bf16[72,16], index: 1, kind: input, shape index: {}]   ;;  %s594_s0 = inlined_call_operand.vmem [shape: bf16[128,72], index: 0, kind: input, shape index: {}]   ;;  %s595_s2 = inlined_call_operand.vmem [shape: f32[1,16], index: 2, kind: input, shape index: {}]   ;;  %s596_s3 = inlined_call_operand.vmem [shape: bf16[128,16], index: 3, kind: output, shape index: {}]  }
   0x1   :  { %v446_v0 = vld [vmem:[%s593_s1] sm:$0xff]   ;;  %v447_v1 = vld [vmem:[%s593_s1 + $0x8] sm:$0xff]   ;;  %v448_v2 = vld [vmem:[%s593_s1 + $0x10] sm:$0xff]  }
   0x2   :  { %408 = vmatprep.subr.bf16.mxu0 %v446_v0  ;;  %434 = vmatprep.subr.bf16.mxu1 %v446_v0  ;;  %v451_v3 = vld [vmem:[%s594_s0] sm:$0xff]   ;;  %v449_v5 = vld [vmem:[%s593_s1 + $0x18] sm:$0xff]   ;;  %v453_v8 = vld [vmem:[%s594_s0 + $0x8] sm:$0xff]  }
   0x3   :  { %409 = vmatpush3.bf16.msra.mxu0 %v446_v0  ;;  %439 = vmatpush3.bf16.msra.mxu1 %v446_v0  ;;  %v452_v4 = vld [vmem:[%s594_s0 + $0x20] sm:$0xff]   ;;  %v454_v9 = vld [vmem:[%s594_s0 + $0x28] sm:$0xff]   ;;  %v455_v10 = vld [vmem:[%s594_s0 + $0x10] sm:$0xff]  }
   0x4   :  { %410 = vmatprep.subr.bf16.mxu0 %v447_v1  ;;  %435 = vmatprep.subr.bf16.mxu1 %v447_v1  ;;  %v450_v6 = vld [vmem:[%s593_s1 + $0x20] ss:$0 sps:$4 sm:$0xff]   ;;  %v456_v11 = vld [vmem:[%s594_s0 + $0x30] sm:$0xff]   ;;  %v457_v12 = vld [vmem:[%s594_s0 + $0x18] sm:$0xff]  }
   0x5   :  { %418 = vmatprep.mubr.msk.bf16.mxu0 %vm114_vm0, %v451_v3  ;;  %426 = vmatprep.mubr.msk.bf16.mxu1 %vm114_vm0, %v452_v4  ;;  %v141_v7 = vsel %vm139_vm1, %v450_v6, 0  ;;  %v458_v13 = vld [vmem:[%s594_s0 + $0x38] sm:$0xff]   ;;  %v341_v14 = vld [vmem:[%s595_s2] ss:$0 sm:$0xff] }
   0x7   :  { %411 = vmatpush3.bf16.msra.mxu0 %v447_v1  ;;  %440 = vmatpush3.bf16.msra.mxu1 %v447_v1 }
   0x8   :  { %412 = vmatprep.subr.bf16.mxu0 %v448_v2  ;;  %436 = vmatprep.subr.bf16.mxu1 %v448_v2 }
   0xb   :  { %413 = vmatpush3.bf16.msra.mxu0 %v448_v2  ;;  %441 = vmatpush3.bf16.msra.mxu1 %v448_v2 }
   0xc   :  { %414 = vmatprep.subr.bf16.mxu0 %v449_v5  ;;  %437 = vmatprep.subr.bf16.mxu1 %v449_v5 }
   0xf   :  { %415 = vmatpush3.bf16.msra.mxu0 %v449_v5  ;;  %442 = vmatpush3.bf16.msra.mxu1 %v449_v5 }
  0x10   :  { %444 = vmatprep.subr.msk.bf16.mxu0 %vm139_vm1, %v450_v6  ;;  %445 = vmatprep.subr.msk.bf16.mxu1 %vm139_vm1, %v450_v6 }
  0x13   :  { %417 = vmatpush3.bf16.msra.mxu0 %v141_v7  ;;  %443 = vmatpush3.bf16.msra.mxu1 %v141_v7 }
  0x16   :  { %419 = vmatmul.mubr.msk.bf16.vlgmr.msra.gmra.mrb[0].mxu0 %vm114_vm0, %v453_v8  ;;  %427 = vmatmul.mubr.msk.bf16.vlgmr.msra.gmra.mrb[0].mxu1 %vm114_vm0, %v454_v9 }
  0x17   :  { %422 = vmatprep.mubr.msk.bf16.mxu0 %vm114_vm0, %v455_v10  ;;  %430 = vmatprep.mubr.msk.bf16.mxu1 %vm114_vm0, %v456_v11 }
  0x1e   :  { %423 = vmatmul.mubr.msk.bf16.gmra.mrb[4].mxu0 %vm114_vm0, %v457_v12  ;;  %431 = vmatmul.mubr.msk.bf16.gmra.mrb[4].mxu1 %vm114_vm0, %v458_v13 }
  0xe9   :  { %v420_v15 = vpop.f32.mrb[0].mxu0  ;;  %v428_v16 = vpop.f32.mrb[0].mxu1 }
  0xea   :  { %v186_v17 = vadd.f32 %v420_v15, %v341_v14  ;;  %v218_v18 = vadd.f32 %v428_v16, %v341_v14  ;;  %v177_v19 = vpop.f32.mrb[1].mxu0  ;;  %v209_v20 = vpop.f32.mrb[1].mxu1 }
  0xeb   :  { %v178_v21 = vadd.f32 %v341_v14, %v177_v19  ;;  %v210_v22 = vadd.f32 %v341_v14, %v209_v20  ;;  %v421_v23 = vpop.f32.mrb[2].mxu0  ;;  %v429_v24 = vpop.f32.mrb[2].mxu1 }
  0xec   :  { %v242_v25 = vmax.f32 %v186_v17, 0.0  ;;  %v250_v26 = vmax.f32 %v218_v18, 0.0  ;;  %v189_v27 = vadd.f32 %v421_v23, %v341_v14  ;;  %v221_v28 = vadd.f32 %v429_v24, %v341_v14  ;;  %v180_v29 = vpop.f32.mrb[3].mxu0  ;;  %v212_v30 = vpop.f32.mrb[3].mxu1 }
  0xed   :  { %v240_v31 = vmax.f32 %v178_v21, 0.0  ;;  %v248_v32 = vmax.f32 %v210_v22, 0.0  ;;  %v181_v33 = vadd.f32 %v341_v14, %v180_v29  ;;  %v213_v34 = vadd.f32 %v341_v14, %v212_v30 }
  0xee   :  { %v381_v35 = vpack.c.bf16 %v242_v25, %v242_v25  ;;  %v389_v36 = vpack.c.bf16 %v250_v26, %v250_v26  ;;  %v243_v37 = vmax.f32 %v189_v27, 0.0  ;;  %v251_v38 = vmax.f32 %v221_v28, 0.0 }
  0xef   :  { %v379_v39 = vpack.c.bf16 %v240_v31, %v240_v31  ;;  %v387_v40 = vpack.c.bf16 %v248_v32, %v248_v32  ;;  %v241_v41 = vmax.f32 %v181_v33, 0.0  ;;  %v249_v42 = vmax.f32 %v213_v34, 0.0 }
  0xf0   :  { %323 = vst.msk [vmem:[%s596_s3 + $0x8] sm:$0xf] %vm320_vm2, %v381_v35  ;;  %331 = vst.msk [vmem:[%s596_s3 + $0x28] sm:$0xf] %vm320_vm2, %v389_v36  ;;  %v382_v43 = vpack.c.bf16 %v243_v37, %v243_v37  ;;  %v390_v44 = vpack.c.bf16 %v251_v38, %v251_v38 }
  0xf1   :  { %321 = vst.msk [vmem:[%s596_s3] sm:$0xf] %vm320_vm2, %v379_v39  ;;  %329 = vst.msk [vmem:[%s596_s3 + $0x20] sm:$0xf] %vm320_vm2, %v387_v40  ;;  %v380_v45 = vpack.c.bf16 %v241_v41, %v241_v41  ;;  %v388_v46 = vpack.c.bf16 %v249_v42, %v249_v42  ;;  %v424_v47 = vpop.f32.mrb[4].mxu0  ;;  %v432_v48 = vpop.f32.mrb[4].mxu1 }
  0xf2   :  { %324 = vst.msk [vmem:[%s596_s3 + $0xc] sm:$0xf] %vm320_vm2, %v382_v43  ;;  %332 = vst.msk [vmem:[%s596_s3 + $0x2c] sm:$0xf] %vm320_vm2, %v390_v44  ;;  %v202_v49 = vadd.f32 %v424_v47, %v341_v14  ;;  %v234_v50 = vadd.f32 %v432_v48, %v341_v14  ;;  %v193_v51 = vpop.f32.mrb[5].mxu0  ;;  %v225_v52 = vpop.f32.mrb[5].mxu1 }
  0xf3   :  { %322 = vst.msk [vmem:[%s596_s3 + $0x4] sm:$0xf] %vm320_vm2, %v380_v45  ;;  %330 = vst.msk [vmem:[%s596_s3 + $0x24] sm:$0xf] %vm320_vm2, %v388_v46  ;;  %v194_v53 = vadd.f32 %v341_v14, %v193_v51  ;;  %v226_v54 = vadd.f32 %v341_v14, %v225_v52  ;;  %v425_v55 = vpop.f32.mrb[6].mxu0  ;;  %v433_v56 = vpop.f32.mrb[6].mxu1 }
  0xf4   :  { %v246_v57 = vmax.f32 %v202_v49, 0.0  ;;  %v254_v58 = vmax.f32 %v234_v50, 0.0  ;;  %v205_v59 = vadd.f32 %v425_v55, %v341_v14  ;;  %v237_v60 = vadd.f32 %v433_v56, %v341_v14  ;;  %v196_v61 = vpop.f32.mrb[7].mxu0  ;;  %v228_v62 = vpop.f32.mrb[7].mxu1 }
  0xf5   :  { %v244_v63 = vmax.f32 %v194_v53, 0.0  ;;  %v252_v0 = vmax.f32 %v226_v54, 0.0  ;;  %v197_v1 = vadd.f32 %v341_v14, %v196_v61  ;;  %v229_v2 = vadd.f32 %v341_v14, %v228_v62 }
  0xf6   :  { %v385_v3 = vpack.c.bf16 %v246_v57, %v246_v57  ;;  %v393_v4 = vpack.c.bf16 %v254_v58, %v254_v58  ;;  %v247_v5 = vmax.f32 %v205_v59, 0.0  ;;  %v255_v6 = vmax.f32 %v237_v60, 0.0 }
  0xf7   :  { %v383_v7 = vpack.c.bf16 %v244_v63, %v244_v63  ;;  %v391_v8 = vpack.c.bf16 %v252_v0, %v252_v0  ;;  %v245_v9 = vmax.f32 %v197_v1, 0.0  ;;  %v253_v10 = vmax.f32 %v229_v2, 0.0 }
  0xf8   :  { %327 = vst.msk [vmem:[%s596_s3 + $0x18] sm:$0xf] %vm320_vm2, %v385_v3  ;;  %335 = vst.msk [vmem:[%s596_s3 + $0x38] sm:$0xf] %vm320_vm2, %v393_v4  ;;  %v386_v11 = vpack.c.bf16 %v247_v5, %v247_v5  ;;  %v394_v12 = vpack.c.bf16 %v255_v6, %v255_v6 }
  0xf9   :  { %325 = vst.msk [vmem:[%s596_s3 + $0x10] sm:$0xf] %vm320_vm2, %v383_v7  ;;  %333 = vst.msk [vmem:[%s596_s3 + $0x30] sm:$0xf] %vm320_vm2, %v391_v8  ;;  %v384_v13 = vpack.c.bf16 %v245_v9, %v245_v9  ;;  %v392_v14 = vpack.c.bf16 %v253_v10, %v253_v10 }
  0xfa   :  { %328 = vst.msk [vmem:[%s596_s3 + $0x1c] sm:$0xf] %vm320_vm2, %v386_v11  ;;  %336 = vst.msk [vmem:[%s596_s3 + $0x3c] sm:$0xf] %vm320_vm2, %v394_v12 }
  0xfb   :  { %326 = vst.msk [vmem:[%s596_s3 + $0x14] sm:$0xf] %vm320_vm2, %v384_v13  ;;  %334 = vst.msk [vmem:[%s596_s3 + $0x34] sm:$0xf] %vm320_vm2, %v392_v14 }

// kernel: _lambda_.49
= control target key start
LH: loop header
LB: loop body
LE: loop exit
PB: predicated region body
PF: predicated region fallthrough
CT: control target
= control target key end

     0   :  { %vm33_vm0 = vcmask 1044480   ;;  %vm34_vm1 = vsmask.f32 4352  ;;  %v89_v28 = vlaneseq  ;;  %v142_v32 = vmov 1966171168   ;;  %s183_s0 = inlined_call_operand.vmem [shape: bf16[9,512], index: 0, kind: input, shape index: {}]   ;;  %s184_s1 = inlined_call_operand.vmem [shape: bf16[1,512], index: 1, kind: output, shape index: {}]  }
   0x1   :  { %v136_v0 = vld [vmem:[%s183_s0] ss:$16 sps:$4 sm:$0x1f]   ;;  %vm35_vm2 = vmand %vm33_vm0, %vm34_vm1  ;;  %v138_v1 = vld [vmem:[%s183_s0 + $0x4] ss:$16 sps:$4 sm:$0x1f]   ;;  %v87_v33 = vunpack.c.l.s4 %v142_v32 }
   0x2   :  { %v139_v2 = vld [vmem:[%s183_s0 + $0x8] ss:$16 sps:$4 sm:$0x1f]   ;;  %v141_v3 = vld [vmem:[%s183_s0 + $0xc] ss:$16 sps:$4 sm:$0x1f]  }
   0x3   :  { %v36_v4 = vsel %vm35_vm2, %v136_v0, 4286644096  ;;  %v47_v7 = vsel %vm35_vm2, %v138_v1, 4286644096  ;;  %v58_v8 = vsel %vm35_vm2, %v139_v2, 4286644096  ;;  %v88_v43 = vunpack.c.0.s8 %v87_v33 }
   0x4   :  { %v37_v5 = vunpack.i.l.bf16 %v36_v4  ;;  %v38_v6 = vunpack.i.h.bf16 %v36_v4  ;;  %v48_v9 = vunpack.i.l.bf16 %v47_v7  ;;  %v49_v10 = vunpack.i.h.bf16 %v47_v7  ;;  %v124_v61 = vld [vmem:[%s184_s1] sm:$0xf] }
   0x5   :  { %v59_v11 = vunpack.i.l.bf16 %v58_v8  ;;  %v60_v12 = vunpack.i.h.bf16 %v58_v8  ;;  %v69_v14 = vsel %vm35_vm2, %v141_v3, 4286644096  ;;  %vm109_vm3 = vcmask 1040384  }
   0x6   :  { %v39_v13 = vmax.f32 %v37_v5, %v38_v6  ;;  %v50_v15 = vmax.f32 %v48_v9, %v49_v10  ;;  %v70_v17 = vunpack.i.l.bf16 %v69_v14  ;;  %v71_v18 = vunpack.i.h.bf16 %v69_v14 }
   0x7   :  { %v61_v16 = vmax.f32 %v59_v11, %v60_v12  ;;  %vm110_vm4 = vsmask.f32 256  ;;  %v90_v39 = vshrl.u32 %v89_v28, 7  ;;  %vm112_vm5 = vcmask 1041409  }
   0x8   :  { %v40_v19 = vrot.slane %v39_v13, 4  ;;  %v51_v20 = vrot.slane %v50_v15, 4  ;;  %v72_v22 = vmax.f32 %v70_v17, %v71_v18  ;;  %vm113_vm6 = vsmask.f32 1280  ;;  %vm165_vm7 = vmand %vm109_vm3, %vm110_vm4 }
   0x9   :  { %v62_v21 = vrot.slane %v61_v16, 4  ;;  %vm169_vm8 = vmand %vm112_vm5, %vm113_vm6  ;;  %vm116_vm9 = vcmask 1042434   ;;  %vm117_vm10 = vsmask.f32 2304  ;;  %v91_v54 = vsub.s32 %v88_v43, %v90_v39 }
   0xa   :  { %v41_v23 = vmax.f32 %v39_v13, %v40_v19  ;;  %v52_v24 = vmax.f32 %v50_v15, %v51_v20  ;;  %v73_v26 = vrot.slane %v72_v22, 4  ;;  %vm115_vm11 = vmor %vm169_vm8, %vm165_vm7  ;;  %vm120_vm13 = vcmask 1043459  }
   0xb   :  { %v63_v25 = vmax.f32 %v61_v16, %v62_v21  ;;  %vm118_vm12 = vmand %vm116_vm9, %vm117_vm10  ;;  %vm121_vm14 = vsmask.f32 3328 }
   0xc   :  { %v42_v27 = vrot.slane %v41_v23, 2  ;;  %v53_v29 = vrot.slane %v52_v24, 2  ;;  %v74_v31 = vmax.f32 %v72_v22, %v73_v26  ;;  %vm119_vm15 = vmor %vm118_vm12, %vm115_vm11 }
   0xd   :  { %v64_v30 = vrot.slane %v63_v25, 2  ;;  %vm122_vm0 = vmand %vm120_vm13, %vm121_vm14 }
   0xe   :  { %v43_v34 = vmax.f32 %v41_v23, %v42_v27  ;;  %v54_v35 = vmax.f32 %v52_v24, %v53_v29  ;;  %v75_v37 = vrot.slane %v74_v31, 2  ;;  %vm123_vm1 = vmor %vm122_vm0, %vm119_vm15 }
   0xf   :  { %v65_v36 = vmax.f32 %v63_v25, %v64_v30 }
  0x10   :  { %v44_v38 = vrot.slane %v43_v34, 1  ;;  %v55_v40 = vrot.slane %v54_v35, 1  ;;  %v76_v42 = vmax.f32 %v74_v31, %v75_v37 }
  0x11   :  { %v66_v41 = vrot.slane %v65_v36, 1 }
  0x12   :  { %v45_v44 = vmax.f32 %v43_v34, %v44_v38  ;;  %v56_v46 = vmax.f32 %v54_v35, %v55_v40  ;;  %v77_v48 = vrot.slane %v76_v42, 1 }
  0x13   :  { %v67_v47 = vmax.f32 %v65_v36, %v66_v41 }
  0x14   :  { %v46_v50 = vpack.i.bf16 %v45_v44, %v45_v44  ;;  %v57_v51 = vpack.i.bf16 %v56_v46, %v56_v46  ;;  %v78_v53 = vmax.f32 %v76_v42, %v77_v48 }
  0x15   :  { %v68_v52 = vpack.i.bf16 %v67_v47, %v67_v47 }
  0x16   :  { %v79_v55 = vpack.i.bf16 %v78_v53, %v78_v53  ;;  %v84_v56 = vcombine.low %v46_v50, %v57_v51 }
  0x18   :  { %v85_v57 = vcombine.low %v68_v52, %v79_v55  ;;  %v92_v58 = vrot.slane %v84_v56, %v91_v54 }
  0x1a   :  { %v99_v59 = vrot.slane %v85_v57, %v91_v54 }
  0x1c   :  { %v100_v60 = vcombine.low %v92_v58, %v99_v59 }
  0x1e   :  { %v107_v62 = vrot.slane %v100_v60, %v91_v54 }
  0x20   :  { %v125_v63 = vsel %vm123_vm1, %v107_v62, %v124_v61 }
  0x21   :  { %126 = vst [vmem:[%s184_s1] sm:$0xf] %v125_v63 }

// kernel: squeeze.17
= control target key start
LH: loop header
LB: loop body
LE: loop exit
PB: predicated region body
PF: predicated region fallthrough
CT: control target
= control target key end

     0   :  { %s156_s8 = smov 80   ;;  %vm19_vm0 = vcmask 130048   ;;  %s157_s9 = smov 96   ;;  %v162_v20 = vmov 0.0   ;;  %s216_s0 = inlined_call_operand.vmem [shape: bf16[512], index: 0, kind: input, shape index: {}]   ;;  %s217_s1 = inlined_call_operand.vmem [shape: bf16[2,4,4,16], index: 1, kind: output, shape index: {}]  }
   0x1   :  { %v14_v0 = vld [vmem:[%s216_s0] sm:$0x3]  ;;  %s155_s0 = smov 112   ;;  %s158_s10 = smov 64  }
   0x2   :  { %v15_v1 = vunpack.c.l.bf16 %v14_v0  ;;  %s159_s11 = smov 48   ;;  %s160_s12 = smov 32  }
   0x3   :  { %s161_s13 = smov 16  }
   0x4   :  { %17 = vst [vmem:[#allocation1] sm:$0xf] %v15_v1 }
   0xb   :  { %v22_v2 = vld [vmem:[#allocation1] sm:$0xf]  }
   0xc   :  { %v38_v3 = vld [vmem:[#allocation1] sm:$0xf]   ;;  %23 = vrot.lane.b32.xlu0 %v22_v2, %s155_s0 }
   0xd   :  { %39 = vrot.lane.b32.xlu1 %v38_v3, %s156_s8  ;;  %v30_v4 = vld [vmem:[#allocation1] sm:$0xf]  }
   0xe   :  { %v46_v5 = vld [vmem:[#allocation1] sm:$0xf]  }
   0xf   :  { %v18_v6 = vld [vmem:[#allocation1] sm:$0xf]  }
  0x10   :  { %20 = vst.msk [vmem:[#allocation0] ss:$16 sm:$0x3] %vm19_vm0, %v18_v6   ;;  %21 = vst.msk [vmem:[#allocation0] ss:$16 sm:$0xc] %vm19_vm0, %v18_v6   ;;  %31 = vrot.lane.b32.xlu0 %v30_v4, %s157_s9 }
  0x11   :  { %47 = vrot.lane.b32.xlu1 %v46_v5, %s158_s10  ;;  %v54_v7 = vld [vmem:[#allocation1] sm:$0xf]  }
  0x12   :  { %v62_v8 = vld [vmem:[#allocation1] sm:$0xf]  }
  0x13   :  { %v70_v9 = vld [vmem:[#allocation1] sm:$0xf]  }
  0x14   :  { %55 = vrot.lane.b32.xlu0 %v54_v7, %s159_s11 }
  0x15   :  { %63 = vrot.lane.b32.xlu1 %v62_v8, %s160_s12 }
  0x18   :  { %71 = vrot.lane.b32.xlu0 %v70_v9, %s161_s13 }
  0x7e   :  { %v24_v10 = vpop.permute.xlu0 %23  }
  0x7f   :  { %v40_v11 = vpop.permute.xlu1 %39   ;;  %27 = vst.msk [vmem:[#allocation0 + $0x1] ss:$16 sm:$0x3] %vm19_vm0, %v24_v10   ;;  %29 = vst.msk [vmem:[#allocation0 + $0x1] ss:$16 sm:$0xc] %vm19_vm0, %v24_v10  }
  0x80   :  { %43 = vst.msk [vmem:[#allocation0 + $0x3] ss:$16 sm:$0x3] %vm19_vm0, %v40_v11   ;;  %45 = vst.msk [vmem:[#allocation0 + $0x3] ss:$16 sm:$0xc] %vm19_vm0, %v40_v11  }
  0x82   :  { %v32_v12 = vpop.permute.xlu0 %31  }
  0x83   :  { %v48_v13 = vpop.permute.xlu1 %47   ;;  %35 = vst.msk [vmem:[#allocation0 + $0x2] ss:$16 sm:$0x3] %vm19_vm0, %v32_v12   ;;  %37 = vst.msk [vmem:[#allocation0 + $0x2] ss:$16 sm:$0xc] %vm19_vm0, %v32_v12  }
  0x84   :  { %51 = vst.msk [vmem:[#allocation0 + $0x8] ss:$16 sm:$0x3] %vm19_vm0, %v48_v13   ;;  %53 = vst.msk [vmem:[#allocation0 + $0x8] ss:$16 sm:$0xc] %vm19_vm0, %v48_v13  }
  0x86   :  { %v56_v14 = vpop.permute.xlu0 %55  }
  0x87   :  { %v64_v15 = vpop.permute.xlu1 %63   ;;  %59 = vst.msk [vmem:[#allocation0 + $0x9] ss:$16 sm:$0x3] %vm19_vm0, %v56_v14   ;;  %61 = vst.msk [vmem:[#allocation0 + $0x9] ss:$16 sm:$0xc] %vm19_vm0, %v56_v14  }
  0x88   :  { %67 = vst.msk [vmem:[#allocation0 + $0xa] ss:$16 sm:$0x3] %vm19_vm0, %v64_v15   ;;  %69 = vst.msk [vmem:[#allocation0 + $0xa] ss:$16 sm:$0xc] %vm19_vm0, %v64_v15  }
  0x8a   :  { %v107_v16 = vld [vmem:[#allocation0 + $0x20] sm:$0xf]  ;;  %v121_v17 = vld [vmem:[#allocation0 + $0x30] sm:$0xf]  ;;  %v72_v19 = vpop.permute.xlu0 %71  }
  0x8b   :  { %v82_v18 = vld [vmem:[#allocation0] sm:$0xf]  ;;  %v108_v21 = vpack.c.bf16 %v162_v20, %v107_v16  ;;  %v122_v22 = vpack.c.bf16 %v162_v20, %v121_v17  ;;  %v93_v23 = vld [vmem:[#allocation0 + $0x10] sm:$0xf] }
  0x8c   :  { %v83_v24 = vpack.c.bf16 %v162_v20, %v82_v18  ;;  %75 = vst.msk [vmem:[#allocation0 + $0xb] ss:$16 sm:$0x3] %vm19_vm0, %v72_v19   ;;  %77 = vst.msk [vmem:[#allocation0 + $0xb] ss:$16 sm:$0xc] %vm19_vm0, %v72_v19   ;;  %v94_v25 = vpack.c.bf16 %v162_v20, %v93_v23 }
  0x8d   :  { %143 = vst [vmem:[%s217_s1 + $0x8] sm:$0x3] %v108_v21  ;;  %145 = vst [vmem:[%s217_s1 + $0xc] sm:$0x3] %v122_v22 }
  0x8e   :  { %85 = vst [vmem:[%s217_s1] sm:$0x3] %v83_v24  ;;  %141 = vst [vmem:[%s217_s1 + $0x4] sm:$0x3] %v94_v25 }
  0x93   :  { %v87_v26 = vld [vmem:[#allocation0 + $0x8] sm:$0xf]  ;;  %v100_v27 = vld [vmem:[#allocation0 + $0x18] sm:$0xf] }
  0x94   :  { %v114_v28 = vld [vmem:[#allocation0 + $0x28] sm:$0xf]  ;;  %v88_v29 = vpack.c.bf16 %v162_v20, %v87_v26  ;;  %v101_v30 = vpack.c.bf16 %v162_v20, %v100_v27  ;;  %v128_v32 = vld [vmem:[#allocation0 + $0x38] sm:$0xf] }
  0x95   :  { %v115_v31 = vpack.c.bf16 %v162_v20, %v114_v28  ;;  %v129_v33 = vpack.c.bf16 %v162_v20, %v128_v32 }
  0x96   :  { %140 = vst [vmem:[%s217_s1 + $0x2] sm:$0x3] %v88_v29  ;;  %142 = vst [vmem:[%s217_s1 + $0x6] sm:$0x3] %v101_v30 }
  0x97   :  { %144 = vst [vmem:[%s217_s1 + $0xa] sm:$0x3] %v115_v31  ;;  %146 = vst [vmem:[%s217_s1 + $0xe] sm:$0x3] %v129_v33 }

// kernel: _lambda_.50
= control target key start
LH: loop header
LB: loop body
LE: loop exit
PB: predicated region body
PF: predicated region fallthrough
CT: control target
= control target key end

     0   :  { %vm44_vm0 = vcmask 130048   ;;  %vm120_vm1 = vcmask 76800   ;;  %s199_s1 = inlined_call_operand.vmem [shape: bf16[16,10], index: 1, kind: input, shape index: {}]   ;;  %s200_s0 = inlined_call_operand.vmem [shape: bf16[32,16], index: 0, kind: input, shape index: {}]   ;;  %s201_s2 = inlined_call_operand.vmem [shape: f32[1,10], index: 2, kind: input, shape index: {}]   ;;  %s202_s3 = inlined_call_operand.vmem [shape: bf16[32,10], index: 3, kind: output, shape index: {}]  }
   0x1   :  { %v152_v0 = vld [vmem:[%s199_s1] sm:$0xff]   ;;  %v154_v2 = vld [vmem:[%s200_s0 + $0x8] sm:$0xff]  }
   0x2   :  { %v153_v1 = vld [vmem:[%s200_s0] sm:$0xff]   ;;  %146 = vmatprep.subr.bf16.mxu0 %v152_v0 }
   0x3   :  { %147 = vmatpush3.bf16.msra.mxu0 %v152_v0  ;;  %148 = vmatprep.mubr.msk.bf16.mxu0 %vm44_vm0, %v153_v1  ;;  %v129_v3 = vld [vmem:[%s201_s2] ss:$0 sm:$0xff] }
   0x6   :  { %149 = vmatmul.mubr.msk.bf16.vlgmr.msra.gmra.mrb[0].mxu0 %vm44_vm0, %v154_v2 }
  0xd9   :  { %v150_v4 = vpop.f32.mrb[0].mxu0 }
  0xda   :  { %v94_v5 = vadd.f32 %v150_v4, %v129_v3  ;;  %v85_v6 = vpop.f32.mrb[1].mxu0 }
  0xdb   :  { %v86_v7 = vadd.f32 %v129_v3, %v85_v6  ;;  %v151_v8 = vpop.f32.mrb[2].mxu0 }
  0xdc   :  { %v102_v9 = vmax.f32 %v94_v5, 0.0  ;;  %v97_v10 = vadd.f32 %v151_v8, %v129_v3  ;;  %v88_v11 = vpop.f32.mrb[3].mxu0 }
  0xdd   :  { %v100_v12 = vmax.f32 %v86_v7, 0.0  ;;  %v89_v13 = vadd.f32 %v129_v3, %v88_v11 }
  0xde   :  { %v141_v14 = vpack.c.bf16 %v102_v9, %v102_v9  ;;  %v103_v15 = vmax.f32 %v97_v10, 0.0 }
  0xdf   :  { %v139_v16 = vpack.c.bf16 %v100_v12, %v100_v12  ;;  %v101_v17 = vmax.f32 %v89_v13, 0.0 }
  0xe0   :  { %123 = vst.msk [vmem:[%s202_s3 + $0x8] sm:$0xf] %vm120_vm1, %v141_v14  ;;  %v142_v18 = vpack.c.bf16 %v103_v15, %v103_v15 }
  0xe1   :  { %121 = vst.msk [vmem:[%s202_s3] sm:$0xf] %vm120_vm1, %v139_v16  ;;  %v140_v19 = vpack.c.bf16 %v101_v17, %v101_v17 }
  0xe2   :  { %124 = vst.msk [vmem:[%s202_s3 + $0xc] sm:$0xf] %vm120_vm1, %v142_v18 }
  0xe3   :  { %122 = vst.msk [vmem:[%s202_s3 + $0x4] sm:$0xf] %vm120_vm1, %v140_v19 }

// kernel: _lambda_.53
= control target key start
LH: loop header
LB: loop body
LE: loop exit
PB: predicated region body
PF: predicated region fallthrough
CT: control target
= control target key end

     0   :  { %vm44_vm0 = vcmask 130048   ;;  %vm120_vm1 = vcmask 27648   ;;  %s199_s1 = inlined_call_operand.vmem [shape: bf16[16,4], index: 1, kind: input, shape index: {}]   ;;  %s200_s0 = inlined_call_operand.vmem [shape: bf16[32,16], index: 0, kind: input, shape index: {}]   ;;  %s201_s2 = inlined_call_operand.vmem [shape: f32[1,4], index: 2, kind: input, shape index: {}]   ;;  %s202_s3 = inlined_call_operand.vmem [shape: bf16[32,4], index: 3, kind: output, shape index: {}]  }
   0x1   :  { %v152_v0 = vld [vmem:[%s199_s1] sm:$0xff]   ;;  %v154_v2 = vld [vmem:[%s200_s0 + $0x8] sm:$0xff]  }
   0x2   :  { %v153_v1 = vld [vmem:[%s200_s0] sm:$0xff]   ;;  %146 = vmatprep.subr.bf16.mxu0 %v152_v0 }
   0x3   :  { %147 = vmatpush3.bf16.msra.mxu0 %v152_v0  ;;  %148 = vmatprep.mubr.msk.bf16.mxu0 %vm44_vm0, %v153_v1  ;;  %v129_v3 = vld [vmem:[%s201_s2] ss:$0 sm:$0xff] }
   0x6   :  { %149 = vmatmul.mubr.msk.bf16.vlgmr.msra.gmra.mrb[0].mxu0 %vm44_vm0, %v154_v2 }
  0xd9   :  { %v150_v4 = vpop.f32.mrb[0].mxu0 }
  0xda   :  { %v94_v5 = vadd.f32 %v150_v4, %v129_v3  ;;  %v85_v6 = vpop.f32.mrb[1].mxu0 }
  0xdb   :  { %v86_v7 = vadd.f32 %v129_v3, %v85_v6  ;;  %v151_v8 = vpop.f32.mrb[2].mxu0 }
  0xdc   :  { %v102_v9 = vmax.f32 %v94_v5, 0.0  ;;  %v97_v10 = vadd.f32 %v151_v8, %v129_v3  ;;  %v88_v11 = vpop.f32.mrb[3].mxu0 }
  0xdd   :  { %v100_v12 = vmax.f32 %v86_v7, 0.0  ;;  %v89_v13 = vadd.f32 %v129_v3, %v88_v11 }
  0xde   :  { %v141_v14 = vpack.c.bf16 %v102_v9, %v102_v9  ;;  %v103_v15 = vmax.f32 %v97_v10, 0.0 }
  0xdf   :  { %v139_v16 = vpack.c.bf16 %v100_v12, %v100_v12  ;;  %v101_v17 = vmax.f32 %v89_v13, 0.0 }
  0xe0   :  { %123 = vst.msk [vmem:[%s202_s3 + $0x8] sm:$0xf] %vm120_vm1, %v141_v14  ;;  %v142_v18 = vpack.c.bf16 %v103_v15, %v103_v15 }
  0xe1   :  { %121 = vst.msk [vmem:[%s202_s3] sm:$0xf] %vm120_vm1, %v139_v16  ;;  %v140_v19 = vpack.c.bf16 %v101_v17, %v101_v17 }
  0xe2   :  { %124 = vst.msk [vmem:[%s202_s3 + $0xc] sm:$0xf] %vm120_vm1, %v142_v18 }
  0xe3   :  { %122 = vst.msk [vmem:[%s202_s3 + $0x4] sm:$0xf] %vm120_vm1, %v140_v19 }

// kernel: _lambda_.51
= control target key start
LH: loop header
LB: loop body
LE: loop exit
PB: predicated region body
PF: predicated region fallthrough
CT: control target
= control target key end

     0   :  { %vm64_vm0 = vcmask 441344   ;;  %vm71_vm1 = vcmask 1042432   ;;  %vm144_vm2 = vcmask 93184   ;;  %s248_s1 = inlined_call_operand.vmem [shape: bf16[54,12], index: 1, kind: input, shape index: {}]   ;;  %s249_s0 = inlined_call_operand.vmem [shape: bf16[32,54], index: 0, kind: input, shape index: {}]   ;;  %s250_s2 = inlined_call_operand.vmem [shape: f32[1,12], index: 2, kind: input, shape index: {}]   ;;  %s251_s3 = inlined_call_operand.vmem [shape: bf16[32,12], index: 3, kind: output, shape index: {}]  }
   0x1   :  { %v189_v0 = vld [vmem:[%s248_s1] sm:$0xff]   ;;  %v190_v1 = vld [vmem:[%s248_s1 + $0x8] sm:$0xff]   ;;  %v191_v2 = vld [vmem:[%s248_s1 + $0x10] sm:$0xff]  }
   0x2   :  { %176 = vmatprep.subr.bf16.mxu0 %v189_v0  ;;  %v193_v3 = vld [vmem:[%s249_s0] sm:$0xff]   ;;  %v192_v4 = vld [vmem:[%s248_s1 + $0x18] ss:$0 sps:$4 sm:$0x77]   ;;  %v194_v6 = vld [vmem:[%s249_s0 + $0x8] sm:$0xff]  }
   0x3   :  { %177 = vmatpush3.bf16.msra.mxu0 %v189_v0  ;;  %184 = vmatprep.mubr.msk.bf16.mxu0 %vm64_vm0, %v193_v3  ;;  %v73_v5 = vsel %vm71_vm1, %v192_v4, 0  ;;  %v153_v7 = vld [vmem:[%s250_s2] ss:$0 sm:$0xff] }
   0x4   :  { %178 = vmatprep.subr.bf16.mxu0 %v190_v1 }
   0x7   :  { %179 = vmatpush3.bf16.msra.mxu0 %v190_v1 }
   0x8   :  { %180 = vmatprep.subr.bf16.mxu0 %v191_v2 }
   0xb   :  { %181 = vmatpush3.bf16.msra.mxu0 %v191_v2 }
   0xc   :  { %188 = vmatprep.subr.msk.bf16.mxu0 %vm71_vm1, %v192_v4 }
   0xf   :  { %183 = vmatpush3.bf16.msra.mxu0 %v73_v5 }
  0x12   :  { %185 = vmatmul.mubr.msk.bf16.vlgmr.msra.gmra.mrb[0].mxu0 %vm64_vm0, %v194_v6 }
  0xe5   :  { %v186_v8 = vpop.f32.mrb[0].mxu0 }
  0xe6   :  { %v118_v9 = vadd.f32 %v186_v8, %v153_v7  ;;  %v109_v10 = vpop.f32.mrb[1].mxu0 }
  0xe7   :  { %v110_v11 = vadd.f32 %v153_v7, %v109_v10  ;;  %v187_v12 = vpop.f32.mrb[2].mxu0 }
  0xe8   :  { %v126_v13 = vmax.f32 %v118_v9, 0.0  ;;  %v121_v14 = vadd.f32 %v187_v12, %v153_v7  ;;  %v112_v15 = vpop.f32.mrb[3].mxu0 }
  0xe9   :  { %v124_v16 = vmax.f32 %v110_v11, 0.0  ;;  %v113_v17 = vadd.f32 %v153_v7, %v112_v15 }
  0xea   :  { %v168_v18 = vpack.c.bf16 %v126_v13, %v126_v13  ;;  %v127_v19 = vmax.f32 %v121_v14, 0.0 }
  0xeb   :  { %v166_v20 = vpack.c.bf16 %v124_v16, %v124_v16  ;;  %v125_v21 = vmax.f32 %v113_v17, 0.0 }
  0xec   :  { %147 = vst.msk [vmem:[%s251_s3 + $0x8] sm:$0xf] %vm144_vm2, %v168_v18  ;;  %v169_v22 = vpack.c.bf16 %v127_v19, %v127_v19 }
  0xed   :  { %145 = vst.msk [vmem:[%s251_s3] sm:$0xf] %vm144_vm2, %v166_v20  ;;  %v167_v23 = vpack.c.bf16 %v125_v21, %v125_v21 }
  0xee   :  { %148 = vst.msk [vmem:[%s251_s3 + $0xc] sm:$0xf] %vm144_vm2, %v169_v22 }
  0xef   :  { %146 = vst.msk [vmem:[%s251_s3 + $0x4] sm:$0xf] %vm144_vm2, %v167_v23 }

// kernel: _lambda_.54
= control target key start
LH: loop header
LB: loop body
LE: loop exit
PB: predicated region body
PF: predicated region fallthrough
CT: control target
= control target key end

     0   :  { %vm48_vm0 = vcmask 162816   ;;  %vm55_vm1 = vcmask 1041408   ;;  %vm128_vm2 = vcmask 76800   ;;  %s216_s1 = inlined_call_operand.vmem [shape: bf16[20,10], index: 1, kind: input, shape index: {}]   ;;  %s217_s0 = inlined_call_operand.vmem [shape: bf16[32,20], index: 0, kind: input, shape index: {}]   ;;  %s218_s2 = inlined_call_operand.vmem [shape: f32[1,10], index: 2, kind: input, shape index: {}]   ;;  %s219_s3 = inlined_call_operand.vmem [shape: bf16[32,10], index: 3, kind: output, shape index: {}]  }
   0x1   :  { %v165_v0 = vld [vmem:[%s216_s1] sm:$0xff]   ;;  %v166_v1 = vld [vmem:[%s216_s1 + $0x8] ss:$0 sps:$4 sm:$0x33]  }
   0x2   :  { %v167_v2 = vld [vmem:[%s217_s0] sm:$0xff]   ;;  %156 = vmatprep.subr.bf16.mxu0 %v165_v0  ;;  %v57_v3 = vsel %vm55_vm1, %v166_v1, 0  ;;  %v168_v4 = vld [vmem:[%s217_s0 + $0x8] sm:$0xff]  }
   0x3   :  { %157 = vmatpush3.bf16.msra.mxu0 %v165_v0  ;;  %160 = vmatprep.mubr.msk.bf16.mxu0 %vm48_vm0, %v167_v2  ;;  %v137_v5 = vld [vmem:[%s218_s2] ss:$0 sm:$0xff] }
   0x4   :  { %164 = vmatprep.subr.msk.bf16.mxu0 %vm55_vm1, %v166_v1 }
   0x7   :  { %159 = vmatpush3.bf16.msra.mxu0 %v57_v3 }
   0xa   :  { %161 = vmatmul.mubr.msk.bf16.vlgmr.msra.gmra.mrb[0].mxu0 %vm48_vm0, %v168_v4 }
  0xdd   :  { %v162_v6 = vpop.f32.mrb[0].mxu0 }
  0xde   :  { %v102_v7 = vadd.f32 %v162_v6, %v137_v5  ;;  %v93_v8 = vpop.f32.mrb[1].mxu0 }
  0xdf   :  { %v94_v9 = vadd.f32 %v137_v5, %v93_v8  ;;  %v163_v10 = vpop.f32.mrb[2].mxu0 }
  0xe0   :  { %v110_v11 = vmax.f32 %v102_v7, 0.0  ;;  %v105_v12 = vadd.f32 %v163_v10, %v137_v5  ;;  %v96_v13 = vpop.f32.mrb[3].mxu0 }
  0xe1   :  { %v108_v14 = vmax.f32 %v94_v9, 0.0  ;;  %v97_v15 = vadd.f32 %v137_v5, %v96_v13 }
  0xe2   :  { %v150_v16 = vpack.c.bf16 %v110_v11, %v110_v11  ;;  %v111_v17 = vmax.f32 %v105_v12, 0.0 }
  0xe3   :  { %v148_v18 = vpack.c.bf16 %v108_v14, %v108_v14  ;;  %v109_v19 = vmax.f32 %v97_v15, 0.0 }
  0xe4   :  { %131 = vst.msk [vmem:[%s219_s3 + $0x8] sm:$0xf] %vm128_vm2, %v150_v16  ;;  %v151_v20 = vpack.c.bf16 %v111_v17, %v111_v17 }
  0xe5   :  { %129 = vst.msk [vmem:[%s219_s3] sm:$0xf] %vm128_vm2, %v148_v18  ;;  %v149_v21 = vpack.c.bf16 %v109_v19, %v109_v19 }
  0xe6   :  { %132 = vst.msk [vmem:[%s219_s3 + $0xc] sm:$0xf] %vm128_vm2, %v151_v20 }
  0xe7   :  { %130 = vst.msk [vmem:[%s219_s3 + $0x4] sm:$0xf] %vm128_vm2, %v149_v21 }

// kernel: squeeze.20
= control target key start
LH: loop header
LB: loop body
LE: loop exit
PB: predicated region body
PF: predicated region fallthrough
CT: control target
= control target key end

     0   :  { %s336_s8 = smov 124   ;;  %vm236_vm0 = vcmask 982016   ;;  %vm209_vm1 = vcmask 916480   ;;  %s337_s9 = smov 112   ;;  %vm250_vm2 = vcmask 1014784   ;;  %vm223_vm3 = vcmask 949248   ;;  %s413_s0 = inlined_call_operand.vmem [shape: bf16[640], index: 0, kind: input, shape index: {}]   ;;  %s414_s1 = inlined_call_operand.vmem [shape: bf16[32,20], index: 1, kind: output, shape index: {}]  }
   0x1   :  { %v14_v0 = vld [vmem:[%s413_s0] sm:$0xf]  ;;  %s335_s0 = smov 120   ;;  %s338_s10 = smov 116   ;;  %vm19_vm4 = vcmask 162816   ;;  %vm240_vm5 = vcmask 64512  }
   0x2   :  { %v15_v1 = vunpack.c.l.bf16 %v14_v0  ;;  %s339_s11 = smov 8   ;;  %s340_s12 = smov 16   ;;  %vm213_vm6 = vcmask 130048   ;;  %vm243_vm7 = vcmask 162880   ;;  %vm216_vm8 = vcmask 162944  }
   0x3   :  { %s341_s13 = smov 4   ;;  %s342_s14 = smov 12   ;;  %vm254_vm9 = vcmask 31744   ;;  %vm227_vm10 = vcmask 97280   ;;  %vm257_vm11 = vcmask 162848   ;;  %vm230_vm12 = vcmask 162912  }
   0x4   :  { %17 = vst [vmem:[#allocation1] sm:$0xff] %v15_v1  ;;  %s343_s15 = smov 104   ;;  %s344_s16 = smov 108  }
   0x5   :  { %s345_s17 = smov 96   ;;  %s346_s18 = smov 100  }
   0x6   :  { %s347_s19 = smov 88   ;;  %s348_s20 = smov 92  }
   0x7   :  { %s349_s21 = smov 80   ;;  %s350_s22 = smov 84  }
   0x8   :  { %s351_s23 = smov 72   ;;  %s352_s24 = smov 76  }
   0x9   :  { %s353_s25 = smov 64   ;;  %s354_s26 = smov 68  }
   0xa   :  { %s355_s27 = smov 56   ;;  %s356_s28 = smov 60  }
   0xb   :  { %v29_v2 = vld [vmem:[#allocation1 + $0x4] sm:$0x1]   ;;  %v22_v3 = vld [vmem:[#allocation1 + $0x2] sm:$0x1]   ;;  %v43_v4 = vld [vmem:[#allocation1 + $0x3] sm:$0x1]  }
   0xc   :  { %30 = vrot.lane.b32.xlu1 %v29_v2, %s335_s0  ;;  %23 = vrot.lane.b32.xlu0 %v22_v3, %s336_s8  ;;  %v36_v5 = vld [vmem:[#allocation1 + $0x1] sm:$0x1]   ;;  %v233_v6 = vld [vmem:[#allocation1] sm:$0x1]   ;;  %v208_v9 = vld [vmem:[#allocation1 + $0x2] sm:$0x1]  }
   0xd   :  { %v235_v7 = vld [vmem:[#allocation1 + $0x1] sm:$0x1]   ;;  %v247_v12 = vld [vmem:[#allocation1 + $0x2] sm:$0x1]   ;;  %v249_v13 = vld [vmem:[#allocation1 + $0x3] sm:$0x1]  }
   0xe   :  { %v206_v8 = vld [vmem:[#allocation1 + $0x1] sm:$0x1]   ;;  %v237_v10 = vsel %vm236_vm0, %v235_v7, %v233_v6  ;;  %v220_v14 = vld [vmem:[#allocation1 + $0x3] sm:$0x1]   ;;  %v222_v15 = vld [vmem:[#allocation1 + $0x4] sm:$0x1]   ;;  %v251_v16 = vsel %vm250_vm2, %v249_v13, %v247_v12 }
   0xf   :  { %v210_v11 = vsel %vm209_vm1, %v208_v9, %v206_v8  ;;  %v224_v17 = vsel %vm223_vm3, %v222_v15, %v220_v14  ;;  %v18_v18 = vld [vmem:[#allocation1] sm:$0x1]   ;;  %v56_v19 = vld [vmem:[#allocation1 + $0x2] sm:$0x1]   ;;  %v70_v21 = vld [vmem:[#allocation1 + $0x1] sm:$0x1]  }
  0x10   :  { %44 = vrot.lane.b32.xlu1 %v43_v4, %s337_s9  ;;  %37 = vrot.lane.b32.xlu0 %v36_v5, %s338_s10  ;;  %v49_v20 = vld [vmem:[#allocation1] sm:$0x1]   ;;  %20 = vst.msk [vmem:[#allocation0] sm:$0x1] %vm19_vm4, %v18_v18   ;;  %v63_v22 = vld [vmem:[#allocation1 + $0x4] sm:$0x1]  }
  0x11   :  { %v83_v23 = vld [vmem:[#allocation1] sm:$0x1]   ;;  %v77_v24 = vld [vmem:[#allocation1 + $0x3] sm:$0x1]   ;;  %v97_v25 = vld [vmem:[#allocation1 + $0x4] sm:$0x1]  }
  0x12   :  { %v90_v26 = vld [vmem:[#allocation1 + $0x2] sm:$0x1]   ;;  %v111_v27 = vld [vmem:[#allocation1 + $0x3] sm:$0x1]   ;;  %v104_v28 = vld [vmem:[#allocation1 + $0x1] sm:$0x1]  }
  0x13   :  { %v124_v29 = vld [vmem:[#allocation1 + $0x2] sm:$0x1]   ;;  %v117_v30 = vld [vmem:[#allocation1] sm:$0x1]   ;;  %v138_v31 = vld [vmem:[#allocation1 + $0x1] sm:$0x1]  }
  0x14   :  { %238 = vrot.lane.b32.xlu1 %v237_v10, %s339_s11  ;;  %211 = vrot.lane.b32.xlu0 %v210_v11, %s340_s12  ;;  %v131_v32 = vld [vmem:[#allocation1 + $0x4] sm:$0x1]   ;;  %v151_v33 = vld [vmem:[#allocation1] sm:$0x1]   ;;  %v145_v34 = vld [vmem:[#allocation1 + $0x3] sm:$0x1]  }
  0x15   :  { %s357_s29 = smov 48   ;;  %s358_s30 = smov 52   ;;  %v165_v35 = vld [vmem:[#allocation1 + $0x4] sm:$0x1]   ;;  %v158_v36 = vld [vmem:[#allocation1 + $0x2] sm:$0x1]  }
  0x16   :  { %s359_s2 = smov 40   ;;  %s360_s3 = smov 44   ;;  %v179_v37 = vld [vmem:[#allocation1 + $0x3] sm:$0x1]   ;;  %v172_v38 = vld [vmem:[#allocation1 + $0x1] sm:$0x1]  }
  0x17   :  { %s361_s4 = smov 32   ;;  %s362_s5 = smov 36   ;;  %v192_v39 = vld [vmem:[#allocation1 + $0x2] sm:$0x1]   ;;  %v185_v40 = vld [vmem:[#allocation1] sm:$0x1]  }
  0x18   :  { %252 = vrot.lane.b32.xlu1 %v251_v16, %s341_s13  ;;  %225 = vrot.lane.b32.xlu0 %v224_v17, %s342_s14  ;;  %s363_s6 = smov 24   ;;  %s364_s7 = smov 28   ;;  %v199_v41 = vld [vmem:[#allocation1 + $0x4] sm:$0x1]  }
  0x19   :  { %s365_s0 = smov 20  }
  0x1c   :  { %57 = vrot.lane.b32.xlu1 %v56_v19, %s343_s15  ;;  %50 = vrot.lane.b32.xlu0 %v49_v20, %s344_s16 }
  0x20   :  { %71 = vrot.lane.b32.xlu1 %v70_v21, %s345_s17  ;;  %64 = vrot.lane.b32.xlu0 %v63_v22, %s346_s18 }
  0x24   :  { %84 = vrot.lane.b32.xlu1 %v83_v23, %s347_s19  ;;  %78 = vrot.lane.b32.xlu0 %v77_v24, %s348_s20 }
  0x28   :  { %98 = vrot.lane.b32.xlu1 %v97_v25, %s349_s21  ;;  %91 = vrot.lane.b32.xlu0 %v90_v26, %s350_s22 }
  0x2c   :  { %112 = vrot.lane.b32.xlu1 %v111_v27, %s351_s23  ;;  %105 = vrot.lane.b32.xlu0 %v104_v28, %s352_s24 }
  0x30   :  { %125 = vrot.lane.b32.xlu1 %v124_v29, %s353_s25  ;;  %118 = vrot.lane.b32.xlu0 %v117_v30, %s354_s26 }
  0x34   :  { %139 = vrot.lane.b32.xlu1 %v138_v31, %s355_s27  ;;  %132 = vrot.lane.b32.xlu0 %v131_v32, %s356_s28 }
  0x38   :  { %152 = vrot.lane.b32.xlu1 %v151_v33, %s357_s29  ;;  %146 = vrot.lane.b32.xlu0 %v145_v34, %s358_s30 }
  0x3c   :  { %166 = vrot.lane.b32.xlu1 %v165_v35, %s359_s2  ;;  %159 = vrot.lane.b32.xlu0 %v158_v36, %s360_s3 }
  0x40   :  { %180 = vrot.lane.b32.xlu1 %v179_v37, %s361_s4  ;;  %173 = vrot.lane.b32.xlu0 %v172_v38, %s362_s5 }
  0x44   :  { %193 = vrot.lane.b32.xlu1 %v192_v39, %s363_s6  ;;  %186 = vrot.lane.b32.xlu0 %v185_v40, %s364_s7 }
  0x48   :  { %200 = vrot.lane.b32.xlu0 %v199_v41, %s365_s0 }
  0x7e   :  { %v31_v42 = vpop.permute.xlu1 %30   ;;  %v24_v43 = vpop.permute.xlu0 %23  }
  0x7f   :  { %34 = vst.msk [vmem:[#allocation0 + $0x1a] sm:$0x1] %vm19_vm4, %v31_v42   ;;  %27 = vst.msk [vmem:[#allocation0 + $0xd] sm:$0x1] %vm19_vm4, %v24_v43  }
  0x82   :  { %v45_v44 = vpop.permute.xlu1 %44   ;;  %v38_v45 = vpop.permute.xlu0 %37  }
  0x83   :  { %48 = vst.msk [vmem:[#allocation0 + $0x14] sm:$0x1] %vm19_vm4, %v45_v44   ;;  %41 = vst.msk [vmem:[#allocation0 + $0x7] sm:$0x1] %vm19_vm4, %v38_v45  }
  0x86   :  { %v239_v46 = vpop.permute.xlu1 %238   ;;  %v212_v47 = vpop.permute.xlu0 %211  }
  0x87   :  { %242 = vst.msk [vmem:[#allocation0 + $0x6] sm:$0x1] %vm240_vm5, %v239_v46  }
  0x88   :  { %215 = vst.msk [vmem:[#allocation0 + $0xc] sm:$0x1] %vm213_vm6, %v212_v47  }
  0x89   :  { %245 = vst.msk [vmem:[#allocation0 + $0x6] sm:$0x1] %vm243_vm7, %v239_v46  }
  0x8a   :  { %218 = vst.msk [vmem:[#allocation0 + $0xc] sm:$0x1] %vm216_vm8, %v212_v47   ;;  %v253_v48 = vpop.permute.xlu1 %252   ;;  %v226_v49 = vpop.permute.xlu0 %225  }
  0x8b   :  { %256 = vst.msk [vmem:[#allocation0 + $0x13] sm:$0x1] %vm254_vm9, %v253_v48  }
  0x8c   :  { %229 = vst.msk [vmem:[#allocation0 + $0x19] sm:$0x1] %vm227_vm10, %v226_v49  }
  0x8d   :  { %259 = vst.msk [vmem:[#allocation0 + $0x13] sm:$0x1] %vm257_vm11, %v253_v48  }
  0x8e   :  { %232 = vst.msk [vmem:[#allocation0 + $0x19] sm:$0x1] %vm230_vm12, %v226_v49   ;;  %v58_v50 = vpop.permute.xlu1 %57   ;;  %v51_v51 = vpop.permute.xlu0 %50  }
  0x8f   :  { %61 = vst.msk [vmem:[#allocation0 + $0xe] sm:$0x1] %vm19_vm4, %v58_v50   ;;  %54 = vst.msk [vmem:[#allocation0 + $0x1] sm:$0x1] %vm19_vm4, %v51_v51  }
  0x92   :  { %v72_v52 = vpop.permute.xlu1 %71   ;;  %v65_v53 = vpop.permute.xlu0 %64  }
  0x93   :  { %75 = vst.msk [vmem:[#allocation0 + $0x8] sm:$0x1] %vm19_vm4, %v72_v52   ;;  %68 = vst.msk [vmem:[#allocation0 + $0x1b] sm:$0x1] %vm19_vm4, %v65_v53  }
  0x96   :  { %v85_v54 = vpop.permute.xlu1 %84   ;;  %v79_v55 = vpop.permute.xlu0 %78  }
  0x97   :  { %88 = vst.msk [vmem:[#allocation0 + $0x2] sm:$0x1] %vm19_vm4, %v85_v54   ;;  %82 = vst.msk [vmem:[#allocation0 + $0x15] sm:$0x1] %vm19_vm4, %v79_v55  }
  0x9a   :  { %v99_v56 = vpop.permute.xlu1 %98   ;;  %v92_v57 = vpop.permute.xlu0 %91  }
  0x9b   :  { %102 = vst.msk [vmem:[#allocation0 + $0x1c] sm:$0x1] %vm19_vm4, %v99_v56   ;;  %95 = vst.msk [vmem:[#allocation0 + $0xf] sm:$0x1] %vm19_vm4, %v92_v57  }
  0x9e   :  { %v113_v58 = vpop.permute.xlu1 %112   ;;  %v106_v59 = vpop.permute.xlu0 %105  }
  0x9f   :  { %116 = vst.msk [vmem:[#allocation0 + $0x16] sm:$0x1] %vm19_vm4, %v113_v58   ;;  %109 = vst.msk [vmem:[#allocation0 + $0x9] sm:$0x1] %vm19_vm4, %v106_v59  }
  0xa2   :  { %v126_v60 = vpop.permute.xlu1 %125   ;;  %v119_v61 = vpop.permute.xlu0 %118  }
  0xa3   :  { %129 = vst.msk [vmem:[#allocation0 + $0x10] sm:$0x1] %vm19_vm4, %v126_v60   ;;  %122 = vst.msk [vmem:[#allocation0 + $0x3] sm:$0x1] %vm19_vm4, %v119_v61  }
  0xa6   :  { %v140_v62 = vpop.permute.xlu1 %139   ;;  %v133_v63 = vpop.permute.xlu0 %132  }
  0xa7   :  { %143 = vst.msk [vmem:[#allocation0 + $0xa] sm:$0x1] %vm19_vm4, %v140_v62   ;;  %136 = vst.msk [vmem:[#allocation0 + $0x1d] sm:$0x1] %vm19_vm4, %v133_v63  }
  0xaa   :  { %v153_v0 = vpop.permute.xlu1 %152   ;;  %v147_v1 = vpop.permute.xlu0 %146  }
  0xab   :  { %156 = vst.msk [vmem:[#allocation0 + $0x4] sm:$0x1] %vm19_vm4, %v153_v0   ;;  %150 = vst.msk [vmem:[#allocation0 + $0x17] sm:$0x1] %vm19_vm4, %v147_v1  }
  0xae   :  { %v167_v2 = vpop.permute.xlu1 %166   ;;  %v160_v3 = vpop.permute.xlu0 %159  }
  0xaf   :  { %170 = vst.msk [vmem:[#allocation0 + $0x1e] sm:$0x1] %vm19_vm4, %v167_v2   ;;  %163 = vst.msk [vmem:[#allocation0 + $0x11] sm:$0x1] %vm19_vm4, %v160_v3  }
  0xb2   :  { %v181_v4 = vpop.permute.xlu1 %180   ;;  %v174_v5 = vpop.permute.xlu0 %173  }
  0xb3   :  { %184 = vst.msk [vmem:[#allocation0 + $0x18] sm:$0x1] %vm19_vm4, %v181_v4   ;;  %177 = vst.msk [vmem:[#allocation0 + $0xb] sm:$0x1] %vm19_vm4, %v174_v5  }
  0xb6   :  { %v194_v6 = vpop.permute.xlu1 %193   ;;  %v187_v7 = vpop.permute.xlu0 %186  }
  0xb7   :  { %197 = vst.msk [vmem:[#allocation0 + $0x12] sm:$0x1] %vm19_vm4, %v194_v6   ;;  %190 = vst.msk [vmem:[#allocation0 + $0x5] sm:$0x1] %vm19_vm4, %v187_v7  }
  0xba   :  { %v201_v8 = vpop.permute.xlu0 %200   ;;  %v269_v9 = vld [vmem:[#allocation0 + $0x8] sm:$0xff] }
  0xbb   :  { %204 = vst.msk [vmem:[#allocation0 + $0x1f] sm:$0x1] %vm19_vm4, %v201_v8  }
  0xbe   :  { %v264_v10 = vld [vmem:[#allocation0] sm:$0xff]  ;;  %v275_v12 = vld [vmem:[#allocation0 + $0x10] sm:$0xff] }
  0xbf   :  { %v296_v11 = vpack.c.bf16 %v269_v9, %v264_v10 }
  0xc1   :  { %297 = vst [vmem:[%s414_s1] sm:$0xff] %v296_v11  }
  0xc2   :  { %v282_v13 = vld [vmem:[#allocation0 + $0x18] sm:$0xff] }
  0xc3   :  { %v301_v14 = vpack.c.bf16 %v282_v13, %v275_v12 }
  0xc5   :  { %303 = vst [vmem:[%s414_s1 + $0x8] sm:$0xff] %v301_v14  }

// kernel: _lambda_.56
= control target key start
LH: loop header
LB: loop body
LE: loop exit
PB: predicated region body
PF: predicated region fallthrough
CT: control target
= control target key end

     0   :  { %vm41_vm0 = vcmask 1044480   ;;  %vm42_vm1 = vsmask.f32 4352  ;;  %v109_v32 = vlaneseq  ;;  %v182_v35 = vmov 1966171168   ;;  %s229_s0 = inlined_call_operand.vmem [shape: bf16[9,640], index: 0, kind: input, shape index: {}]   ;;  %s230_s1 = inlined_call_operand.vmem [shape: bf16[1,640], index: 1, kind: output, shape index: {}]  }
   0x1   :  { %v175_v0 = vld [vmem:[%s229_s0] ss:$20 sps:$4 sm:$0x1f]   ;;  %v177_v1 = vld [vmem:[%s229_s0 + $0x4] ss:$20 sps:$4 sm:$0x1f]   ;;  %vm43_vm2 = vmand %vm41_vm0, %vm42_vm1  ;;  %v107_v36 = vunpack.c.l.s4 %v182_v35 }
   0x2   :  { %v178_v2 = vld [vmem:[%s229_s0 + $0x8] ss:$20 sps:$4 sm:$0x1f]   ;;  %v180_v3 = vld [vmem:[%s229_s0 + $0xc] ss:$20 sps:$4 sm:$0x1f]  }
   0x3   :  { %v181_v4 = vld [vmem:[%s229_s0 + $0x10] ss:$20 sps:$4 sm:$0x1f]   ;;  %v44_v5 = vsel %vm43_vm2, %v175_v0, 4286644096  ;;  %vm144_vm3 = vcmask 1040384   ;;  %v108_v47 = vunpack.c.0.s8 %v107_v36 }
   0x4   :  { %v45_v6 = vunpack.i.l.bf16 %v44_v5  ;;  %v46_v7 = vunpack.i.h.bf16 %v44_v5  ;;  %v55_v8 = vsel %vm43_vm2, %v177_v1, 4286644096  ;;  %v66_v9 = vsel %vm43_vm2, %v178_v2, 4286644096 }
   0x5   :  { %v56_v10 = vunpack.i.l.bf16 %v55_v8  ;;  %v57_v11 = vunpack.i.h.bf16 %v55_v8  ;;  %v67_v12 = vunpack.i.l.bf16 %v66_v9  ;;  %v68_v13 = vunpack.i.h.bf16 %v66_v9 }
   0x6   :  { %v47_v14 = vmax.f32 %v45_v6, %v46_v7  ;;  %v77_v15 = vsel %vm43_vm2, %v180_v3, 4286644096  ;;  %v88_v16 = vsel %vm43_vm2, %v181_v4, 4286644096  ;;  %vm145_vm4 = vsmask.f32 256 }
   0x7   :  { %v58_v17 = vmax.f32 %v56_v10, %v57_v11  ;;  %v69_v18 = vmax.f32 %v67_v12, %v68_v13  ;;  %v78_v19 = vunpack.i.l.bf16 %v77_v15  ;;  %v79_v20 = vunpack.i.h.bf16 %v77_v15  ;;  %vm210_vm7 = vmand %vm144_vm3, %vm145_vm4  ;;  %v162_v12 = vld [vmem:[%s230_s1] sm:$0x1f] }
   0x8   :  { %v48_v21 = vrot.slane %v47_v14, 4  ;;  %v89_v22 = vunpack.i.l.bf16 %v88_v16  ;;  %v90_v23 = vunpack.i.h.bf16 %v88_v16  ;;  %vm147_vm5 = vcmask 1041409  }
   0x9   :  { %v59_v24 = vrot.slane %v58_v17, 4  ;;  %v70_v25 = vrot.slane %v69_v18, 4  ;;  %v80_v26 = vmax.f32 %v78_v19, %v79_v20  ;;  %vm148_vm6 = vsmask.f32 1280 }
   0xa   :  { %v49_v27 = vmax.f32 %v47_v14, %v48_v21  ;;  %v91_v28 = vmax.f32 %v89_v22, %v90_v23  ;;  %v110_v52 = vshrl.u32 %v109_v32, 7  ;;  %vm214_vm8 = vmand %vm147_vm5, %vm148_vm6  ;;  %vm151_vm9 = vcmask 1042434  }
   0xb   :  { %v60_v29 = vmax.f32 %v58_v17, %v59_v24  ;;  %v71_v30 = vmax.f32 %v69_v18, %v70_v25  ;;  %v81_v31 = vrot.slane %v80_v26, 4  ;;  %vm152_vm10 = vsmask.f32 2304  ;;  %vm150_vm11 = vmor %vm214_vm8, %vm210_vm7 }
   0xc   :  { %v50_v33 = vrot.slane %v49_v27, 2  ;;  %v92_v34 = vrot.slane %v91_v28, 4  ;;  %v111_v0 = vsub.s32 %v108_v47, %v110_v52  ;;  %vm153_vm12 = vmand %vm151_vm9, %vm152_vm10  ;;  %vm155_vm13 = vcmask 1043459  }
   0xd   :  { %v61_v37 = vrot.slane %v60_v29, 2  ;;  %v72_v38 = vrot.slane %v71_v30, 2  ;;  %v82_v39 = vmax.f32 %v80_v26, %v81_v31  ;;  %vm156_vm14 = vsmask.f32 3328  ;;  %vm154_vm15 = vmor %vm153_vm12, %vm150_vm11 }
   0xe   :  { %v51_v40 = vmax.f32 %v49_v27, %v50_v33  ;;  %v93_v41 = vmax.f32 %v91_v28, %v92_v34  ;;  %vm157_vm0 = vmand %vm155_vm13, %vm156_vm14  ;;  %vm159_vm2 = vcmask 1044484  }
   0xf   :  { %v62_v42 = vmax.f32 %v60_v29, %v61_v37  ;;  %v73_v43 = vmax.f32 %v71_v30, %v72_v38  ;;  %v83_v44 = vrot.slane %v82_v39, 2  ;;  %vm158_vm3 = vmor %vm157_vm0, %vm154_vm15 }
  0x10   :  { %v52_v45 = vrot.slane %v51_v40, 1  ;;  %v94_v46 = vrot.slane %v93_v41, 2  ;;  %vm160_vm4 = vmand %vm159_vm2, %vm42_vm1 }
  0x11   :  { %v63_v49 = vrot.slane %v62_v42, 1  ;;  %v74_v50 = vrot.slane %v73_v43, 1  ;;  %v84_v51 = vmax.f32 %v82_v39, %v83_v44  ;;  %vm161_vm5 = vmor %vm160_vm4, %vm158_vm3 }
  0x12   :  { %v53_v54 = vmax.f32 %v51_v40, %v52_v45  ;;  %v95_v55 = vmax.f32 %v93_v41, %v94_v46 }
  0x13   :  { %v64_v56 = vmax.f32 %v62_v42, %v63_v49  ;;  %v75_v57 = vmax.f32 %v73_v43, %v74_v50  ;;  %v85_v58 = vrot.slane %v84_v51, 1 }
  0x14   :  { %v54_v59 = vpack.i.bf16 %v53_v54, %v53_v54  ;;  %v96_v60 = vrot.slane %v95_v55, 1 }
  0x15   :  { %v65_v61 = vpack.i.bf16 %v64_v56, %v64_v56  ;;  %v76_v62 = vpack.i.bf16 %v75_v57, %v75_v57  ;;  %v86_v63 = vmax.f32 %v84_v51, %v85_v58 }
  0x16   :  { %v97_v1 = vmax.f32 %v95_v55, %v96_v60 }
  0x17   :  { %v87_v2 = vpack.i.bf16 %v86_v63, %v86_v63  ;;  %v104_v3 = vcombine.low %v54_v59, %v65_v61 }
  0x18   :  { %v98_v4 = vpack.i.bf16 %v97_v1, %v97_v1 }
  0x19   :  { %v105_v5 = vcombine.low %v76_v62, %v87_v2  ;;  %v112_v6 = vrot.slane %v104_v3, %v111_v0 }
  0x1a   :  { %v126_v7 = vrot.slane %v98_v4, %v111_v0 }
  0x1b   :  { %v119_v8 = vrot.slane %v105_v5, %v111_v0 }
  0x1c   :  { %v141_v10 = vrot.slane %v126_v7, %v111_v0 }
  0x1d   :  { %v127_v9 = vcombine.low %v112_v6, %v119_v8 }
  0x1f   :  { %v134_v11 = vrot.slane %v127_v9, %v111_v0 }
  0x21   :  { %v142_v13 = vcombine.low %v134_v11, %v141_v10 }
  0x23   :  { %v163_v14 = vsel %vm161_vm5, %v142_v13, %v162_v12 }
  0x24   :  { %164 = vst [vmem:[%s230_s1] sm:$0x1f] %v163_v14 }

// kernel: _lambda_.57
= control target key start
LH: loop header
LB: loop body
LE: loop exit
PB: predicated region body
PF: predicated region fallthrough
CT: control target
= control target key end

     0   :  { %vm48_vm0 = vcmask 162816   ;;  %vm55_vm1 = vcmask 1041408   ;;  %vm128_vm2 = vcmask 27648   ;;  %s216_s1 = inlined_call_operand.vmem [shape: bf16[20,4], index: 1, kind: input, shape index: {}]   ;;  %s217_s0 = inlined_call_operand.vmem [shape: bf16[32,20], index: 0, kind: input, shape index: {}]   ;;  %s218_s2 = inlined_call_operand.vmem [shape: f32[1,4], index: 2, kind: input, shape index: {}]   ;;  %s219_s3 = inlined_call_operand.vmem [shape: bf16[32,4], index: 3, kind: output, shape index: {}]  }
   0x1   :  { %v165_v0 = vld [vmem:[%s216_s1] sm:$0xff]   ;;  %v166_v1 = vld [vmem:[%s216_s1 + $0x8] ss:$0 sps:$4 sm:$0x33]  }
   0x2   :  { %v167_v2 = vld [vmem:[%s217_s0] sm:$0xff]   ;;  %156 = vmatprep.subr.bf16.mxu0 %v165_v0  ;;  %v57_v3 = vsel %vm55_vm1, %v166_v1, 0  ;;  %v168_v4 = vld [vmem:[%s217_s0 + $0x8] sm:$0xff]  }
   0x3   :  { %157 = vmatpush3.bf16.msra.mxu0 %v165_v0  ;;  %160 = vmatprep.mubr.msk.bf16.mxu0 %vm48_vm0, %v167_v2  ;;  %v137_v5 = vld [vmem:[%s218_s2] ss:$0 sm:$0xff] }
   0x4   :  { %164 = vmatprep.subr.msk.bf16.mxu0 %vm55_vm1, %v166_v1 }
   0x7   :  { %159 = vmatpush3.bf16.msra.mxu0 %v57_v3 }
   0xa   :  { %161 = vmatmul.mubr.msk.bf16.vlgmr.msra.gmra.mrb[0].mxu0 %vm48_vm0, %v168_v4 }
  0xdd   :  { %v162_v6 = vpop.f32.mrb[0].mxu0 }
  0xde   :  { %v102_v7 = vadd.f32 %v162_v6, %v137_v5  ;;  %v93_v8 = vpop.f32.mrb[1].mxu0 }
  0xdf   :  { %v94_v9 = vadd.f32 %v137_v5, %v93_v8  ;;  %v163_v10 = vpop.f32.mrb[2].mxu0 }
  0xe0   :  { %v110_v11 = vmax.f32 %v102_v7, 0.0  ;;  %v105_v12 = vadd.f32 %v163_v10, %v137_v5  ;;  %v96_v13 = vpop.f32.mrb[3].mxu0 }
  0xe1   :  { %v108_v14 = vmax.f32 %v94_v9, 0.0  ;;  %v97_v15 = vadd.f32 %v137_v5, %v96_v13 }
  0xe2   :  { %v150_v16 = vpack.c.bf16 %v110_v11, %v110_v11  ;;  %v111_v17 = vmax.f32 %v105_v12, 0.0 }
  0xe3   :  { %v148_v18 = vpack.c.bf16 %v108_v14, %v108_v14  ;;  %v109_v19 = vmax.f32 %v97_v15, 0.0 }
  0xe4   :  { %131 = vst.msk [vmem:[%s219_s3 + $0x8] sm:$0xf] %vm128_vm2, %v150_v16  ;;  %v151_v20 = vpack.c.bf16 %v111_v17, %v111_v17 }
  0xe5   :  { %129 = vst.msk [vmem:[%s219_s3] sm:$0xf] %vm128_vm2, %v148_v18  ;;  %v149_v21 = vpack.c.bf16 %v109_v19, %v109_v19 }
  0xe6   :  { %132 = vst.msk [vmem:[%s219_s3 + $0xc] sm:$0xf] %vm128_vm2, %v151_v20 }
  0xe7   :  { %130 = vst.msk [vmem:[%s219_s3 + $0x4] sm:$0xf] %vm128_vm2, %v149_v21 }

// kernel: squeeze.22
= control target key start
LH: loop header
LB: loop body
LE: loop exit
PB: predicated region body
PF: predicated region fallthrough
CT: control target
= control target key end

     0   :  { %s88_s8 = smov 108   ;;  %vm19_vm0 = vcmask 162816   ;;  %vm61_vm1 = vcmask 982016   ;;  %s89_s9 = smov 68   ;;  %vm65_vm2 = vcmask 64512   ;;  %vm68_vm3 = vcmask 162880   ;;  %s118_s0 = inlined_call_operand.vmem [shape: bf16[160], index: 0, kind: input, shape index: {}]   ;;  %s119_s1 = inlined_call_operand.vmem [shape: bf16[8,20], index: 1, kind: output, shape index: {}]  }
   0x1   :  { %v14_v0 = vld [vmem:[%s118_s0] sm:$0x1]  ;;  %s87_s0 = smov 116   ;;  %s90_s10 = smov 88   ;;  %v94_v20 = vmov 0.0  }
   0x2   :  { %v15_v1 = vunpack.c.l.bf16 %v14_v0  ;;  %s91_s11 = smov 8   ;;  %s92_s12 = smov 48  }
   0x3   :  { %s93_s13 = smov 28  }
   0x4   :  { %17 = vst [vmem:[#allocation1] sm:$0x3] %v15_v1 }
   0xb   :  { %v22_v2 = vld [vmem:[#allocation1 + $0x1] sm:$0x1]   ;;  %v28_v3 = vld [vmem:[#allocation1] sm:$0x1]  }
   0xc   :  { %23 = vrot.lane.b32.xlu0 %v22_v2, %s87_s0  ;;  %29 = vrot.lane.b32.xlu1 %v28_v3, %s88_s8  ;;  %v40_v4 = vld [vmem:[#allocation1] sm:$0x1]   ;;  %v60_v8 = vld [vmem:[#allocation1 + $0x1] sm:$0x1]  }
   0xd   :  { %v34_v5 = vld [vmem:[#allocation1] sm:$0x1]  }
   0xe   :  { %v18_v6 = vld [vmem:[#allocation1] sm:$0x1]  }
   0xf   :  { %v58_v7 = vld [vmem:[#allocation1] sm:$0x1]   ;;  %20 = vst.msk [vmem:[#allocation0] sm:$0x1] %vm19_vm0, %v18_v6  }
  0x10   :  { %41 = vrot.lane.b32.xlu0 %v40_v4, %s89_s9  ;;  %35 = vrot.lane.b32.xlu1 %v34_v5, %s90_s10  ;;  %v62_v9 = vsel %vm61_vm1, %v60_v8, %v58_v7  ;;  %v46_v10 = vld [vmem:[#allocation1] sm:$0x1]  }
  0x11   :  { %v52_v11 = vld [vmem:[#allocation1] sm:$0x1]  }
  0x14   :  { %63 = vrot.lane.b32.xlu0 %v62_v9, %s91_s11  ;;  %47 = vrot.lane.b32.xlu1 %v46_v10, %s92_s12 }
  0x18   :  { %53 = vrot.lane.b32.xlu0 %v52_v11, %s93_s13 }
  0x7e   :  { %v24_v12 = vpop.permute.xlu0 %23   ;;  %v30_v13 = vpop.permute.xlu1 %29  }
  0x7f   :  { %27 = vst.msk [vmem:[#allocation0 + $0x7] sm:$0x1] %vm19_vm0, %v24_v12   ;;  %33 = vst.msk [vmem:[#allocation0 + $0x1] sm:$0x1] %vm19_vm0, %v30_v13  }
  0x82   :  { %v42_v14 = vpop.permute.xlu0 %41   ;;  %v36_v15 = vpop.permute.xlu1 %35  }
  0x83   :  { %45 = vst.msk [vmem:[#allocation0 + $0x3] sm:$0x1] %vm19_vm0, %v42_v14   ;;  %39 = vst.msk [vmem:[#allocation0 + $0x2] sm:$0x1] %vm19_vm0, %v36_v15  }
  0x86   :  { %v64_v16 = vpop.permute.xlu0 %63   ;;  %v48_v17 = vpop.permute.xlu1 %47  }
  0x87   :  { %67 = vst.msk [vmem:[#allocation0 + $0x6] sm:$0x1] %vm65_vm2, %v64_v16  }
  0x88   :  { %51 = vst.msk [vmem:[#allocation0 + $0x4] sm:$0x1] %vm19_vm0, %v48_v17  }
  0x89   :  { %70 = vst.msk [vmem:[#allocation0 + $0x6] sm:$0x1] %vm68_vm3, %v64_v16  }
  0x8a   :  { %v54_v18 = vpop.permute.xlu0 %53  }
  0x8b   :  { %57 = vst.msk [vmem:[#allocation0 + $0x5] sm:$0x1] %vm19_vm0, %v54_v18  }
  0x92   :  { %v75_v19 = vld [vmem:[#allocation0] sm:$0xff] }
  0x93   :  { %v76_v21 = vpack.c.bf16 %v94_v20, %v75_v19 }
  0x95   :  { %78 = vst [vmem:[%s119_s1] sm:$0xf] %v76_v21 }

// kernel: squeeze.21
= control target key start
LH: loop header
LB: loop body
LE: loop exit
PB: predicated region body
PF: predicated region fallthrough
CT: control target
= control target key end

     0   :  { %s113_s8 = smov 116   ;;  %vm19_vm0 = vcmask 162816   ;;  %vm61_vm1 = vcmask 982016   ;;  %s114_s9 = smov 88   ;;  %vm65_vm2 = vcmask 64512   ;;  %vm68_vm3 = vcmask 162880   ;;  %s152_s0 = inlined_call_operand.vmem [shape: bf16[160], index: 0, kind: input, shape index: {}]   ;;  %s153_s1 = inlined_call_operand.vmem [shape: bf16[2,2,2,20], index: 1, kind: output, shape index: {}]  }
   0x1   :  { %v14_v0 = vld [vmem:[%s152_s0] sm:$0x1]  ;;  %s112_s0 = smov 108   ;;  %s115_s10 = smov 68   ;;  %v119_v19 = vmov 0.0  }
   0x2   :  { %v15_v1 = vunpack.c.l.bf16 %v14_v0  ;;  %s116_s11 = smov 8   ;;  %s117_s12 = smov 48  }
   0x3   :  { %s118_s13 = smov 28  }
   0x4   :  { %17 = vst [vmem:[#allocation1] sm:$0x3] %v15_v1 }
   0xb   :  { %v28_v2 = vld [vmem:[#allocation1] sm:$0x1]   ;;  %v22_v3 = vld [vmem:[#allocation1 + $0x1] sm:$0x1]  }
   0xc   :  { %29 = vrot.lane.b32.xlu1 %v28_v2, %s112_s0  ;;  %23 = vrot.lane.b32.xlu0 %v22_v3, %s113_s8  ;;  %v34_v4 = vld [vmem:[#allocation1] sm:$0x1]   ;;  %v60_v8 = vld [vmem:[#allocation1 + $0x1] sm:$0x1]  }
   0xd   :  { %v40_v5 = vld [vmem:[#allocation1] sm:$0x1]  }
   0xe   :  { %v18_v6 = vld [vmem:[#allocation1] sm:$0x1]  }
   0xf   :  { %v58_v7 = vld [vmem:[#allocation1] sm:$0x1]   ;;  %20 = vst.msk [vmem:[#allocation0] sm:$0x1] %vm19_vm0, %v18_v6  }
  0x10   :  { %35 = vrot.lane.b32.xlu1 %v34_v4, %s114_s9  ;;  %41 = vrot.lane.b32.xlu0 %v40_v5, %s115_s10  ;;  %v62_v9 = vsel %vm61_vm1, %v60_v8, %v58_v7  ;;  %v46_v10 = vld [vmem:[#allocation1] sm:$0x1]  }
  0x11   :  { %v52_v11 = vld [vmem:[#allocation1] sm:$0x1]  }
  0x14   :  { %63 = vrot.lane.b32.xlu0 %v62_v9, %s116_s11  ;;  %47 = vrot.lane.b32.xlu1 %v46_v10, %s117_s12 }
  0x18   :  { %53 = vrot.lane.b32.xlu0 %v52_v11, %s118_s13 }
  0x7e   :  { %v30_v12 = vpop.permute.xlu1 %29   ;;  %v24_v13 = vpop.permute.xlu0 %23  }
  0x7f   :  { %33 = vst.msk [vmem:[#allocation0 + $0x1] sm:$0x1] %vm19_vm0, %v30_v12   ;;  %27 = vst.msk [vmem:[#allocation0 + $0x19] sm:$0x1] %vm19_vm0, %v24_v13  }
  0x82   :  { %v36_v14 = vpop.permute.xlu1 %35   ;;  %v42_v15 = vpop.permute.xlu0 %41  }
  0x83   :  { %39 = vst.msk [vmem:[#allocation0 + $0x8] sm:$0x1] %vm19_vm0, %v36_v14   ;;  %45 = vst.msk [vmem:[#allocation0 + $0x9] sm:$0x1] %vm19_vm0, %v42_v15  }
  0x86   :  { %v75_v16 = vld [vmem:[#allocation0] sm:$0x3]  ;;  %v64_v17 = vpop.permute.xlu0 %63   ;;  %v48_v18 = vpop.permute.xlu1 %47  }
  0x87   :  { %v76_v20 = vpack.c.bf16 %v119_v19, %v75_v16  ;;  %67 = vst.msk [vmem:[#allocation0 + $0x18] sm:$0x1] %vm65_vm2, %v64_v17  }
  0x88   :  { %51 = vst.msk [vmem:[#allocation0 + $0x10] sm:$0x1] %vm19_vm0, %v48_v18  }
  0x89   :  { %70 = vst.msk [vmem:[#allocation0 + $0x18] sm:$0x1] %vm68_vm3, %v64_v17   ;;  %78 = vst [vmem:[%s153_s1] sm:$0x1] %v76_v20 }
  0x8a   :  { %v80_v21 = vld [vmem:[#allocation0 + $0x8] sm:$0x3]  ;;  %v54_v22 = vpop.permute.xlu0 %53  }
  0x8b   :  { %v81_v23 = vpack.c.bf16 %v119_v19, %v80_v21  ;;  %57 = vst.msk [vmem:[#allocation0 + $0x11] sm:$0x1] %vm19_vm0, %v54_v22  }
  0x8d   :  { %101 = vst [vmem:[%s153_s1 + $0x1] sm:$0x1] %v81_v23 }
  0x90   :  { %v93_v24 = vld [vmem:[#allocation0 + $0x18] sm:$0x3] }
  0x91   :  { %v94_v25 = vpack.c.bf16 %v119_v19, %v93_v24 }
  0x92   :  { %v86_v26 = vld [vmem:[#allocation0 + $0x10] sm:$0x3] }
  0x93   :  { %103 = vst [vmem:[%s153_s1 + $0x3] sm:$0x1] %v94_v25  ;;  %v87_v27 = vpack.c.bf16 %v119_v19, %v86_v26 }
  0x95   :  { %102 = vst [vmem:[%s153_s1 + $0x2] sm:$0x1] %v87_v27 }

// kernel: _lambda_.58
= control target key start
LH: loop header
LB: loop body
LE: loop exit
PB: predicated region body
PF: predicated region fallthrough
CT: control target
= control target key end

     0   :  { %vm21_vm0 = vcmask 1044480   ;;  %vm22_vm1 = vsmask.f32 4352  ;;  %v84_v16 = vmov 1966171168   ;;  %v52_v18 = vlaneseq  ;;  %s107_s0 = inlined_call_operand.vmem [shape: bf16[9,256], index: 0, kind: input, shape index: {}]   ;;  %s108_s1 = inlined_call_operand.vmem [shape: bf16[1,256], index: 1, kind: output, shape index: {}]  }
   0x1   :  { %v81_v0 = vld [vmem:[%s107_s0] ss:$8 sps:$4 sm:$0x1f]   ;;  %v83_v1 = vld [vmem:[%s107_s0 + $0x4] ss:$8 sps:$4 sm:$0x1f]   ;;  %vm23_vm2 = vmand %vm21_vm0, %vm22_vm1  ;;  %v50_v17 = vunpack.c.l.s4 %v84_v16 }
   0x2   :  { %v24_v2 = vsel %vm23_vm2, %v81_v0, 4286644096  ;;  %v35_v5 = vsel %vm23_vm2, %v83_v1, 4286644096  ;;  %v53_v24 = vshrl.u32 %v52_v18, 7  ;;  %vm64_vm3 = vcmask 1040384  }
   0x3   :  { %v25_v3 = vunpack.i.l.bf16 %v24_v2  ;;  %v26_v4 = vunpack.i.h.bf16 %v24_v2  ;;  %v36_v6 = vunpack.i.l.bf16 %v35_v5  ;;  %v37_v7 = vunpack.i.h.bf16 %v35_v5  ;;  %v71_v32 = vld [vmem:[%s108_s1] sm:$0x3] }
   0x4   :  { %v51_v23 = vunpack.c.0.s8 %v50_v17  ;;  %vm65_vm4 = vsmask.f32 256  ;;  %vm67_vm5 = vcmask 1041409   ;;  %vm68_vm6 = vsmask.f32 1280 }
   0x5   :  { %v27_v8 = vmax.f32 %v25_v3, %v26_v4  ;;  %v38_v9 = vmax.f32 %v36_v6, %v37_v7  ;;  %vm66_vm7 = vmand %vm64_vm3, %vm65_vm4 }
   0x6   :  { %v54_v29 = vsub.s32 %v51_v23, %v53_v24  ;;  %vm69_vm8 = vmand %vm67_vm5, %vm68_vm6 }
   0x7   :  { %v28_v10 = vrot.slane %v27_v8, 4  ;;  %v39_v11 = vrot.slane %v38_v9, 4  ;;  %vm70_vm9 = vmor %vm69_vm8, %vm66_vm7 }
   0x9   :  { %v29_v12 = vmax.f32 %v27_v8, %v28_v10  ;;  %v40_v13 = vmax.f32 %v38_v9, %v39_v11 }
   0xb   :  { %v30_v14 = vrot.slane %v29_v12, 2  ;;  %v41_v15 = vrot.slane %v40_v13, 2 }
   0xd   :  { %v31_v19 = vmax.f32 %v29_v12, %v30_v14  ;;  %v42_v20 = vmax.f32 %v40_v13, %v41_v15 }
   0xf   :  { %v32_v21 = vrot.slane %v31_v19, 1  ;;  %v43_v22 = vrot.slane %v42_v20, 1 }
  0x11   :  { %v33_v25 = vmax.f32 %v31_v19, %v32_v21  ;;  %v44_v26 = vmax.f32 %v42_v20, %v43_v22 }
  0x13   :  { %v34_v27 = vpack.i.bf16 %v33_v25, %v33_v25  ;;  %v45_v28 = vpack.i.bf16 %v44_v26, %v44_v26 }
  0x15   :  { %v48_v30 = vcombine.low %v34_v27, %v45_v28 }
  0x17   :  { %v55_v31 = vrot.slane %v48_v30, %v54_v29 }
  0x19   :  { %v62_v33 = vrot.slane %v55_v31, %v54_v29 }
  0x1b   :  { %v72_v34 = vsel %vm70_vm9, %v62_v33, %v71_v32 }
  0x1c   :  { %73 = vst [vmem:[%s108_s1] sm:$0x3] %v72_v34 }

// kernel: _lambda_.59
= control target key start
LH: loop header
LB: loop body
LE: loop exit
PB: predicated region body
PF: predicated region fallthrough
CT: control target
= control target key end

     0   :  { %v110_v0 = vmov 0.0   ;;  %vm39_vm0 = vcmask 1041408   ;;  %vm111_vm1 = vmmov 0   ;;  %vm35_vm2 = vcmask 162816   ;;  %s147_s1 = inlined_call_operand.vmem [shape: bf16[20,14], index: 1, kind: input, shape index: {}]   ;;  %s148_s0 = inlined_call_operand.vmem [shape: bf16[8,20], index: 0, kind: input, shape index: {}]   ;;  %s149_s2 = inlined_call_operand.vmem [shape: f32[1,14], index: 2, kind: input, shape index: {}]   ;;  %s150_s3 = inlined_call_operand.vmem [shape: bf16[8,14], index: 3, kind: output, shape index: {}]  }
   0x1   :  { %98 = vmatprep.subr.bf16.mxu0 %v110_v0  ;;  %v108_v1 = vld [vmem:[%s147_s1] sm:$0xff]   ;;  %102 = vmatprep.mubr.msk.bf16.mxu0 %vm111_vm1, %v110_v0  ;;  %v109_v2 = vld [vmem:[%s147_s1 + $0x8] ss:$0 sps:$4 sm:$0x33]   ;;  %vm85_vm3 = vcmask 109568  }
   0x2   :  { %99 = vmatpush3.bf16.msra.mxu0 %v108_v1  ;;  %v41_v3 = vsel %vm39_vm0, %v109_v2, 0  ;;  %v15_v4 = vld [vmem:[%s148_s0] sm:$0xf] }
   0x3   :  { %100 = vmatprep.subr.bf16.mxu0 %v110_v0  ;;  %v91_v5 = vld [vmem:[%s149_s2] ss:$0 sm:$0xff] }
   0x6   :  { %101 = vmatpush3.bf16.msra.mxu0 %v41_v3 }
   0x9   :  { %103 = vmatmul.mubr.msk.bf16.vlgmr.msra.gmra.mrb[0].mxu0 %vm35_vm2, %v15_v4 }
  0xdc   :  { %v77_v6 = vpop.f32.mrb[0].mxu0 }
  0xdd   :  { %v78_v7 = vadd.f32 %v91_v5, %v77_v6  ;;  %v104_v8 = vpop.f32.mrb[1].mxu0 }
  0xde   :  { %v80_v9 = vpop.f32.mrb[2].mxu0 }
  0xdf   :  { %v83_v10 = vmax.f32 %v78_v7, 0.0  ;;  %v105_v11 = vpop.f32.mrb[3].mxu0 }
  0xe1   :  { %v84_v12 = vpack.c.bf16 %v83_v10, %v83_v10 }
  0xe3   :  { %86 = vst.msk [vmem:[%s150_s3] sm:$0xf] %vm85_vm3, %v84_v12 }

// kernel: _lambda_.60
= control target key start
LH: loop header
LB: loop body
LE: loop exit
PB: predicated region body
PF: predicated region fallthrough
CT: control target
= control target key end

     0   :  { %v136_v0 = vmov 0.0   ;;  %vm137_vm0 = vmmov 0   ;;  %vm55_vm1 = vcmask 1042432   ;;  %vm51_vm2 = vcmask 441344   ;;  %s179_s1 = inlined_call_operand.vmem [shape: bf16[54,12], index: 1, kind: input, shape index: {}]   ;;  %s180_s0 = inlined_call_operand.vmem [shape: bf16[8,54], index: 0, kind: input, shape index: {}]   ;;  %s181_s2 = inlined_call_operand.vmem [shape: f32[1,12], index: 2, kind: input, shape index: {}]   ;;  %s182_s3 = inlined_call_operand.vmem [shape: bf16[8,12], index: 3, kind: output, shape index: {}]  }
   0x1   :  { %118 = vmatprep.subr.bf16.mxu0 %v136_v0  ;;  %v132_v1 = vld [vmem:[%s179_s1] sm:$0xff]   ;;  %126 = vmatprep.mubr.msk.bf16.mxu0 %vm137_vm0, %v136_v0  ;;  %v133_v2 = vld [vmem:[%s179_s1 + $0x8] sm:$0xff]   ;;  %v134_v3 = vld [vmem:[%s179_s1 + $0x10] sm:$0xff]   ;;  %vm101_vm3 = vcmask 93184  }
   0x2   :  { %119 = vmatpush3.bf16.msra.mxu0 %v132_v1  ;;  %v135_v4 = vld [vmem:[%s179_s1 + $0x18] ss:$0 sps:$4 sm:$0x77]   ;;  %v15_v6 = vld [vmem:[%s180_s0] sm:$0xf] }
   0x3   :  { %120 = vmatprep.subr.bf16.mxu0 %v136_v0  ;;  %v57_v5 = vsel %vm55_vm1, %v135_v4, 0  ;;  %v107_v7 = vld [vmem:[%s181_s2] ss:$0 sm:$0xff] }
   0x6   :  { %121 = vmatpush3.bf16.msra.mxu0 %v133_v2 }
   0x7   :  { %122 = vmatprep.subr.bf16.mxu0 %v136_v0 }
   0xa   :  { %123 = vmatpush3.bf16.msra.mxu0 %v134_v3 }
   0xb   :  { %124 = vmatprep.subr.bf16.mxu0 %v136_v0 }
   0xe   :  { %125 = vmatpush3.bf16.msra.mxu0 %v57_v5 }
  0x11   :  { %127 = vmatmul.mubr.msk.bf16.vlgmr.msra.gmra.mrb[0].mxu0 %vm51_vm2, %v15_v6 }
  0xe4   :  { %v93_v8 = vpop.f32.mrb[0].mxu0 }
  0xe5   :  { %v94_v9 = vadd.f32 %v107_v7, %v93_v8  ;;  %v128_v10 = vpop.f32.mrb[1].mxu0 }
  0xe6   :  { %v96_v11 = vpop.f32.mrb[2].mxu0 }
  0xe7   :  { %v99_v12 = vmax.f32 %v94_v9, 0.0  ;;  %v129_v13 = vpop.f32.mrb[3].mxu0 }
  0xe9   :  { %v100_v14 = vpack.c.bf16 %v99_v12, %v99_v12 }
  0xeb   :  { %102 = vst.msk [vmem:[%s182_s3] sm:$0xf] %vm101_vm3, %v100_v14 }

// kernel: squeeze.24
= control target key start
LH: loop header
LB: loop body
LE: loop exit
PB: predicated region body
PF: predicated region fallthrough
CT: control target
= control target key end

     0   :  { %s89_s8 = smov 104   ;;  %vm19_vm0 = vcmask 195584   ;;  %vm62_vm1 = vcmask 982016   ;;  %s90_s9 = smov 80   ;;  %vm66_vm2 = vcmask 64512   ;;  %vm69_vm3 = vcmask 195648   ;;  %s119_s0 = inlined_call_operand.vmem [shape: bf16[192], index: 0, kind: input, shape index: {}]   ;;  %s120_s1 = inlined_call_operand.vmem [shape: bf16[8,24], index: 1, kind: output, shape index: {}]  }
   0x1   :  { %v14_v0 = vld [vmem:[%s119_s0] sm:$0x1]  ;;  %s88_s0 = smov 112   ;;  %s91_s10 = smov 88   ;;  %v95_v20 = vmov 0.0  }
   0x2   :  { %v15_v1 = vunpack.c.l.bf16 %v14_v0  ;;  %s92_s11 = smov 8   ;;  %s93_s12 = smov 56  }
   0x3   :  { %s94_s13 = smov 32  }
   0x4   :  { %17 = vst [vmem:[#allocation1] sm:$0x3] %v15_v1 }
   0xb   :  { %v22_v2 = vld [vmem:[#allocation1 + $0x1] sm:$0x1]   ;;  %v28_v3 = vld [vmem:[#allocation1] sm:$0x1]  }
   0xc   :  { %23 = vrot.lane.b32.xlu0 %v22_v2, %s88_s0  ;;  %29 = vrot.lane.b32.xlu1 %v28_v3, %s89_s8  ;;  %v41_v4 = vld [vmem:[#allocation1] sm:$0x1]   ;;  %v35_v5 = vld [vmem:[#allocation1 + $0x1] sm:$0x1]  }
   0xd   :  { %v18_v6 = vld [vmem:[#allocation1] sm:$0x1]   ;;  %v61_v8 = vld [vmem:[#allocation1 + $0x1] sm:$0x1]  }
   0xe   :  { %v59_v7 = vld [vmem:[#allocation1] sm:$0x1]   ;;  %20 = vst.msk [vmem:[#allocation0] sm:$0x1] %vm19_vm0, %v18_v6  }
   0xf   :  { %v63_v9 = vsel %vm62_vm1, %v61_v8, %v59_v7  ;;  %v47_v10 = vld [vmem:[#allocation1] sm:$0x1]  }
  0x10   :  { %42 = vrot.lane.b32.xlu0 %v41_v4, %s90_s9  ;;  %36 = vrot.lane.b32.xlu1 %v35_v5, %s91_s10  ;;  %v53_v11 = vld [vmem:[#allocation1] sm:$0x1]  }
  0x14   :  { %64 = vrot.lane.b32.xlu0 %v63_v9, %s92_s11  ;;  %48 = vrot.lane.b32.xlu1 %v47_v10, %s93_s12 }
  0x18   :  { %54 = vrot.lane.b32.xlu0 %v53_v11, %s94_s13 }
  0x7e   :  { %v24_v12 = vpop.permute.xlu0 %23   ;;  %v30_v13 = vpop.permute.xlu1 %29  }
  0x7f   :  { %27 = vst.msk [vmem:[#allocation0 + $0x6] sm:$0x1] %vm19_vm0, %v24_v12   ;;  %33 = vst.msk [vmem:[#allocation0 + $0x1] sm:$0x1] %vm19_vm0, %v30_v13  }
  0x82   :  { %v43_v14 = vpop.permute.xlu0 %42   ;;  %v37_v15 = vpop.permute.xlu1 %36  }
  0x83   :  { %46 = vst.msk [vmem:[#allocation0 + $0x2] sm:$0x1] %vm19_vm0, %v43_v14   ;;  %40 = vst.msk [vmem:[#allocation0 + $0x7] sm:$0x1] %vm19_vm0, %v37_v15  }
  0x86   :  { %v65_v16 = vpop.permute.xlu0 %64   ;;  %v49_v17 = vpop.permute.xlu1 %48  }
  0x87   :  { %68 = vst.msk [vmem:[#allocation0 + $0x5] sm:$0x1] %vm66_vm2, %v65_v16  }
  0x88   :  { %52 = vst.msk [vmem:[#allocation0 + $0x3] sm:$0x1] %vm19_vm0, %v49_v17  }
  0x89   :  { %71 = vst.msk [vmem:[#allocation0 + $0x5] sm:$0x1] %vm69_vm3, %v65_v16  }
  0x8a   :  { %v55_v18 = vpop.permute.xlu0 %54  }
  0x8b   :  { %58 = vst.msk [vmem:[#allocation0 + $0x4] sm:$0x1] %vm19_vm0, %v55_v18  }
  0x92   :  { %v76_v19 = vld [vmem:[#allocation0] sm:$0xff] }
  0x93   :  { %v77_v21 = vpack.c.bf16 %v95_v20, %v76_v19 }
  0x95   :  { %79 = vst [vmem:[%s120_s1] sm:$0xf] %v77_v21 }

// kernel: _lambda_.62
= control target key start
LH: loop header
LB: loop body
LE: loop exit
PB: predicated region body
PF: predicated region fallthrough
CT: control target
= control target key end

     0   :  { %v110_v0 = vmov 0.0   ;;  %vm39_vm0 = vcmask 1041408   ;;  %vm111_vm1 = vmmov 0   ;;  %vm35_vm2 = vcmask 162816   ;;  %s147_s1 = inlined_call_operand.vmem [shape: bf16[20,4], index: 1, kind: input, shape index: {}]   ;;  %s148_s0 = inlined_call_operand.vmem [shape: bf16[8,20], index: 0, kind: input, shape index: {}]   ;;  %s149_s2 = inlined_call_operand.vmem [shape: f32[1,4], index: 2, kind: input, shape index: {}]   ;;  %s150_s3 = inlined_call_operand.vmem [shape: bf16[8,4], index: 3, kind: output, shape index: {}]  }
   0x1   :  { %98 = vmatprep.subr.bf16.mxu0 %v110_v0  ;;  %v108_v1 = vld [vmem:[%s147_s1] sm:$0xff]   ;;  %102 = vmatprep.mubr.msk.bf16.mxu0 %vm111_vm1, %v110_v0  ;;  %v109_v2 = vld [vmem:[%s147_s1 + $0x8] ss:$0 sps:$4 sm:$0x33]   ;;  %vm85_vm3 = vcmask 27648  }
   0x2   :  { %99 = vmatpush3.bf16.msra.mxu0 %v108_v1  ;;  %v41_v3 = vsel %vm39_vm0, %v109_v2, 0  ;;  %v15_v4 = vld [vmem:[%s148_s0] sm:$0xf] }
   0x3   :  { %100 = vmatprep.subr.bf16.mxu0 %v110_v0  ;;  %v91_v5 = vld [vmem:[%s149_s2] ss:$0 sm:$0xff] }
   0x6   :  { %101 = vmatpush3.bf16.msra.mxu0 %v41_v3 }
   0x9   :  { %103 = vmatmul.mubr.msk.bf16.vlgmr.msra.gmra.mrb[0].mxu0 %vm35_vm2, %v15_v4 }
  0xdc   :  { %v77_v6 = vpop.f32.mrb[0].mxu0 }
  0xdd   :  { %v78_v7 = vadd.f32 %v91_v5, %v77_v6  ;;  %v104_v8 = vpop.f32.mrb[1].mxu0 }
  0xde   :  { %v80_v9 = vpop.f32.mrb[2].mxu0 }
  0xdf   :  { %v83_v10 = vmax.f32 %v78_v7, 0.0  ;;  %v105_v11 = vpop.f32.mrb[3].mxu0 }
  0xe1   :  { %v84_v12 = vpack.c.bf16 %v83_v10, %v83_v10 }
  0xe3   :  { %86 = vst.msk [vmem:[%s150_s3] sm:$0xf] %vm85_vm3, %v84_v12 }

// kernel: _lambda_.63
= control target key start
LH: loop header
LB: loop body
LE: loop exit
PB: predicated region body
PF: predicated region fallthrough
CT: control target
= control target key end

     0   :  { %v110_v0 = vmov 0.0   ;;  %vm39_vm0 = vcmask 1043456   ;;  %vm111_vm1 = vmmov 0   ;;  %vm35_vm2 = vcmask 195584   ;;  %s147_s1 = inlined_call_operand.vmem [shape: bf16[24,14], index: 1, kind: input, shape index: {}]   ;;  %s148_s0 = inlined_call_operand.vmem [shape: bf16[8,24], index: 0, kind: input, shape index: {}]   ;;  %s149_s2 = inlined_call_operand.vmem [shape: f32[1,14], index: 2, kind: input, shape index: {}]   ;;  %s150_s3 = inlined_call_operand.vmem [shape: bf16[8,14], index: 3, kind: output, shape index: {}]  }
   0x1   :  { %98 = vmatprep.subr.bf16.mxu0 %v110_v0  ;;  %v108_v1 = vld [vmem:[%s147_s1] sm:$0xff]   ;;  %102 = vmatprep.mubr.msk.bf16.mxu0 %vm111_vm1, %v110_v0  ;;  %v109_v2 = vld [vmem:[%s147_s1 + $0x8] ss:$0 sps:$4 sm:$0xff]   ;;  %vm85_vm3 = vcmask 109568  }
   0x2   :  { %99 = vmatpush3.bf16.msra.mxu0 %v108_v1  ;;  %v41_v3 = vsel %vm39_vm0, %v109_v2, 0  ;;  %v15_v4 = vld [vmem:[%s148_s0] sm:$0xf] }
   0x3   :  { %100 = vmatprep.subr.bf16.mxu0 %v110_v0  ;;  %v91_v5 = vld [vmem:[%s149_s2] ss:$0 sm:$0xff] }
   0x6   :  { %101 = vmatpush3.bf16.msra.mxu0 %v41_v3 }
   0x9   :  { %103 = vmatmul.mubr.msk.bf16.vlgmr.msra.gmra.mrb[0].mxu0 %vm35_vm2, %v15_v4 }
  0xdc   :  { %v77_v6 = vpop.f32.mrb[0].mxu0 }
  0xdd   :  { %v78_v7 = vadd.f32 %v91_v5, %v77_v6  ;;  %v104_v8 = vpop.f32.mrb[1].mxu0 }
  0xde   :  { %v80_v9 = vpop.f32.mrb[2].mxu0 }
  0xdf   :  { %v83_v10 = vmax.f32 %v78_v7, 0.0  ;;  %v105_v11 = vpop.f32.mrb[3].mxu0 }
  0xe1   :  { %v84_v12 = vpack.c.bf16 %v83_v10, %v83_v10 }
  0xe3   :  { %86 = vst.msk [vmem:[%s150_s3] sm:$0xf] %vm85_vm3, %v84_v12 }

// kernel: _lambda_.66
= control target key start
LH: loop header
LB: loop body
LE: loop exit
PB: predicated region body
PF: predicated region fallthrough
CT: control target
= control target key end

     0   :  { %v110_v0 = vmov 0.0   ;;  %vm39_vm0 = vcmask 1043456   ;;  %vm111_vm1 = vmmov 0   ;;  %vm35_vm2 = vcmask 195584   ;;  %s147_s1 = inlined_call_operand.vmem [shape: bf16[24,4], index: 1, kind: input, shape index: {}]   ;;  %s148_s0 = inlined_call_operand.vmem [shape: bf16[8,24], index: 0, kind: input, shape index: {}]   ;;  %s149_s2 = inlined_call_operand.vmem [shape: f32[1,4], index: 2, kind: input, shape index: {}]   ;;  %s150_s3 = inlined_call_operand.vmem [shape: bf16[8,4], index: 3, kind: output, shape index: {}]  }
   0x1   :  { %98 = vmatprep.subr.bf16.mxu0 %v110_v0  ;;  %v108_v1 = vld [vmem:[%s147_s1] sm:$0xff]   ;;  %102 = vmatprep.mubr.msk.bf16.mxu0 %vm111_vm1, %v110_v0  ;;  %v109_v2 = vld [vmem:[%s147_s1 + $0x8] ss:$0 sps:$4 sm:$0xff]   ;;  %vm85_vm3 = vcmask 27648  }
   0x2   :  { %99 = vmatpush3.bf16.msra.mxu0 %v108_v1  ;;  %v41_v3 = vsel %vm39_vm0, %v109_v2, 0  ;;  %v15_v4 = vld [vmem:[%s148_s0] sm:$0xf] }
   0x3   :  { %100 = vmatprep.subr.bf16.mxu0 %v110_v0  ;;  %v91_v5 = vld [vmem:[%s149_s2] ss:$0 sm:$0xff] }
   0x6   :  { %101 = vmatpush3.bf16.msra.mxu0 %v41_v3 }
   0x9   :  { %103 = vmatmul.mubr.msk.bf16.vlgmr.msra.gmra.mrb[0].mxu0 %vm35_vm2, %v15_v4 }
  0xdc   :  { %v77_v6 = vpop.f32.mrb[0].mxu0 }
  0xdd   :  { %v78_v7 = vadd.f32 %v91_v5, %v77_v6  ;;  %v104_v8 = vpop.f32.mrb[1].mxu0 }
  0xde   :  { %v80_v9 = vpop.f32.mrb[2].mxu0 }
  0xdf   :  { %v83_v10 = vmax.f32 %v78_v7, 0.0  ;;  %v105_v11 = vpop.f32.mrb[3].mxu0 }
  0xe1   :  { %v84_v12 = vpack.c.bf16 %v83_v10, %v83_v10 }
  0xe3   :  { %86 = vst.msk [vmem:[%s150_s3] sm:$0xf] %vm85_vm3, %v84_v12 }

// kernel: _lambda_.75
= control target key start
LH: loop header
LB: loop body
LE: loop exit
PB: predicated region body
PF: predicated region fallthrough
CT: control target
= control target key end

     0   :  { %v110_v0 = vmov 0.0   ;;  %vm39_vm0 = vcmask 1043456   ;;  %vm111_vm1 = vmmov 0   ;;  %vm35_vm2 = vcmask 195584   ;;  %s147_s1 = inlined_call_operand.vmem [shape: bf16[24,20], index: 1, kind: input, shape index: {}]   ;;  %s148_s0 = inlined_call_operand.vmem [shape: bf16[8,24], index: 0, kind: input, shape index: {}]   ;;  %s149_s2 = inlined_call_operand.vmem [shape: f32[1,20], index: 2, kind: input, shape index: {}]   ;;  %s150_s3 = inlined_call_operand.vmem [shape: bf16[8,20], index: 3, kind: output, shape index: {}]  }
   0x1   :  { %98 = vmatprep.subr.bf16.mxu0 %v110_v0  ;;  %v108_v1 = vld [vmem:[%s147_s1] sm:$0xff]   ;;  %102 = vmatprep.mubr.msk.bf16.mxu0 %vm111_vm1, %v110_v0  ;;  %v109_v2 = vld [vmem:[%s147_s1 + $0x8] ss:$0 sps:$4 sm:$0xff]   ;;  %vm85_vm3 = vcmask 158720  }
   0x2   :  { %99 = vmatpush3.bf16.msra.mxu0 %v108_v1  ;;  %v41_v3 = vsel %vm39_vm0, %v109_v2, 0  ;;  %v15_v4 = vld [vmem:[%s148_s0] sm:$0xf] }
   0x3   :  { %100 = vmatprep.subr.bf16.mxu0 %v110_v0  ;;  %v91_v5 = vld [vmem:[%s149_s2] ss:$0 sm:$0xff] }
   0x6   :  { %101 = vmatpush3.bf16.msra.mxu0 %v41_v3 }
   0x9   :  { %103 = vmatmul.mubr.msk.bf16.vlgmr.msra.gmra.mrb[0].mxu0 %vm35_vm2, %v15_v4 }
  0xdc   :  { %v77_v6 = vpop.f32.mrb[0].mxu0 }
  0xdd   :  { %v78_v7 = vadd.f32 %v91_v5, %v77_v6  ;;  %v104_v8 = vpop.f32.mrb[1].mxu0 }
  0xde   :  { %v80_v9 = vpop.f32.mrb[2].mxu0 }
  0xdf   :  { %v83_v10 = vmax.f32 %v78_v7, 0.0  ;;  %v105_v11 = vpop.f32.mrb[3].mxu0 }
  0xe1   :  { %v84_v12 = vpack.c.bf16 %v83_v10, %v83_v10 }
  0xe3   :  { %86 = vst.msk [vmem:[%s150_s3] sm:$0xf] %vm85_vm3, %v84_v12 }

// kernel: _lambda_.78
= control target key start
LH: loop header
LB: loop body
LE: loop exit
PB: predicated region body
PF: predicated region fallthrough
CT: control target
= control target key end

     0   :  { %v110_v0 = vmov 0.0   ;;  %vm39_vm0 = vcmask 1043456   ;;  %vm111_vm1 = vmmov 0   ;;  %vm35_vm2 = vcmask 195584   ;;  %s147_s1 = inlined_call_operand.vmem [shape: bf16[24,8], index: 1, kind: input, shape index: {}]   ;;  %s148_s0 = inlined_call_operand.vmem [shape: bf16[8,24], index: 0, kind: input, shape index: {}]   ;;  %s149_s2 = inlined_call_operand.vmem [shape: f32[1,8], index: 2, kind: input, shape index: {}]   ;;  %s150_s3 = inlined_call_operand.vmem [shape: bf16[8,8], index: 3, kind: output, shape index: {}]  }
   0x1   :  { %98 = vmatprep.subr.bf16.mxu0 %v110_v0  ;;  %v108_v1 = vld [vmem:[%s147_s1] sm:$0xff]   ;;  %102 = vmatprep.mubr.msk.bf16.mxu0 %vm111_vm1, %v110_v0  ;;  %v109_v2 = vld [vmem:[%s147_s1 + $0x8] ss:$0 sps:$4 sm:$0xff]   ;;  %vm85_vm3 = vcmask 60416  }
   0x2   :  { %99 = vmatpush3.bf16.msra.mxu0 %v108_v1  ;;  %v41_v3 = vsel %vm39_vm0, %v109_v2, 0  ;;  %v15_v4 = vld [vmem:[%s148_s0] sm:$0xf] }
   0x3   :  { %100 = vmatprep.subr.bf16.mxu0 %v110_v0  ;;  %v91_v5 = vld [vmem:[%s149_s2] ss:$0 sm:$0xff] }
   0x6   :  { %101 = vmatpush3.bf16.msra.mxu0 %v41_v3 }
   0x9   :  { %103 = vmatmul.mubr.msk.bf16.vlgmr.msra.gmra.mrb[0].mxu0 %vm35_vm2, %v15_v4 }
  0xdc   :  { %v77_v6 = vpop.f32.mrb[0].mxu0 }
  0xdd   :  { %v78_v7 = vadd.f32 %v91_v5, %v77_v6  ;;  %v104_v8 = vpop.f32.mrb[1].mxu0 }
  0xde   :  { %v80_v9 = vpop.f32.mrb[2].mxu0 }
  0xdf   :  { %v83_v10 = vmax.f32 %v78_v7, 0.0  ;;  %v105_v11 = vpop.f32.mrb[3].mxu0 }
  0xe1   :  { %v84_v12 = vpack.c.bf16 %v83_v10, %v83_v10 }
  0xe3   :  { %86 = vst.msk [vmem:[%s150_s3] sm:$0xf] %vm85_vm3, %v84_v12 }

// kernel: squeeze.30
= control target key start
LH: loop header
LB: loop body
LE: loop exit
PB: predicated region body
PF: predicated region fallthrough
CT: control target
= control target key end

     0   :  { %vm19_vm0 = vcmask 326656   ;;  %v38_v6 = vmov 0.0   ;;  %s55_s0 = inlined_call_operand.vmem [shape: bf16[80], index: 0, kind: input, shape index: {}]   ;;  %s56_s1 = inlined_call_operand.vmem [shape: bf16[2,40], index: 1, kind: output, shape index: {}]  }
   0x1   :  { %v14_v0 = vld [vmem:[%s55_s0] sm:$0x1]  ;;  %s37_s0 = smov 88  }
   0x2   :  { %v15_v1 = vunpack.c.l.bf16 %v14_v0 }
   0x4   :  { %17 = vst [vmem:[#allocation1] sm:$0x3] %v15_v1 }
   0xb   :  { %v21_v2 = vld [vmem:[#allocation1] sm:$0x1]  }
   0xc   :  { %v18_v3 = vld [vmem:[#allocation1] sm:$0x1]   ;;  %22 = vrot.lane.b32.xlu0 %v21_v2, %s37_s0 }
   0xd   :  { %20 = vst.msk [vmem:[#allocation0] sm:$0x1] %vm19_vm0, %v18_v3  }
  0x7e   :  { %v23_v4 = vpop.permute.xlu0 %22  }
  0x7f   :  { %26 = vst.msk [vmem:[#allocation0 + $0x1] sm:$0x1] %vm19_vm0, %v23_v4  }
  0x86   :  { %v31_v5 = vld [vmem:[#allocation0] sm:$0x3] }
  0x87   :  { %v32_v7 = vpack.c.bf16 %v38_v6, %v31_v5 }
  0x89   :  { %34 = vst [vmem:[%s56_s1] sm:$0x1] %v32_v7 }

// kernel: _lambda_.76
= control target key start
LH: loop header
LB: loop body
LE: loop exit
PB: predicated region body
PF: predicated region fallthrough
CT: control target
= control target key end

     0   :  { %v178_v0 = vmov 0.0   ;;  %vm179_vm0 = vmmov 0   ;;  %vm82_vm1 = vcmask 1045504   ;;  %vm78_vm2 = vcmask 883712   ;;  %s230_s1 = inlined_call_operand.vmem [shape: bf16[108,24], index: 1, kind: input, shape index: {}]   ;;  %s231_s0 = inlined_call_operand.vmem [shape: bf16[8,108], index: 0, kind: input, shape index: {}]   ;;  %s232_s2 = inlined_call_operand.vmem [shape: f32[1,24], index: 2, kind: input, shape index: {}]   ;;  %s233_s3 = inlined_call_operand.vmem [shape: bf16[8,24], index: 3, kind: output, shape index: {}]  }
   0x1   :  { %151 = vmatprep.subr.bf16.mxu0 %v178_v0  ;;  %v171_v1 = vld [vmem:[%s230_s1] sm:$0xff]   ;;  %165 = vmatprep.mubr.msk.bf16.mxu0 %vm179_vm0, %v178_v0  ;;  %v172_v2 = vld [vmem:[%s230_s1 + $0x8] sm:$0xff]   ;;  %v173_v3 = vld [vmem:[%s230_s1 + $0x10] sm:$0xff]   ;;  %vm128_vm3 = vcmask 191488  }
   0x2   :  { %152 = vmatpush3.bf16.msra.mxu0 %v171_v1  ;;  %v174_v4 = vld [vmem:[%s230_s1 + $0x18] sm:$0xff]   ;;  %v175_v5 = vld [vmem:[%s230_s1 + $0x20] sm:$0xff]   ;;  %v176_v6 = vld [vmem:[%s230_s1 + $0x28] sm:$0xff]  }
   0x3   :  { %153 = vmatprep.subr.bf16.mxu0 %v178_v0  ;;  %v177_v7 = vld [vmem:[%s230_s1 + $0x30] sm:$0x3f]   ;;  %v15_v9 = vld [vmem:[%s231_s0] sm:$0xf] }
   0x4   :  { %v84_v8 = vsel %vm82_vm1, %v177_v7, 0  ;;  %v134_v10 = vld [vmem:[%s232_s2] ss:$0 sm:$0xff] }
   0x6   :  { %154 = vmatpush3.bf16.msra.mxu0 %v172_v2 }
   0x7   :  { %155 = vmatprep.subr.bf16.mxu0 %v178_v0 }
   0xa   :  { %156 = vmatpush3.bf16.msra.mxu0 %v173_v3 }
   0xb   :  { %157 = vmatprep.subr.bf16.mxu0 %v178_v0 }
   0xe   :  { %158 = vmatpush3.bf16.msra.mxu0 %v174_v4 }
   0xf   :  { %159 = vmatprep.subr.bf16.mxu0 %v178_v0 }
  0x12   :  { %160 = vmatpush3.bf16.msra.mxu0 %v175_v5 }
  0x13   :  { %161 = vmatprep.subr.bf16.mxu0 %v178_v0 }
  0x16   :  { %162 = vmatpush3.bf16.msra.mxu0 %v176_v6 }
  0x17   :  { %163 = vmatprep.subr.bf16.mxu0 %v178_v0 }
  0x1a   :  { %164 = vmatpush3.bf16.msra.mxu0 %v84_v8 }
  0x1d   :  { %166 = vmatmul.mubr.msk.bf16.vlgmr.msra.gmra.mrb[0].mxu0 %vm78_vm2, %v15_v9 }
  0xf0   :  { %v120_v11 = vpop.f32.mrb[0].mxu0 }
  0xf1   :  { %v121_v12 = vadd.f32 %v134_v10, %v120_v11  ;;  %v167_v13 = vpop.f32.mrb[1].mxu0 }
  0xf2   :  { %v123_v14 = vpop.f32.mrb[2].mxu0 }
  0xf3   :  { %v126_v15 = vmax.f32 %v121_v12, 0.0  ;;  %v168_v16 = vpop.f32.mrb[3].mxu0 }
  0xf5   :  { %v127_v17 = vpack.c.bf16 %v126_v15, %v126_v15 }
  0xf7   :  { %129 = vst.msk [vmem:[%s233_s3] sm:$0xf] %vm128_vm3, %v127_v17 }

// kernel: _lambda_.79
= control target key start
LH: loop header
LB: loop body
LE: loop exit
PB: predicated region body
PF: predicated region fallthrough
CT: control target
= control target key end

     0   :  { %vm10_vm0 = vcmask 1041408   ;;  %vm25_vm1 = vcmask 1040384   ;;  %vm26_vm2 = vsmask.f32 256  ;;  %s54_s0 = inlined_call_operand.vmem [shape: bf16[4,128], index: 0, kind: input, shape index: {}]   ;;  %s55_s1 = inlined_call_operand.vmem [shape: bf16[1,128], index: 1, kind: output, shape index: {}]  }
   0x1   :  { %v9_v0 = vld [vmem:[%s54_s0] sm:$0x3]  ;;  %vm27_vm3 = vmand %vm25_vm1, %vm26_vm2 }
   0x2   :  { %v13_v1 = vsel %vm10_vm0, %v9_v0, 4286644096  ;;  %v28_v11 = vld [vmem:[%s55_s1] sm:$0x1] }
   0x3   :  { %v15_v2 = vunpack.i.l.bf16 %v13_v1  ;;  %v16_v3 = vunpack.i.h.bf16 %v13_v1 }
   0x5   :  { %v17_v4 = vmax.f32 %v15_v2, %v16_v3 }
   0x7   :  { %v18_v5 = vrot.slane %v17_v4, 4 }
   0x9   :  { %v19_v6 = vmax.f32 %v17_v4, %v18_v5 }
   0xb   :  { %v20_v7 = vrot.slane %v19_v6, 2 }
   0xd   :  { %v21_v8 = vmax.f32 %v19_v6, %v20_v7 }
   0xf   :  { %v22_v9 = vrot.slane %v21_v8, 1 }
  0x11   :  { %v23_v10 = vmax.f32 %v21_v8, %v22_v9 }
  0x13   :  { %v24_v12 = vpack.i.bf16 %v23_v10, %v23_v10 }
  0x15   :  { %v29_v13 = vsel %vm27_vm3, %v24_v12, %v28_v11 }
  0x16   :  { %30 = vst [vmem:[%s55_s1] sm:$0x1] %v29_v13 }

// kernel: _lambda_.82
= control target key start
LH: loop header
LB: loop body
LE: loop exit
PB: predicated region body
PF: predicated region fallthrough
CT: control target
= control target key end

     0   :  { %vm17_vm0 = vcmask 1044480   ;;  %vm18_vm1 = vsmask.f32 4352  ;;  %vm31_vm3 = vcmask 1040384   ;;  %vm32_vm4 = vsmask.f32 256  ;;  %s62_s0 = inlined_call_operand.vmem [shape: bf16[9,128], index: 0, kind: input, shape index: {}]   ;;  %s63_s1 = inlined_call_operand.vmem [shape: bf16[1,128], index: 1, kind: output, shape index: {}]  }
   0x1   :  { %v42_v0 = vld [vmem:[%s62_s0] sm:$0x1f]   ;;  %vm19_vm2 = vmand %vm17_vm0, %vm18_vm1 }
   0x2   :  { %v20_v1 = vsel %vm19_vm2, %v42_v0, 4286644096  ;;  %vm33_vm5 = vmand %vm31_vm3, %vm32_vm4  ;;  %v34_v11 = vld [vmem:[%s63_s1] sm:$0x1] }
   0x3   :  { %v21_v2 = vunpack.i.l.bf16 %v20_v1  ;;  %v22_v3 = vunpack.i.h.bf16 %v20_v1 }
   0x5   :  { %v23_v4 = vmax.f32 %v21_v2, %v22_v3 }
   0x7   :  { %v24_v5 = vrot.slane %v23_v4, 4 }
   0x9   :  { %v25_v6 = vmax.f32 %v23_v4, %v24_v5 }
   0xb   :  { %v26_v7 = vrot.slane %v25_v6, 2 }
   0xd   :  { %v27_v8 = vmax.f32 %v25_v6, %v26_v7 }
   0xf   :  { %v28_v9 = vrot.slane %v27_v8, 1 }
  0x11   :  { %v29_v10 = vmax.f32 %v27_v8, %v28_v9 }
  0x13   :  { %v30_v12 = vpack.i.bf16 %v29_v10, %v29_v10 }
  0x15   :  { %v35_v13 = vsel %vm33_vm5, %v30_v12, %v34_v11 }
  0x16   :  { %36 = vst [vmem:[%s63_s1] sm:$0x1] %v35_v13 }

// kernel: _lambda_.83
= control target key start
LH: loop header
LB: loop body
LE: loop exit
PB: predicated region body
PF: predicated region fallthrough
CT: control target
= control target key end

     0   :  { %v123_v0 = vmov 0.0   ;;  %vm124_vm0 = vmmov 0   ;;  %vm47_vm1 = vcmask 1043456   ;;  %vm43_vm2 = vcmask 326656   ;;  %s163_s1 = inlined_call_operand.vmem [shape: bf16[40,8], index: 1, kind: input, shape index: {}]   ;;  %s164_s0 = inlined_call_operand.vmem [shape: bf16[8,40], index: 0, kind: input, shape index: {}]   ;;  %s165_s2 = inlined_call_operand.vmem [shape: f32[1,8], index: 2, kind: input, shape index: {}]   ;;  %s166_s3 = inlined_call_operand.vmem [shape: bf16[8,8], index: 3, kind: output, shape index: {}]  }
   0x1   :  { %108 = vmatprep.subr.bf16.mxu0 %v123_v0  ;;  %v120_v1 = vld [vmem:[%s163_s1] sm:$0xff]   ;;  %114 = vmatprep.mubr.msk.bf16.mxu0 %vm124_vm0, %v123_v0  ;;  %v121_v2 = vld [vmem:[%s163_s1 + $0x8] sm:$0xff]   ;;  %v122_v3 = vld [vmem:[%s163_s1 + $0x10] ss:$0 sps:$4 sm:$0xff]   ;;  %vm93_vm3 = vcmask 60416  }
   0x2   :  { %109 = vmatpush3.bf16.msra.mxu0 %v120_v1  ;;  %v49_v4 = vsel %vm47_vm1, %v122_v3, 0  ;;  %v15_v5 = vld [vmem:[%s164_s0] sm:$0xf] }
   0x3   :  { %110 = vmatprep.subr.bf16.mxu0 %v123_v0  ;;  %v99_v6 = vld [vmem:[%s165_s2] ss:$0 sm:$0xff] }
   0x6   :  { %111 = vmatpush3.bf16.msra.mxu0 %v121_v2 }
   0x7   :  { %112 = vmatprep.subr.bf16.mxu0 %v123_v0 }
   0xa   :  { %113 = vmatpush3.bf16.msra.mxu0 %v49_v4 }
   0xd   :  { %115 = vmatmul.mubr.msk.bf16.vlgmr.msra.gmra.mrb[0].mxu0 %vm43_vm2, %v15_v5 }
  0xe0   :  { %v85_v7 = vpop.f32.mrb[0].mxu0 }
  0xe1   :  { %v86_v8 = vadd.f32 %v99_v6, %v85_v7  ;;  %v116_v9 = vpop.f32.mrb[1].mxu0 }
  0xe2   :  { %v88_v10 = vpop.f32.mrb[2].mxu0 }
  0xe3   :  { %v91_v11 = vmax.f32 %v86_v8, 0.0  ;;  %v117_v12 = vpop.f32.mrb[3].mxu0 }
  0xe5   :  { %v92_v13 = vpack.c.bf16 %v91_v11, %v91_v11 }
  0xe7   :  { %94 = vst.msk [vmem:[%s166_s3] sm:$0xf] %vm93_vm3, %v92_v13 }

// kernel: _lambda_.80
= control target key start
LH: loop header
LB: loop body
LE: loop exit
PB: predicated region body
PF: predicated region fallthrough
CT: control target
= control target key end

     0   :  { %v123_v0 = vmov 0.0   ;;  %vm124_vm0 = vmmov 0   ;;  %vm47_vm1 = vcmask 1043456   ;;  %vm43_vm2 = vcmask 326656   ;;  %s163_s1 = inlined_call_operand.vmem [shape: bf16[40,20], index: 1, kind: input, shape index: {}]   ;;  %s164_s0 = inlined_call_operand.vmem [shape: bf16[8,40], index: 0, kind: input, shape index: {}]   ;;  %s165_s2 = inlined_call_operand.vmem [shape: f32[1,20], index: 2, kind: input, shape index: {}]   ;;  %s166_s3 = inlined_call_operand.vmem [shape: bf16[8,20], index: 3, kind: output, shape index: {}]  }
   0x1   :  { %108 = vmatprep.subr.bf16.mxu0 %v123_v0  ;;  %v120_v1 = vld [vmem:[%s163_s1] sm:$0xff]   ;;  %114 = vmatprep.mubr.msk.bf16.mxu0 %vm124_vm0, %v123_v0  ;;  %v121_v2 = vld [vmem:[%s163_s1 + $0x8] sm:$0xff]   ;;  %v122_v3 = vld [vmem:[%s163_s1 + $0x10] ss:$0 sps:$4 sm:$0xff]   ;;  %vm93_vm3 = vcmask 158720  }
   0x2   :  { %109 = vmatpush3.bf16.msra.mxu0 %v120_v1  ;;  %v49_v4 = vsel %vm47_vm1, %v122_v3, 0  ;;  %v15_v5 = vld [vmem:[%s164_s0] sm:$0xf] }
   0x3   :  { %110 = vmatprep.subr.bf16.mxu0 %v123_v0  ;;  %v99_v6 = vld [vmem:[%s165_s2] ss:$0 sm:$0xff] }
   0x6   :  { %111 = vmatpush3.bf16.msra.mxu0 %v121_v2 }
   0x7   :  { %112 = vmatprep.subr.bf16.mxu0 %v123_v0 }
   0xa   :  { %113 = vmatpush3.bf16.msra.mxu0 %v49_v4 }
   0xd   :  { %115 = vmatmul.mubr.msk.bf16.vlgmr.msra.gmra.mrb[0].mxu0 %vm43_vm2, %v15_v5 }
  0xe0   :  { %v85_v7 = vpop.f32.mrb[0].mxu0 }
  0xe1   :  { %v86_v8 = vadd.f32 %v99_v6, %v85_v7  ;;  %v116_v9 = vpop.f32.mrb[1].mxu0 }
  0xe2   :  { %v88_v10 = vpop.f32.mrb[2].mxu0 }
  0xe3   :  { %v91_v11 = vmax.f32 %v86_v8, 0.0  ;;  %v117_v12 = vpop.f32.mrb[3].mxu0 }
  0xe5   :  { %v92_v13 = vpack.c.bf16 %v91_v11, %v91_v11 }
  0xe7   :  { %94 = vst.msk [vmem:[%s166_s3] sm:$0xf] %vm93_vm3, %v92_v13 }

// kernel: _lambda_.88
= control target key start
LH: loop header
LB: loop body
LE: loop exit
PB: predicated region body
PF: predicated region fallthrough
CT: control target
= control target key end

     0   :  { %v16_v0 = vlaneseq  ;;  %vm24_vm0 = vcmask 1041409   ;;  %vm27_vm1 = vcmask 320512   ;;  %s52_s0 = inlined_call_operand.vmem [shape: bf16[2,1,40], index: 0, kind: input, shape index: {}]   ;;  %s53_s1 = inlined_call_operand.vmem [shape: f32[2,40], index: 1, kind: output, shape index: {}]  }
   0x1   :  { %v8_v1 = vld [vmem:[%s52_s0] sm:$0x1]  ;;  %v9_v2 = vld [vmem:[%s52_s0 + $0x1] sm:$0x1] }
   0x2   :  { %v10_v3 = vunpack.c.l.bf16 %v8_v1  ;;  %v11_v4 = vunpack.c.l.bf16 %v9_v2  ;;  %v17_v5 = vshrl.u32 %v16_v0, 7 }
   0x4   :  { %v18_v6 = vsub.s32 0, %v17_v5 }
   0x6   :  { %v19_v7 = vrot.slane %v10_v3, %v18_v6  ;;  %v23_v8 = vrot.slane %v11_v4, %v18_v6 }
   0x8   :  { %v25_v9 = vsel %vm24_vm0, %v23_v8, %v19_v7 }
   0x9   :  { %28 = vst.msk [vmem:[%s53_s1] sm:$0x3] %vm27_vm1, %v25_v9 }

// kernel: _lambda_.89
= control target key start
LH: loop header
LB: loop body
LE: loop exit
PB: predicated region body
PF: predicated region fallthrough
CT: control target
= control target key end

     0   :  { %v121_v0 = vmov 0.0   ;;  %vm122_vm0 = vmmov 0   ;;  %vm47_vm1 = vcmask 1043456   ;;  %vm43_vm2 = vcmask 326656   ;;  %s161_s1 = inlined_call_operand.vmem [shape: bf16[40,100], index: 1, kind: input, shape index: {}]   ;;  %s162_s0 = inlined_call_operand.vmem [shape: bf16[8,40], index: 0, kind: input, shape index: {}]   ;;  %s163_s2 = inlined_call_operand.vmem [shape: f32[1,100], index: 2, kind: input, shape index: {}]   ;;  %s164_s3 = inlined_call_operand.vmem [shape: f32[8,100], index: 3, kind: output, shape index: {}]  }
   0x1   :  { %106 = vmatprep.subr.bf16.mxu0 %v121_v0  ;;  %v118_v1 = vld [vmem:[%s161_s1] sm:$0xff]   ;;  %112 = vmatprep.mubr.msk.bf16.mxu0 %vm122_vm0, %v121_v0  ;;  %v119_v2 = vld [vmem:[%s161_s1 + $0x8] sm:$0xff]   ;;  %v120_v3 = vld [vmem:[%s161_s1 + $0x10] ss:$0 sps:$4 sm:$0xff]   ;;  %vm91_vm3 = vcmask 818176  }
   0x2   :  { %107 = vmatpush3.bf16.msra.mxu0 %v118_v1  ;;  %v49_v4 = vsel %vm47_vm1, %v120_v3, 0  ;;  %v15_v5 = vld [vmem:[%s162_s0] sm:$0xf] }
   0x3   :  { %108 = vmatprep.subr.bf16.mxu0 %v121_v0  ;;  %v97_v6 = vld [vmem:[%s163_s2] ss:$0 sm:$0xff] }
   0x6   :  { %109 = vmatpush3.bf16.msra.mxu0 %v119_v2 }
   0x7   :  { %110 = vmatprep.subr.bf16.mxu0 %v121_v0 }
   0xa   :  { %111 = vmatpush3.bf16.msra.mxu0 %v49_v4 }
   0xd   :  { %113 = vmatmul.mubr.msk.bf16.vlgmr.msra.gmra.mrb[0].mxu0 %vm43_vm2, %v15_v5 }
  0xe0   :  { %v85_v7 = vpop.f32.mrb[0].mxu0 }
  0xe1   :  { %v86_v8 = vadd.f32 %v97_v6, %v85_v7  ;;  %v114_v9 = vpop.f32.mrb[1].mxu0 }
  0xe2   :  { %v88_v10 = vpop.f32.mrb[2].mxu0 }
  0xe3   :  { %92 = vst.msk [vmem:[%s164_s3] sm:$0xff] %vm91_vm3, %v86_v8  ;;  %v115_v11 = vpop.f32.mrb[3].mxu0 }

</bundles_post_ra>
